<compile_context>
chip_gen: v7x
topology: tpu7x:2x2x1
jax: 0.10.0
libtpu: 0.0.40
codegen_flags: <defaults>
</compile_context>

<pallas_src>
import jax
import jax.numpy as jnp
from jax.experimental import pallas as pl
from jax.experimental.pallas import tpu as pltpu


def _round_up(x, m):
    return ((x + m - 1) // m) * m


# ---------------- Pallas GEMM kernels (conv hot path) ----------------
def _mm_kernel(w_ref, a_ref, o_ref):
    o_ref[...] = jnp.dot(w_ref[...], a_ref[...],
                         preferred_element_type=jnp.float32)


def _mm_bias_kernel(w_ref, a_ref, b_ref, o_ref):
    o_ref[...] = (jnp.dot(w_ref[...], a_ref[...],
                          preferred_element_type=jnp.float32)
                  + b_ref[...])


def pallas_matmul_bias(wm, a, b=None):
    """wm: (cout, K), a: (K, M)  ->  f32 (cout, M) = wm @ a (+ b).

    Inputs are cast to bf16 (f32 accumulate on the MXU); bias add is fused into
    the kernel epilogue. Only the lane axis M is tiled (grid marked parallel).
    """
    cout, K = wm.shape
    K2, M = a.shape
    assert K == K2
    wm = wm.astype(jnp.bfloat16)
    a = a.astype(jnp.bfloat16)

    coutp = _round_up(cout, 8)          # sublane alignment for the tiny W operand
    Mp = _round_up(M, 128)              # lane alignment for the big spatial axis
    if coutp != cout:
        wm = jnp.pad(wm, ((0, coutp - cout), (0, 0)))
    if Mp != M:
        a = jnp.pad(a, ((0, 0), (0, Mp - M)))

    if Mp % 512 == 0:
        tile_m = 512
    elif Mp % 256 == 0:
        tile_m = 256
    else:
        tile_m = 128
    grid = (Mp // tile_m,)

    in_specs = [pl.BlockSpec((coutp, K), lambda i: (0, 0)),
                pl.BlockSpec((K, tile_m), lambda i: (0, i))]
    operands = [wm, a]
    if b is not None:
        bcol = b.astype(jnp.float32).reshape(cout, 1)
        if coutp != cout:
            bcol = jnp.pad(bcol, ((0, coutp - cout), (0, 0)))
        in_specs.append(pl.BlockSpec((coutp, 1), lambda i: (0, 0)))
        operands.append(bcol)
        kernel = _mm_bias_kernel
    else:
        kernel = _mm_kernel

    out = pl.pallas_call(
        kernel,
        out_shape=jax.ShapeDtypeStruct((coutp, Mp), jnp.float32),
        grid=grid,
        in_specs=in_specs,
        out_specs=pl.BlockSpec((coutp, tile_m), lambda i: (0, i)),
        compiler_params=pltpu.CompilerParams(
            dimension_semantics=("parallel",)),
    )(*operands)

    if coutp != cout or Mp != M:
        out = out[:cout, :M]
    return out


# ---------------- conv / norm / activation helpers ----------------
def conv2d(x, cp, kh, kw, stride=1, zero_pad=0, reflect_pad=0):
    """x: (C, N, H, W) f32 -> (cout, N, Ho, Wo) f32.  cp = {"wm": (cout,K) bf16, "b": f32|None}."""
    wm, b = cp["wm"], cp["b"]
    if reflect_pad:
        x = jnp.pad(x, ((0, 0), (0, 0), (reflect_pad,) * 2, (reflect_pad,) * 2),
                    mode="reflect")
    if zero_pad:
        x = jnp.pad(x, ((0, 0), (0, 0), (zero_pad,) * 2, (zero_pad,) * 2))
    c, n, h, w = x.shape
    ho = (h - kh) // stride + 1
    wo = (w - kw) // stride + 1
    xb = x.astype(jnp.bfloat16)
    if kh == 1 and kw == 1 and stride == 1:
        a = xb.reshape(c, n * h * w)
    else:
        patches = [xb[:, :, i:i + stride * ho:stride, j:j + stride * wo:stride]
                   for i in range(kh) for j in range(kw)]
        # (C, kh*kw, N, Ho, Wo) -> (C*kh*kw, N*Ho*Wo); K ordering matches
        # PyTorch weight.reshape(cout, cin*kh*kw).
        a = jnp.stack(patches, axis=1).reshape(c * kh * kw, n * ho * wo)
    out = pallas_matmul_bias(wm, a, b)
    return out.reshape(wm.shape[0], n, ho, wo)


def batchnorm(x, p, with_relu=False, eps=1e-5):
    # training-mode BatchNorm2d, single-pass batch stats over (N, H, W); x is (C,N,H,W)
    mean = x.mean(axis=(1, 2, 3), keepdims=True)
    mean_sq = (x * x).mean(axis=(1, 2, 3), keepdims=True)
    var = jnp.maximum(mean_sq - mean * mean, 0.0)
    scale = p["gamma"].reshape(-1, 1, 1, 1) * jax.lax.rsqrt(var + eps)
    shift = p["beta"].reshape(-1, 1, 1, 1) - mean * scale
    y = x * scale + shift
    return jnp.maximum(y, 0.0) if with_relu else y


def upsample2x_bilinear(x):
    # nn.Upsample(scale_factor=2, mode='bilinear', align_corners=True) on (C,N,H,W),
    # expressed as two dense interpolation matmuls (MXU-friendly, no gathers).
    c, n, h, w = x.shape
    ho, wo = 2 * h, 2 * w

    def interp_matrix(isz, osz):
        src = jnp.arange(osz, dtype=jnp.float32) * (isz - 1) / (osz - 1)
        lo = jnp.clip(jnp.floor(src).astype(jnp.int32), 0, isz - 2)
        frac = src - lo.astype(jnp.float32)
        rows = jnp.arange(osz)
        m = jnp.zeros((osz, isz), jnp.float32)
        m = m.at[rows, lo].add(1.0 - frac)
        m = m.at[rows, lo + 1].add(frac)
        return m

    uy = interp_matrix(h, ho)   # (ho, h)
    ux = interp_matrix(w, wo)   # (wo, w)
    t = jnp.einsum("ph,cnhw->cnpw", uy, x)
    return jnp.einsum("cnpw,qw->cnpq", t, ux)


# ---------------- deterministic parameter construction ----------------
class ParamGen:
    def __init__(self, seed=42):
        self.key = jax.random.PRNGKey(seed)

    def _next(self):
        self.key, k = jax.random.split(self.key)
        return k

    def conv(self, cin, cout, kh, kw, bias=True):
        fan_in = cin * kh * kw
        w = jax.random.normal(self._next(), (cout, cin, kh, kw), jnp.float32)
        w = w / jnp.sqrt(float(fan_in))
        b = (0.01 * jax.random.normal(self._next(), (cout,), jnp.float32)
             if bias else None)
        # pre-pack to the GEMM layout (cout, cin*kh*kw) in bf16 once, outside forward
        return {"wm": w.reshape(cout, cin * kh * kw).astype(jnp.bfloat16), "b": b}

    def bn(self, c):
        return {"gamma": jnp.ones((c,), jnp.float32),
                "beta": jnp.zeros((c,), jnp.float32)}

    def resblk(self, dim):
        return {"c1": self.conv(dim, dim, 3, 3), "bn1": self.bn(dim),
                "c2": self.conv(dim, dim, 3, 3), "bn2": self.bn(dim)}


def init_network_params(inp, output, ngf, nf_part, n_block1, n_block2, seed=42):
    g = ParamGen(seed)
    p = {}
    # encoder1 / encoder2
    p["enc1_c0"] = g.conv(inp[0], ngf, 7, 7); p["enc1_bn0"] = g.bn(ngf)
    p["enc1_c1"] = g.conv(ngf, ngf * 2, 3, 3); p["enc1_bn1"] = g.bn(ngf * 2)
    p["enc2_c0"] = g.conv(ngf * 2, ngf * 4, 3, 3); p["enc2_bn0"] = g.bn(ngf * 4)
    # back / seg encoders
    p["back_c0"] = g.conv(inp[1], ngf, 7, 7); p["back_bn0"] = g.bn(ngf)
    p["back_c1"] = g.conv(ngf, ngf * 2, 3, 3); p["back_bn1"] = g.bn(ngf * 2)
    p["back_c2"] = g.conv(ngf * 2, ngf * 4, 3, 3); p["back_bn2"] = g.bn(ngf * 4)
    p["seg_c0"] = g.conv(inp[2], ngf, 7, 7); p["seg_bn0"] = g.bn(ngf)
    p["seg_c1"] = g.conv(ngf, ngf * 2, 3, 3); p["seg_bn1"] = g.bn(ngf * 2)
    p["seg_c2"] = g.conv(ngf * 2, ngf * 4, 3, 3); p["seg_bn2"] = g.bn(ngf * 4)
    # comb_* (module uses normalization(ngf) -> requires ngf == nf_part)
    for name in ("comb_back", "comb_seg", "comb_multi"):
        p[name + "_c"] = g.conv(ngf * 8, nf_part, 1, 1, bias=False)
        p[name + "_bn"] = g.bn(nf_part)
    # resnet decoder
    p["rdec_c0"] = g.conv(ngf * 4 + 3 * nf_part, ngf * 4, 1, 1, bias=False)
    p["rdec_bn0"] = g.bn(ngf * 4)
    p["rdec_blocks"] = [g.resblk(ngf * 4) for _ in range(n_block1)]
    p["ralpha_blocks"] = [g.resblk(ngf * 4) for _ in range(n_block2)]
    p["rfg_blocks"] = [g.resblk(ngf * 4) for _ in range(n_block2)]
    # alpha decoder
    p["alpha_c0"] = g.conv(ngf * 4, ngf * 2, 3, 3); p["alpha_bn0"] = g.bn(ngf * 2)
    p["alpha_c1"] = g.conv(ngf * 2, ngf, 3, 3); p["alpha_bn1"] = g.bn(ngf)
    p["alpha_c2"] = g.conv(ngf, 1, 7, 7)
    # foreground decoders
    p["fg1_c0"] = g.conv(ngf * 4, ngf * 2, 3, 3); p["fg1_bn0"] = g.bn(ngf * 2)
    p["fgo_c0"] = g.conv(ngf * 4, ngf, 3, 3); p["fgo_bn0"] = g.bn(ngf)
    p["fgo_c1"] = g.conv(ngf, output - 1, 7, 7)
    return p


# ---------------- forward pass ----------------
def resblk_forward(p, x):
    h = conv2d(x, p["c1"], 3, 3, reflect_pad=1)
    h = batchnorm(h, p["bn1"], with_relu=True)
    h = conv2d(h, p["c2"], 3, 3, reflect_pad=1)
    h = batchnorm(h, p["bn2"])
    return x + h


def network_forward(p, image, background, segmentation):
    # NCHW -> CNHW once at the boundary; all internal ops stay channels-major.
    image = image.transpose(1, 0, 2, 3)
    background = background.transpose(1, 0, 2, 3)
    segmentation = segmentation.transpose(1, 0, 2, 3)

    # encoder1 / encoder2
    x = conv2d(image, p["enc1_c0"], 7, 7, reflect_pad=3)
    x = batchnorm(x, p["enc1_bn0"], with_relu=True)
    x = conv2d(x, p["enc1_c1"], 3, 3, stride=2, zero_pad=1)
    img1 = batchnorm(x, p["enc1_bn1"], with_relu=True)
    x = conv2d(img1, p["enc2_c0"], 3, 3, stride=2, zero_pad=1)
    img = batchnorm(x, p["enc2_bn0"], with_relu=True)

    # back encoder
    x = conv2d(background, p["back_c0"], 7, 7, reflect_pad=3)
    x = batchnorm(x, p["back_bn0"], with_relu=True)
    x = conv2d(x, p["back_c1"], 3, 3, stride=2, zero_pad=1)
    x = batchnorm(x, p["back_bn1"], with_relu=True)
    x = conv2d(x, p["back_c2"], 3, 3, stride=2, zero_pad=1)
    back = batchnorm(x, p["back_bn2"], with_relu=True)

    # seg encoder
    x = conv2d(segmentation, p["seg_c0"], 7, 7, reflect_pad=3)
    x = batchnorm(x, p["seg_bn0"], with_relu=True)
    x = conv2d(x, p["seg_c1"], 3, 3, stride=2, zero_pad=1)
    x = batchnorm(x, p["seg_bn1"], with_relu=True)
    x = conv2d(x, p["seg_c2"], 3, 3, stride=2, zero_pad=1)
    seg = batchnorm(x, p["seg_bn2"], with_relu=True)

    # comb_back + comb_multi share the same input -> fuse into one GEMM
    nf = p["comb_back_c"]["wm"].shape[0]
    x_bm = jnp.concatenate([img, back], axis=0)
    c, n, hh, ww = x_bm.shape
    wm_bm = jnp.concatenate([p["comb_back_c"]["wm"], p["comb_multi_c"]["wm"]], axis=0)
    y_bm = pallas_matmul_bias(wm_bm, x_bm.astype(jnp.bfloat16).reshape(c, n * hh * ww))
    y_bm = y_bm.reshape(2 * nf, n, hh, ww)
    y_back = batchnorm(y_bm[:nf], p["comb_back_bn"], with_relu=True)
    y_multi = batchnorm(y_bm[nf:], p["comb_multi_bn"], with_relu=True)
    y_seg = conv2d(jnp.concatenate([img, seg], axis=0), p["comb_seg_c"], 1, 1)
    y_seg = batchnorm(y_seg, p["comb_seg_bn"], with_relu=True)
    out_cat = jnp.concatenate([y_back, y_seg, y_multi], axis=0)

    # resnet decoder
    x = conv2d(jnp.concatenate([img, out_cat], axis=0), p["rdec_c0"], 1, 1)
    out = batchnorm(x, p["rdec_bn0"], with_relu=True)
    for bp in p["rdec_blocks"]:
        out = resblk_forward(bp, out)

    # alpha branch
    alpha_dec = out
    for bp in p["ralpha_blocks"]:
        alpha_dec = resblk_forward(bp, alpha_dec)
    a = upsample2x_bilinear(alpha_dec)
    a = batchnorm(conv2d(a, p["alpha_c0"], 3, 3, zero_pad=1),
                  p["alpha_bn0"], with_relu=True)
    a = upsample2x_bilinear(a)
    a = batchnorm(conv2d(a, p["alpha_c1"], 3, 3, zero_pad=1),
                  p["alpha_bn1"], with_relu=True)
    alpha_out = jnp.tanh(conv2d(a, p["alpha_c2"], 7, 7, reflect_pad=3))

    # foreground branch
    fg = out
    for bp in p["rfg_blocks"]:
        fg = resblk_forward(bp, fg)
    f = upsample2x_bilinear(fg)
    f = batchnorm(conv2d(f, p["fg1_c0"], 3, 3, zero_pad=1),
                  p["fg1_bn0"], with_relu=True)
    f = jnp.concatenate([f, img1], axis=0)
    f = upsample2x_bilinear(f)
    f = batchnorm(conv2d(f, p["fgo_c0"], 3, 3, zero_pad=1),
                  p["fgo_bn0"], with_relu=True)
    foreground_out = conv2d(f, p["fgo_c1"], 7, 7, reflect_pad=3)

    # CNHW -> NCHW at the boundary
    return alpha_out.transpose(1, 0, 2, 3), foreground_out.transpose(1, 0, 2, 3)


if __name__ == "__main__":
    # Small config consistent with the module (ngf must equal nf_part for comb_* BN).
    ngf, nf_part = 16, 16
    n_block1, n_block2 = 5, 2
    in_channels = (3, 3, 1)   # image, background, segmentation channel counts
    output = 4                # foreground_out gets output-1 = 3 channels
    B, H, W = 2, 16, 16

    params = init_network_params(in_channels, output, ngf, nf_part,
                                 n_block1, n_block2, seed=42)

    key = jax.random.PRNGKey(0)
    k1, k2, k3 = jax.random.split(key, 3)
    image = jax.random.normal(k1, (B, in_channels[0], H, W), jnp.float32)
    background = jax.random.normal(k2, (B, in_channels[1], H, W), jnp.float32)
    segmentation = jax.random.normal(k3, (B, in_channels[2], H, W), jnp.float32)

    fwd = jax.jit(network_forward)
    alpha_out, fg_out = fwd(params, image, background, segmentation)
    jax.block_until_ready((alpha_out, fg_out))

    assert alpha_out.shape == (B, 1, H, W)
    assert fg_out.shape == (B, output - 1, H, W)
    assert bool(jnp.all(jnp.isfinite(alpha_out))) and bool(jnp.all(jnp.isfinite(fg_out)))
    print("KERNEL_OK")
</pallas_src>

<mosaic_0001>
module attributes {stable_mosaic.version = 11 : i64} {
  func.func private @main(%arg0: i32) attributes {dimension_semantics = [#tpu.dimension_semantics<core_parallel>], iteration_bounds = array<i64: 2>, tpu.core_type = #tpu.core_type<sc_scalar_subcore>, window_params = []} {
    return
  }
}

module attributes {stable_mosaic.version = 11 : i64} {
  func.func private @main(%arg0: i32) attributes {dimension_semantics = [#tpu.dimension_semantics<core_parallel>], iteration_bounds = array<i64: 2>, tpu.core_type = #tpu.core_type<sc_scalar_subcore>, window_params = []} {
    return
  }
}

module attributes {stable_mosaic.version = 11 : i64} {
  func.func @_mm_bias_kernel(%arg0: i32, %arg1: memref<16x147xbf16, #tpu.memory_space<vmem>>, %arg2: memref<147x512xbf16, #tpu.memory_space<vmem>>, %arg3: memref<16x1xf32, #tpu.memory_space<vmem>>, %arg4: memref<16x512xf32, #tpu.memory_space<vmem>>) attributes {dimension_semantics = [#tpu.dimension_semantics<parallel>], iteration_bounds = array<i64: 1>, scalar_prefetch = 0 : i64, scratch_operands = 0 : i64, tpu.core_type = #tpu.core_type<tc>, window_params = [{pipeline_mode = #tpu.pipeline_mode<synchronous>, transform_indices = @transform_0, window_bounds = array<i64: 16, 147>}, {transform_indices = @transform_1, window_bounds = array<i64: 147, 512>}, {pipeline_mode = #tpu.pipeline_mode<synchronous>, transform_indices = @transform_2, window_bounds = array<i64: 16, 1>}, {transform_indices = @transform_3, window_bounds = array<i64: 16, 512>}]} {
    %c0 = arith.constant 0 : index
    %c0_0 = arith.constant 0 : index
    %0 = vector.load %arg1[%c0, %c0_0] : memref<16x147xbf16, #tpu.memory_space<vmem>>, vector<16x147xbf16>
    %c0_1 = arith.constant 0 : index
    %c0_2 = arith.constant 0 : index
    %1 = vector.load %arg2[%c0_1, %c0_2] : memref<147x512xbf16, #tpu.memory_space<vmem>>, vector<147x512xbf16>
    %cst = arith.constant dense<0.000000e+00> : vector<16x512xf32>
    %2 = tpu.matmul %0, %1, %cst {dimension_numbers = #tpu.dot_dimension_numbers<[1], [0], [0], [1], [0, 0, 1, 1], [], []>} : vector<16x147xbf16>, vector<147x512xbf16>, vector<16x512xf32> -> vector<16x512xf32>
    %c0_3 = arith.constant 0 : index
    %c0_4 = arith.constant 0 : index
    %3 = vector.load %arg3[%c0_3, %c0_4] : memref<16x1xf32, #tpu.memory_space<vmem>>, vector<16x1xf32>
    %4 = vector.broadcast %3 : vector<16x1xf32> to vector<16x512xf32>
    %5 = arith.addf %2, %4 : vector<16x512xf32>
    %c0_5 = arith.constant 0 : index
    %c0_6 = arith.constant 0 : index
    %6 = vector.load %arg4[%c0_5, %c0_6] : memref<16x512xf32, #tpu.memory_space<vmem>>, vector<16x512xf32>
    tpu.vector_store %arg4[%c0_5, %c0_6], %5 {strides = array<i32>} : memref<16x512xf32, #tpu.memory_space<vmem>>, vector<16x512xf32>,
    return
  }
  func.func @transform_0(%arg0: i32) -> (i32, i32) {
    %c0_i32 = arith.constant 0 : i32
    %c0_i32_0 = arith.constant 0 : i32
    %c0_i32_1 = arith.constant 0 : i32
    return %c0_i32, %c0_i32_0 : i32, i32
  }
  func.func @transform_1(%arg0: i32) -> (i32, i32) {
    %c0_i32 = arith.constant 0 : i32
    %c0_i32_0 = arith.constant 0 : i32
    return %c0_i32, %arg0 : i32, i32
  }
  func.func @transform_2(%arg0: i32) -> (i32, i32) {
    %c0_i32 = arith.constant 0 : i32
    %c0_i32_0 = arith.constant 0 : i32
    %c0_i32_1 = arith.constant 0 : i32
    return %c0_i32, %c0_i32_0 : i32, i32
  }
  func.func @transform_3(%arg0: i32) -> (i32, i32) {
    %c0_i32 = arith.constant 0 : i32
    %c0_i32_0 = arith.constant 0 : i32
    return %c0_i32, %arg0 : i32, i32
  }
}

module attributes {stable_mosaic.version = 11 : i64} {
  func.func @_mm_bias_kernel(%arg0: i32, %arg1: memref<32x144xbf16, #tpu.memory_space<vmem>>, %arg2: memref<144x128xbf16, #tpu.memory_space<vmem>>, %arg3: memref<32x1xf32, #tpu.memory_space<vmem>>, %arg4: memref<32x128xf32, #tpu.memory_space<vmem>>) attributes {dimension_semantics = [#tpu.dimension_semantics<parallel>], iteration_bounds = array<i64: 1>, scalar_prefetch = 0 : i64, scratch_operands = 0 : i64, tpu.core_type = #tpu.core_type<tc>, window_params = [{pipeline_mode = #tpu.pipeline_mode<synchronous>, transform_indices = @transform_0, window_bounds = array<i64: 32, 144>}, {transform_indices = @transform_1, window_bounds = array<i64: 144, 128>}, {pipeline_mode = #tpu.pipeline_mode<synchronous>, transform_indices = @transform_2, window_bounds = array<i64: 32, 1>}, {transform_indices = @transform_3, window_bounds = array<i64: 32, 128>}]} {
    %c0 = arith.constant 0 : index
    %c0_0 = arith.constant 0 : index
    %0 = vector.load %arg1[%c0, %c0_0] : memref<32x144xbf16, #tpu.memory_space<vmem>>, vector<32x144xbf16>
    %c0_1 = arith.constant 0 : index
    %c0_2 = arith.constant 0 : index
    %1 = vector.load %arg2[%c0_1, %c0_2] : memref<144x128xbf16, #tpu.memory_space<vmem>>, vector<144x128xbf16>
    %cst = arith.constant dense<0.000000e+00> : vector<32x128xf32>
    %2 = tpu.matmul %0, %1, %cst {dimension_numbers = #tpu.dot_dimension_numbers<[1], [0], [0], [1], [0, 0, 1, 1], [], []>} : vector<32x144xbf16>, vector<144x128xbf16>, vector<32x128xf32> -> vector<32x128xf32>
    %c0_3 = arith.constant 0 : index
    %c0_4 = arith.constant 0 : index
    %3 = vector.load %arg3[%c0_3, %c0_4] : memref<32x1xf32, #tpu.memory_space<vmem>>, vector<32x1xf32>
    %4 = vector.broadcast %3 : vector<32x1xf32> to vector<32x128xf32>
    %5 = arith.addf %2, %4 : vector<32x128xf32>
    %c0_5 = arith.constant 0 : index
    %c0_6 = arith.constant 0 : index
    %6 = vector.load %arg4[%c0_5, %c0_6] : memref<32x128xf32, #tpu.memory_space<vmem>>, vector<32x128xf32>
    tpu.vector_store %arg4[%c0_5, %c0_6], %5 {strides = array<i32>} : memref<32x128xf32, #tpu.memory_space<vmem>>, vector<32x128xf32>,
    return
  }
  func.func @transform_0(%arg0: i32) -> (i32, i32) {
    %c0_i32 = arith.constant 0 : i32
    %c0_i32_0 = arith.constant 0 : i32
    %c0_i32_1 = arith.constant 0 : i32
    return %c0_i32, %c0_i32_0 : i32, i32
  }
  func.func @transform_1(%arg0: i32) -> (i32, i32) {
    %c0_i32 = arith.constant 0 : i32
    %c0_i32_0 = arith.constant 0 : i32
    return %c0_i32, %arg0 : i32, i32
  }
  func.func @transform_2(%arg0: i32) -> (i32, i32) {
    %c0_i32 = arith.constant 0 : i32
    %c0_i32_0 = arith.constant 0 : i32
    %c0_i32_1 = arith.constant 0 : i32
    return %c0_i32, %c0_i32_0 : i32, i32
  }
  func.func @transform_3(%arg0: i32) -> (i32, i32) {
    %c0_i32 = arith.constant 0 : i32
    %c0_i32_0 = arith.constant 0 : i32
    return %c0_i32, %arg0 : i32, i32
  }
}

module attributes {stable_mosaic.version = 11 : i64} {
  func.func @_mm_bias_kernel(%arg0: i32, %arg1: memref<16x49xbf16, #tpu.memory_space<vmem>>, %arg2: memref<49x512xbf16, #tpu.memory_space<vmem>>, %arg3: memref<16x1xf32, #tpu.memory_space<vmem>>, %arg4: memref<16x512xf32, #tpu.memory_space<vmem>>) attributes {dimension_semantics = [#tpu.dimension_semantics<parallel>], iteration_bounds = array<i64: 1>, scalar_prefetch = 0 : i64, scratch_operands = 0 : i64, tpu.core_type = #tpu.core_type<tc>, window_params = [{pipeline_mode = #tpu.pipeline_mode<synchronous>, transform_indices = @transform_0, window_bounds = array<i64: 16, 49>}, {transform_indices = @transform_1, window_bounds = array<i64: 49, 512>}, {pipeline_mode = #tpu.pipeline_mode<synchronous>, transform_indices = @transform_2, window_bounds = array<i64: 16, 1>}, {transform_indices = @transform_3, window_bounds = array<i64: 16, 512>}]} {
    %c0 = arith.constant 0 : index
    %c0_0 = arith.constant 0 : index
    %0 = vector.load %arg1[%c0, %c0_0] : memref<16x49xbf16, #tpu.memory_space<vmem>>, vector<16x49xbf16>
    %c0_1 = arith.constant 0 : index
    %c0_2 = arith.constant 0 : index
    %1 = vector.load %arg2[%c0_1, %c0_2] : memref<49x512xbf16, #tpu.memory_space<vmem>>, vector<49x512xbf16>
    %cst = arith.constant dense<0.000000e+00> : vector<16x512xf32>
    %2 = tpu.matmul %0, %1, %cst {dimension_numbers = #tpu.dot_dimension_numbers<[1], [0], [0], [1], [0, 0, 1, 1], [], []>} : vector<16x49xbf16>, vector<49x512xbf16>, vector<16x512xf32> -> vector<16x512xf32>
    %c0_3 = arith.constant 0 : index
    %c0_4 = arith.constant 0 : index
    %3 = vector.load %arg3[%c0_3, %c0_4] : memref<16x1xf32, #tpu.memory_space<vmem>>, vector<16x1xf32>
    %4 = vector.broadcast %3 : vector<16x1xf32> to vector<16x512xf32>
    %5 = arith.addf %2, %4 : vector<16x512xf32>
    %c0_5 = arith.constant 0 : index
    %c0_6 = arith.constant 0 : index
    %6 = vector.load %arg4[%c0_5, %c0_6] : memref<16x512xf32, #tpu.memory_space<vmem>>, vector<16x512xf32>
    tpu.vector_store %arg4[%c0_5, %c0_6], %5 {strides = array<i32>} : memref<16x512xf32, #tpu.memory_space<vmem>>, vector<16x512xf32>,
    return
  }
  func.func @transform_0(%arg0: i32) -> (i32, i32) {
    %c0_i32 = arith.constant 0 : i32
    %c0_i32_0 = arith.constant 0 : i32
    %c0_i32_1 = arith.constant 0 : i32
    return %c0_i32, %c0_i32_0 : i32, i32
  }
  func.func @transform_1(%arg0: i32) -> (i32, i32) {
    %c0_i32 = arith.constant 0 : i32
    %c0_i32_0 = arith.constant 0 : i32
    return %c0_i32, %arg0 : i32, i32
  }
  func.func @transform_2(%arg0: i32) -> (i32, i32) {
    %c0_i32 = arith.constant 0 : i32
    %c0_i32_0 = arith.constant 0 : i32
    %c0_i32_1 = arith.constant 0 : i32
    return %c0_i32, %c0_i32_0 : i32, i32
  }
  func.func @transform_3(%arg0: i32) -> (i32, i32) {
    %c0_i32 = arith.constant 0 : i32
    %c0_i32_0 = arith.constant 0 : i32
    return %c0_i32, %arg0 : i32, i32
  }
}

module attributes {stable_mosaic.version = 11 : i64} {
  func.func @_mm_bias_kernel(%arg0: i32, %arg1: memref<64x288xbf16, #tpu.memory_space<vmem>>, %arg2: memref<288x128xbf16, #tpu.memory_space<vmem>>, %arg3: memref<64x1xf32, #tpu.memory_space<vmem>>, %arg4: memref<64x128xf32, #tpu.memory_space<vmem>>) attributes {dimension_semantics = [#tpu.dimension_semantics<parallel>], iteration_bounds = array<i64: 1>, scalar_prefetch = 0 : i64, scratch_operands = 0 : i64, tpu.core_type = #tpu.core_type<tc>, window_params = [{pipeline_mode = #tpu.pipeline_mode<synchronous>, transform_indices = @transform_0, window_bounds = array<i64: 64, 288>}, {transform_indices = @transform_1, window_bounds = array<i64: 288, 128>}, {pipeline_mode = #tpu.pipeline_mode<synchronous>, transform_indices = @transform_2, window_bounds = array<i64: 64, 1>}, {transform_indices = @transform_3, window_bounds = array<i64: 64, 128>}]} {
    %c0 = arith.constant 0 : index
    %c0_0 = arith.constant 0 : index
    %0 = vector.load %arg1[%c0, %c0_0] : memref<64x288xbf16, #tpu.memory_space<vmem>>, vector<64x288xbf16>
    %c0_1 = arith.constant 0 : index
    %c0_2 = arith.constant 0 : index
    %1 = vector.load %arg2[%c0_1, %c0_2] : memref<288x128xbf16, #tpu.memory_space<vmem>>, vector<288x128xbf16>
    %cst = arith.constant dense<0.000000e+00> : vector<64x128xf32>
    %2 = tpu.matmul %0, %1, %cst {dimension_numbers = #tpu.dot_dimension_numbers<[1], [0], [0], [1], [0, 0, 1, 1], [], []>} : vector<64x288xbf16>, vector<288x128xbf16>, vector<64x128xf32> -> vector<64x128xf32>
    %c0_3 = arith.constant 0 : index
    %c0_4 = arith.constant 0 : index
    %3 = vector.load %arg3[%c0_3, %c0_4] : memref<64x1xf32, #tpu.memory_space<vmem>>, vector<64x1xf32>
    %4 = vector.broadcast %3 : vector<64x1xf32> to vector<64x128xf32>
    %5 = arith.addf %2, %4 : vector<64x128xf32>
    %c0_5 = arith.constant 0 : index
    %c0_6 = arith.constant 0 : index
    %6 = vector.load %arg4[%c0_5, %c0_6] : memref<64x128xf32, #tpu.memory_space<vmem>>, vector<64x128xf32>
    tpu.vector_store %arg4[%c0_5, %c0_6], %5 {strides = array<i32>} : memref<64x128xf32, #tpu.memory_space<vmem>>, vector<64x128xf32>,
    return
  }
  func.func @transform_0(%arg0: i32) -> (i32, i32) {
    %c0_i32 = arith.constant 0 : i32
    %c0_i32_0 = arith.constant 0 : i32
    %c0_i32_1 = arith.constant 0 : i32
    return %c0_i32, %c0_i32_0 : i32, i32
  }
  func.func @transform_1(%arg0: i32) -> (i32, i32) {
    %c0_i32 = arith.constant 0 : i32
    %c0_i32_0 = arith.constant 0 : i32
    return %c0_i32, %arg0 : i32, i32
  }
  func.func @transform_2(%arg0: i32) -> (i32, i32) {
    %c0_i32 = arith.constant 0 : i32
    %c0_i32_0 = arith.constant 0 : i32
    %c0_i32_1 = arith.constant 0 : i32
    return %c0_i32, %c0_i32_0 : i32, i32
  }
  func.func @transform_3(%arg0: i32) -> (i32, i32) {
    %c0_i32 = arith.constant 0 : i32
    %c0_i32_0 = arith.constant 0 : i32
    return %c0_i32, %arg0 : i32, i32
  }
}

module attributes {stable_mosaic.version = 11 : i64} {
  func.func @_mm_kernel(%arg0: i32, %arg1: memref<32x128xbf16, #tpu.memory_space<vmem>>, %arg2: memref<128x128xbf16, #tpu.memory_space<vmem>>, %arg3: memref<32x128xf32, #tpu.memory_space<vmem>>) attributes {dimension_semantics = [#tpu.dimension_semantics<parallel>], iteration_bounds = array<i64: 1>, scalar_prefetch = 0 : i64, scratch_operands = 0 : i64, tpu.core_type = #tpu.core_type<tc>, window_params = [{pipeline_mode = #tpu.pipeline_mode<synchronous>, transform_indices = @transform_0, window_bounds = array<i64: 32, 128>}, {transform_indices = @transform_1, window_bounds = array<i64: 128, 128>}, {transform_indices = @transform_2, window_bounds = array<i64: 32, 128>}]} {
    %c0 = arith.constant 0 : index
    %c0_0 = arith.constant 0 : index
    %0 = vector.load %arg1[%c0, %c0_0] : memref<32x128xbf16, #tpu.memory_space<vmem>>, vector<32x128xbf16>
    %c0_1 = arith.constant 0 : index
    %c0_2 = arith.constant 0 : index
    %1 = vector.load %arg2[%c0_1, %c0_2] : memref<128x128xbf16, #tpu.memory_space<vmem>>, vector<128x128xbf16>
    %cst = arith.constant dense<0.000000e+00> : vector<32x128xf32>
    %2 = tpu.matmul %0, %1, %cst {dimension_numbers = #tpu.dot_dimension_numbers<[1], [0], [0], [1], [0, 0, 1, 1], [], []>} : vector<32x128xbf16>, vector<128x128xbf16>, vector<32x128xf32> -> vector<32x128xf32>
    %c0_3 = arith.constant 0 : index
    %c0_4 = arith.constant 0 : index
    %3 = vector.load %arg3[%c0_3, %c0_4] : memref<32x128xf32, #tpu.memory_space<vmem>>, vector<32x128xf32>
    tpu.vector_store %arg3[%c0_3, %c0_4], %2 {strides = array<i32>} : memref<32x128xf32, #tpu.memory_space<vmem>>, vector<32x128xf32>,
    return
  }
  func.func @transform_0(%arg0: i32) -> (i32, i32) {
    %c0_i32 = arith.constant 0 : i32
    %c0_i32_0 = arith.constant 0 : i32
    %c0_i32_1 = arith.constant 0 : i32
    return %c0_i32, %c0_i32_0 : i32, i32
  }
  func.func @transform_1(%arg0: i32) -> (i32, i32) {
    %c0_i32 = arith.constant 0 : i32
    %c0_i32_0 = arith.constant 0 : i32
    return %c0_i32, %arg0 : i32, i32
  }
  func.func @transform_2(%arg0: i32) -> (i32, i32) {
    %c0_i32 = arith.constant 0 : i32
    %c0_i32_0 = arith.constant 0 : i32
    return %c0_i32, %arg0 : i32, i32
  }
}

module attributes {stable_mosaic.version = 11 : i64} {
  func.func @_mm_kernel(%arg0: i32, %arg1: memref<16x128xbf16, #tpu.memory_space<vmem>>, %arg2: memref<128x128xbf16, #tpu.memory_space<vmem>>, %arg3: memref<16x128xf32, #tpu.memory_space<vmem>>) attributes {dimension_semantics = [#tpu.dimension_semantics<parallel>], iteration_bounds = array<i64: 1>, scalar_prefetch = 0 : i64, scratch_operands = 0 : i64, tpu.core_type = #tpu.core_type<tc>, window_params = [{pipeline_mode = #tpu.pipeline_mode<synchronous>, transform_indices = @transform_0, window_bounds = array<i64: 16, 128>}, {transform_indices = @transform_1, window_bounds = array<i64: 128, 128>}, {transform_indices = @transform_2, window_bounds = array<i64: 16, 128>}]} {
    %c0 = arith.constant 0 : index
    %c0_0 = arith.constant 0 : index
    %0 = vector.load %arg1[%c0, %c0_0] : memref<16x128xbf16, #tpu.memory_space<vmem>>, vector<16x128xbf16>
    %c0_1 = arith.constant 0 : index
    %c0_2 = arith.constant 0 : index
    %1 = vector.load %arg2[%c0_1, %c0_2] : memref<128x128xbf16, #tpu.memory_space<vmem>>, vector<128x128xbf16>
    %cst = arith.constant dense<0.000000e+00> : vector<16x128xf32>
    %2 = tpu.matmul %0, %1, %cst {dimension_numbers = #tpu.dot_dimension_numbers<[1], [0], [0], [1], [0, 0, 1, 1], [], []>} : vector<16x128xbf16>, vector<128x128xbf16>, vector<16x128xf32> -> vector<16x128xf32>
    %c0_3 = arith.constant 0 : index
    %c0_4 = arith.constant 0 : index
    %3 = vector.load %arg3[%c0_3, %c0_4] : memref<16x128xf32, #tpu.memory_space<vmem>>, vector<16x128xf32>
    tpu.vector_store %arg3[%c0_3, %c0_4], %2 {strides = array<i32>} : memref<16x128xf32, #tpu.memory_space<vmem>>, vector<16x128xf32>,
    return
  }
  func.func @transform_0(%arg0: i32) -> (i32, i32) {
    %c0_i32 = arith.constant 0 : i32
    %c0_i32_0 = arith.constant 0 : i32
    %c0_i32_1 = arith.constant 0 : i32
    return %c0_i32, %c0_i32_0 : i32, i32
  }
  func.func @transform_1(%arg0: i32) -> (i32, i32) {
    %c0_i32 = arith.constant 0 : i32
    %c0_i32_0 = arith.constant 0 : i32
    return %c0_i32, %arg0 : i32, i32
  }
  func.func @transform_2(%arg0: i32) -> (i32, i32) {
    %c0_i32 = arith.constant 0 : i32
    %c0_i32_0 = arith.constant 0 : i32
    return %c0_i32, %arg0 : i32, i32
  }
}

module attributes {stable_mosaic.version = 11 : i64} {
  func.func @_mm_kernel(%arg0: i32, %arg1: memref<64x112xbf16, #tpu.memory_space<vmem>>, %arg2: memref<112x128xbf16, #tpu.memory_space<vmem>>, %arg3: memref<64x128xf32, #tpu.memory_space<vmem>>) attributes {dimension_semantics = [#tpu.dimension_semantics<parallel>], iteration_bounds = array<i64: 1>, scalar_prefetch = 0 : i64, scratch_operands = 0 : i64, tpu.core_type = #tpu.core_type<tc>, window_params = [{pipeline_mode = #tpu.pipeline_mode<synchronous>, transform_indices = @transform_0, window_bounds = array<i64: 64, 112>}, {transform_indices = @transform_1, window_bounds = array<i64: 112, 128>}, {transform_indices = @transform_2, window_bounds = array<i64: 64, 128>}]} {
    %c0 = arith.constant 0 : index
    %c0_0 = arith.constant 0 : index
    %0 = vector.load %arg1[%c0, %c0_0] : memref<64x112xbf16, #tpu.memory_space<vmem>>, vector<64x112xbf16>
    %c0_1 = arith.constant 0 : index
    %c0_2 = arith.constant 0 : index
    %1 = vector.load %arg2[%c0_1, %c0_2] : memref<112x128xbf16, #tpu.memory_space<vmem>>, vector<112x128xbf16>
    %cst = arith.constant dense<0.000000e+00> : vector<64x128xf32>
    %2 = tpu.matmul %0, %1, %cst {dimension_numbers = #tpu.dot_dimension_numbers<[1], [0], [0], [1], [0, 0, 1, 1], [], []>} : vector<64x112xbf16>, vector<112x128xbf16>, vector<64x128xf32> -> vector<64x128xf32>
    %c0_3 = arith.constant 0 : index
    %c0_4 = arith.constant 0 : index
    %3 = vector.load %arg3[%c0_3, %c0_4] : memref<64x128xf32, #tpu.memory_space<vmem>>, vector<64x128xf32>
    tpu.vector_store %arg3[%c0_3, %c0_4], %2 {strides = array<i32>} : memref<64x128xf32, #tpu.memory_space<vmem>>, vector<64x128xf32>,
    return
  }
  func.func @transform_0(%arg0: i32) -> (i32, i32) {
    %c0_i32 = arith.constant 0 : i32
    %c0_i32_0 = arith.constant 0 : i32
    %c0_i32_1 = arith.constant 0 : i32
    return %c0_i32, %c0_i32_0 : i32, i32
  }
  func.func @transform_1(%arg0: i32) -> (i32, i32) {
    %c0_i32 = arith.constant 0 : i32
    %c0_i32_0 = arith.constant 0 : i32
    return %c0_i32, %arg0 : i32, i32
  }
  func.func @transform_2(%arg0: i32) -> (i32, i32) {
    %c0_i32 = arith.constant 0 : i32
    %c0_i32_0 = arith.constant 0 : i32
    return %c0_i32, %arg0 : i32, i32
  }
}

module attributes {stable_mosaic.version = 11 : i64} {
  func.func @_mm_bias_kernel(%arg0: i32, %arg1: memref<64x576xbf16, #tpu.memory_space<vmem>>, %arg2: memref<576x128xbf16, #tpu.memory_space<vmem>>, %arg3: memref<64x1xf32, #tpu.memory_space<vmem>>, %arg4: memref<64x128xf32, #tpu.memory_space<vmem>>) attributes {dimension_semantics = [#tpu.dimension_semantics<parallel>], iteration_bounds = array<i64: 1>, scalar_prefetch = 0 : i64, scratch_operands = 0 : i64, tpu.core_type = #tpu.core_type<tc>, window_params = [{pipeline_mode = #tpu.pipeline_mode<synchronous>, transform_indices = @transform_0, window_bounds = array<i64: 64, 576>}, {transform_indices = @transform_1, window_bounds = array<i64: 576, 128>}, {pipeline_mode = #tpu.pipeline_mode<synchronous>, transform_indices = @transform_2, window_bounds = array<i64: 64, 1>}, {transform_indices = @transform_3, window_bounds = array<i64: 64, 128>}]} {
    %c0 = arith.constant 0 : index
    %c0_0 = arith.constant 0 : index
    %0 = vector.load %arg1[%c0, %c0_0] : memref<64x576xbf16, #tpu.memory_space<vmem>>, vector<64x576xbf16>
    %c0_1 = arith.constant 0 : index
    %c0_2 = arith.constant 0 : index
    %1 = vector.load %arg2[%c0_1, %c0_2] : memref<576x128xbf16, #tpu.memory_space<vmem>>, vector<576x128xbf16>
    %cst = arith.constant dense<0.000000e+00> : vector<64x128xf32>
    %2 = tpu.matmul %0, %1, %cst {dimension_numbers = #tpu.dot_dimension_numbers<[1], [0], [0], [1], [0, 0, 1, 1], [], []>} : vector<64x576xbf16>, vector<576x128xbf16>, vector<64x128xf32> -> vector<64x128xf32>
    %c0_3 = arith.constant 0 : index
    %c0_4 = arith.constant 0 : index
    %3 = vector.load %arg3[%c0_3, %c0_4] : memref<64x1xf32, #tpu.memory_space<vmem>>, vector<64x1xf32>
    %4 = vector.broadcast %3 : vector<64x1xf32> to vector<64x128xf32>
    %5 = arith.addf %2, %4 : vector<64x128xf32>
    %c0_5 = arith.constant 0 : index
    %c0_6 = arith.constant 0 : index
    %6 = vector.load %arg4[%c0_5, %c0_6] : memref<64x128xf32, #tpu.memory_space<vmem>>, vector<64x128xf32>
    tpu.vector_store %arg4[%c0_5, %c0_6], %5 {strides = array<i32>} : memref<64x128xf32, #tpu.memory_space<vmem>>, vector<64x128xf32>,
    return
  }
  func.func @transform_0(%arg0: i32) -> (i32, i32) {
    %c0_i32 = arith.constant 0 : i32
    %c0_i32_0 = arith.constant 0 : i32
    %c0_i32_1 = arith.constant 0 : i32
    return %c0_i32, %c0_i32_0 : i32, i32
  }
  func.func @transform_1(%arg0: i32) -> (i32, i32) {
    %c0_i32 = arith.constant 0 : i32
    %c0_i32_0 = arith.constant 0 : i32
    return %c0_i32, %arg0 : i32, i32
  }
  func.func @transform_2(%arg0: i32) -> (i32, i32) {
    %c0_i32 = arith.constant 0 : i32
    %c0_i32_0 = arith.constant 0 : i32
    %c0_i32_1 = arith.constant 0 : i32
    return %c0_i32, %c0_i32_0 : i32, i32
  }
  func.func @transform_3(%arg0: i32) -> (i32, i32) {
    %c0_i32 = arith.constant 0 : i32
    %c0_i32_0 = arith.constant 0 : i32
    return %c0_i32, %arg0 : i32, i32
  }
}

module attributes {stable_mosaic.version = 11 : i64} {
  func.func @_mm_bias_kernel(%arg0: i32, %arg1: memref<32x576xbf16, #tpu.memory_space<vmem>>, %arg2: memref<576x128xbf16, #tpu.memory_space<vmem>>, %arg3: memref<32x1xf32, #tpu.memory_space<vmem>>, %arg4: memref<32x128xf32, #tpu.memory_space<vmem>>) attributes {dimension_semantics = [#tpu.dimension_semantics<parallel>], iteration_bounds = array<i64: 1>, scalar_prefetch = 0 : i64, scratch_operands = 0 : i64, tpu.core_type = #tpu.core_type<tc>, window_params = [{pipeline_mode = #tpu.pipeline_mode<synchronous>, transform_indices = @transform_0, window_bounds = array<i64: 32, 576>}, {transform_indices = @transform_1, window_bounds = array<i64: 576, 128>}, {pipeline_mode = #tpu.pipeline_mode<synchronous>, transform_indices = @transform_2, window_bounds = array<i64: 32, 1>}, {transform_indices = @transform_3, window_bounds = array<i64: 32, 128>}]} {
    %c0 = arith.constant 0 : index
    %c0_0 = arith.constant 0 : index
    %0 = vector.load %arg1[%c0, %c0_0] : memref<32x576xbf16, #tpu.memory_space<vmem>>, vector<32x576xbf16>
    %c0_1 = arith.constant 0 : index
    %c0_2 = arith.constant 0 : index
    %1 = vector.load %arg2[%c0_1, %c0_2] : memref<576x128xbf16, #tpu.memory_space<vmem>>, vector<576x128xbf16>
    %cst = arith.constant dense<0.000000e+00> : vector<32x128xf32>
    %2 = tpu.matmul %0, %1, %cst {dimension_numbers = #tpu.dot_dimension_numbers<[1], [0], [0], [1], [0, 0, 1, 1], [], []>} : vector<32x576xbf16>, vector<576x128xbf16>, vector<32x128xf32> -> vector<32x128xf32>
    %c0_3 = arith.constant 0 : index
    %c0_4 = arith.constant 0 : index
    %3 = vector.load %arg3[%c0_3, %c0_4] : memref<32x1xf32, #tpu.memory_space<vmem>>, vector<32x1xf32>
    %4 = vector.broadcast %3 : vector<32x1xf32> to vector<32x128xf32>
    %5 = arith.addf %2, %4 : vector<32x128xf32>
    %c0_5 = arith.constant 0 : index
    %c0_6 = arith.constant 0 : index
    %6 = vector.load %arg4[%c0_5, %c0_6] : memref<32x128xf32, #tpu.memory_space<vmem>>, vector<32x128xf32>
    tpu.vector_store %arg4[%c0_5, %c0_6], %5 {strides = array<i32>} : memref<32x128xf32, #tpu.memory_space<vmem>>, vector<32x128xf32>,
    return
  }
  func.func @transform_0(%arg0: i32) -> (i32, i32) {
    %c0_i32 = arith.constant 0 : i32
    %c0_i32_0 = arith.constant 0 : i32
    %c0_i32_1 = arith.constant 0 : i32
    return %c0_i32, %c0_i32_0 : i32, i32
  }
  func.func @transform_1(%arg0: i32) -> (i32, i32) {
    %c0_i32 = arith.constant 0 : i32
    %c0_i32_0 = arith.constant 0 : i32
    return %c0_i32, %arg0 : i32, i32
  }
  func.func @transform_2(%arg0: i32) -> (i32, i32) {
    %c0_i32 = arith.constant 0 : i32
    %c0_i32_0 = arith.constant 0 : i32
    %c0_i32_1 = arith.constant 0 : i32
    return %c0_i32, %c0_i32_0 : i32, i32
  }
  func.func @transform_3(%arg0: i32) -> (i32, i32) {
    %c0_i32 = arith.constant 0 : i32
    %c0_i32_0 = arith.constant 0 : i32
    return %c0_i32, %arg0 : i32, i32
  }
}

module attributes {stable_mosaic.version = 11 : i64} {
  func.func @_mm_bias_kernel(%arg0: i32, %arg1: memref<16x576xbf16, #tpu.memory_space<vmem>>, %arg2: memref<576x512xbf16, #tpu.memory_space<vmem>>, %arg3: memref<16x1xf32, #tpu.memory_space<vmem>>, %arg4: memref<16x512xf32, #tpu.memory_space<vmem>>) attributes {dimension_semantics = [#tpu.dimension_semantics<parallel>], iteration_bounds = array<i64: 1>, scalar_prefetch = 0 : i64, scratch_operands = 0 : i64, tpu.core_type = #tpu.core_type<tc>, window_params = [{pipeline_mode = #tpu.pipeline_mode<synchronous>, transform_indices = @transform_0, window_bounds = array<i64: 16, 576>}, {transform_indices = @transform_1, window_bounds = array<i64: 576, 512>}, {pipeline_mode = #tpu.pipeline_mode<synchronous>, transform_indices = @transform_2, window_bounds = array<i64: 16, 1>}, {transform_indices = @transform_3, window_bounds = array<i64: 16, 512>}]} {
    %c0 = arith.constant 0 : index
    %c0_0 = arith.constant 0 : index
    %0 = vector.load %arg1[%c0, %c0_0] : memref<16x576xbf16, #tpu.memory_space<vmem>>, vector<16x576xbf16>
    %c0_1 = arith.constant 0 : index
    %c0_2 = arith.constant 0 : index
    %1 = vector.load %arg2[%c0_1, %c0_2] : memref<576x512xbf16, #tpu.memory_space<vmem>>, vector<576x512xbf16>
    %cst = arith.constant dense<0.000000e+00> : vector<16x512xf32>
    %2 = tpu.matmul %0, %1, %cst {dimension_numbers = #tpu.dot_dimension_numbers<[1], [0], [0], [1], [0, 0, 1, 1], [], []>} : vector<16x576xbf16>, vector<576x512xbf16>, vector<16x512xf32> -> vector<16x512xf32>
    %c0_3 = arith.constant 0 : index
    %c0_4 = arith.constant 0 : index
    %3 = vector.load %arg3[%c0_3, %c0_4] : memref<16x1xf32, #tpu.memory_space<vmem>>, vector<16x1xf32>
    %4 = vector.broadcast %3 : vector<16x1xf32> to vector<16x512xf32>
    %5 = arith.addf %2, %4 : vector<16x512xf32>
    %c0_5 = arith.constant 0 : index
    %c0_6 = arith.constant 0 : index
    %6 = vector.load %arg4[%c0_5, %c0_6] : memref<16x512xf32, #tpu.memory_space<vmem>>, vector<16x512xf32>
    tpu.vector_store %arg4[%c0_5, %c0_6], %5 {strides = array<i32>} : memref<16x512xf32, #tpu.memory_space<vmem>>, vector<16x512xf32>,
    return
  }
  func.func @transform_0(%arg0: i32) -> (i32, i32) {
    %c0_i32 = arith.constant 0 : i32
    %c0_i32_0 = arith.constant 0 : i32
    %c0_i32_1 = arith.constant 0 : i32
    return %c0_i32, %c0_i32_0 : i32, i32
  }
  func.func @transform_1(%arg0: i32) -> (i32, i32) {
    %c0_i32 = arith.constant 0 : i32
    %c0_i32_0 = arith.constant 0 : i32
    return %c0_i32, %arg0 : i32, i32
  }
  func.func @transform_2(%arg0: i32) -> (i32, i32) {
    %c0_i32 = arith.constant 0 : i32
    %c0_i32_0 = arith.constant 0 : i32
    %c0_i32_1 = arith.constant 0 : i32
    return %c0_i32, %c0_i32_0 : i32, i32
  }
  func.func @transform_3(%arg0: i32) -> (i32, i32) {
    %c0_i32 = arith.constant 0 : i32
    %c0_i32_0 = arith.constant 0 : i32
    return %c0_i32, %arg0 : i32, i32
  }
}

module attributes {stable_mosaic.version = 11 : i64} {
  func.func @_mm_bias_kernel(%arg0: i32, %arg1: memref<16x288xbf16, #tpu.memory_space<vmem>>, %arg2: memref<288x512xbf16, #tpu.memory_space<vmem>>, %arg3: memref<16x1xf32, #tpu.memory_space<vmem>>, %arg4: memref<16x512xf32, #tpu.memory_space<vmem>>) attributes {dimension_semantics = [#tpu.dimension_semantics<parallel>], iteration_bounds = array<i64: 1>, scalar_prefetch = 0 : i64, scratch_operands = 0 : i64, tpu.core_type = #tpu.core_type<tc>, window_params = [{pipeline_mode = #tpu.pipeline_mode<synchronous>, transform_indices = @transform_0, window_bounds = array<i64: 16, 288>}, {transform_indices = @transform_1, window_bounds = array<i64: 288, 512>}, {pipeline_mode = #tpu.pipeline_mode<synchronous>, transform_indices = @transform_2, window_bounds = array<i64: 16, 1>}, {transform_indices = @transform_3, window_bounds = array<i64: 16, 512>}]} {
    %c0 = arith.constant 0 : index
    %c0_0 = arith.constant 0 : index
    %0 = vector.load %arg1[%c0, %c0_0] : memref<16x288xbf16, #tpu.memory_space<vmem>>, vector<16x288xbf16>
    %c0_1 = arith.constant 0 : index
    %c0_2 = arith.constant 0 : index
    %1 = vector.load %arg2[%c0_1, %c0_2] : memref<288x512xbf16, #tpu.memory_space<vmem>>, vector<288x512xbf16>
    %cst = arith.constant dense<0.000000e+00> : vector<16x512xf32>
    %2 = tpu.matmul %0, %1, %cst {dimension_numbers = #tpu.dot_dimension_numbers<[1], [0], [0], [1], [0, 0, 1, 1], [], []>} : vector<16x288xbf16>, vector<288x512xbf16>, vector<16x512xf32> -> vector<16x512xf32>
    %c0_3 = arith.constant 0 : index
    %c0_4 = arith.constant 0 : index
    %3 = vector.load %arg3[%c0_3, %c0_4] : memref<16x1xf32, #tpu.memory_space<vmem>>, vector<16x1xf32>
    %4 = vector.broadcast %3 : vector<16x1xf32> to vector<16x512xf32>
    %5 = arith.addf %2, %4 : vector<16x512xf32>
    %c0_5 = arith.constant 0 : index
    %c0_6 = arith.constant 0 : index
    %6 = vector.load %arg4[%c0_5, %c0_6] : memref<16x512xf32, #tpu.memory_space<vmem>>, vector<16x512xf32>
    tpu.vector_store %arg4[%c0_5, %c0_6], %5 {strides = array<i32>} : memref<16x512xf32, #tpu.memory_space<vmem>>, vector<16x512xf32>,
    return
  }
  func.func @transform_0(%arg0: i32) -> (i32, i32) {
    %c0_i32 = arith.constant 0 : i32
    %c0_i32_0 = arith.constant 0 : i32
    %c0_i32_1 = arith.constant 0 : i32
    return %c0_i32, %c0_i32_0 : i32, i32
  }
  func.func @transform_1(%arg0: i32) -> (i32, i32) {
    %c0_i32 = arith.constant 0 : i32
    %c0_i32_0 = arith.constant 0 : i32
    return %c0_i32, %arg0 : i32, i32
  }
  func.func @transform_2(%arg0: i32) -> (i32, i32) {
    %c0_i32 = arith.constant 0 : i32
    %c0_i32_0 = arith.constant 0 : i32
    %c0_i32_1 = arith.constant 0 : i32
    return %c0_i32, %c0_i32_0 : i32, i32
  }
  func.func @transform_3(%arg0: i32) -> (i32, i32) {
    %c0_i32 = arith.constant 0 : i32
    %c0_i32_0 = arith.constant 0 : i32
    return %c0_i32, %arg0 : i32, i32
  }
}

module attributes {stable_mosaic.version = 11 : i64} {
  func.func @_mm_bias_kernel(%arg0: i32, %arg1: memref<8x784xbf16, #tpu.memory_space<vmem>>, %arg2: memref<784x512xbf16, #tpu.memory_space<vmem>>, %arg3: memref<8x1xf32, #tpu.memory_space<vmem>>, %arg4: memref<8x512xf32, #tpu.memory_space<vmem>>) attributes {dimension_semantics = [#tpu.dimension_semantics<parallel>], iteration_bounds = array<i64: 1>, scalar_prefetch = 0 : i64, scratch_operands = 0 : i64, tpu.core_type = #tpu.core_type<tc>, window_params = [{pipeline_mode = #tpu.pipeline_mode<synchronous>, transform_indices = @transform_0, window_bounds = array<i64: 8, 784>}, {transform_indices = @transform_1, window_bounds = array<i64: 784, 512>}, {pipeline_mode = #tpu.pipeline_mode<synchronous>, transform_indices = @transform_2, window_bounds = array<i64: 8, 1>}, {transform_indices = @transform_3, window_bounds = array<i64: 8, 512>}]} {
    %c0 = arith.constant 0 : index
    %c0_0 = arith.constant 0 : index
    %0 = vector.load %arg1[%c0, %c0_0] : memref<8x784xbf16, #tpu.memory_space<vmem>>, vector<8x784xbf16>
    %c0_1 = arith.constant 0 : index
    %c0_2 = arith.constant 0 : index
    %1 = vector.load %arg2[%c0_1, %c0_2] : memref<784x512xbf16, #tpu.memory_space<vmem>>, vector<784x512xbf16>
    %cst = arith.constant dense<0.000000e+00> : vector<8x512xf32>
    %2 = tpu.matmul %0, %1, %cst {dimension_numbers = #tpu.dot_dimension_numbers<[1], [0], [0], [1], [0, 0, 1, 1], [], []>} : vector<8x784xbf16>, vector<784x512xbf16>, vector<8x512xf32> -> vector<8x512xf32>
    %c0_3 = arith.constant 0 : index
    %c0_4 = arith.constant 0 : index
    %3 = vector.load %arg3[%c0_3, %c0_4] : memref<8x1xf32, #tpu.memory_space<vmem>>, vector<8x1xf32>
    %4 = vector.broadcast %3 : vector<8x1xf32> to vector<8x512xf32>
    %5 = arith.addf %2, %4 : vector<8x512xf32>
    %c0_5 = arith.constant 0 : index
    %c0_6 = arith.constant 0 : index
    %6 = vector.load %arg4[%c0_5, %c0_6] : memref<8x512xf32, #tpu.memory_space<vmem>>, vector<8x512xf32>
    tpu.vector_store %arg4[%c0_5, %c0_6], %5 {strides = array<i32>} : memref<8x512xf32, #tpu.memory_space<vmem>>, vector<8x512xf32>,
    return
  }
  func.func @transform_0(%arg0: i32) -> (i32, i32) {
    %c0_i32 = arith.constant 0 : i32
    %c0_i32_0 = arith.constant 0 : i32
    %c0_i32_1 = arith.constant 0 : i32
    return %c0_i32, %c0_i32_0 : i32, i32
  }
  func.func @transform_1(%arg0: i32) -> (i32, i32) {
    %c0_i32 = arith.constant 0 : i32
    %c0_i32_0 = arith.constant 0 : i32
    return %c0_i32, %arg0 : i32, i32
  }
  func.func @transform_2(%arg0: i32) -> (i32, i32) {
    %c0_i32 = arith.constant 0 : i32
    %c0_i32_0 = arith.constant 0 : i32
    %c0_i32_1 = arith.constant 0 : i32
    return %c0_i32, %c0_i32_0 : i32, i32
  }
  func.func @transform_3(%arg0: i32) -> (i32, i32) {
    %c0_i32 = arith.constant 0 : i32
    %c0_i32_0 = arith.constant 0 : i32
    return %c0_i32, %arg0 : i32, i32
  }
}

</mosaic_0001>

<bundles_post_ra>
// kernel: network_forward.39
= control target key start
LH: loop header
LB: loop body
LE: loop exit
PB: predicated region body
PF: predicated region fallthrough
CT: control target
= control target key end

     0   :  { %v492_v2 = vmov 0   ;;  %vm270_vm0 = vcmask 1040384   ;;  %vm266_vm1 = vcmask 154624   ;;  %vm271_vm2 = vcmask 1041408   ;;  %s665_s1 = inlined_call_operand.vmem [shape: bf16[147,512], index: 1, kind: input, shape index: {}]   ;;  %s666_s0 = inlined_call_operand.vmem [shape: bf16[16,147], index: 0, kind: input, shape index: {}]   ;;  %s667_s2 = inlined_call_operand.vmem [shape: f32[16,1], index: 2, kind: input, shape index: {}]   ;;  %s668_s3 = inlined_call_operand.vmem [shape: f32[16,512], index: 3, kind: output, shape index: {}]  }
   0x1   :  { %v431_v0 = vld [vmem:[%s665_s1 + $0x4] ss:$16 sps:$4 sm:$0xff]   ;;  %v433_v1 = vld [vmem:[%s665_s1 + $0xc] ss:$16 sps:$4 sm:$0xff]   ;;  %430 = vset.pattern.permute.xlu0 %v492_v2  ;;  %v435_v3 = vld [vmem:[%s665_s1] ss:$16 sps:$4 sm:$0xff]  }
   0x2   :  { %286 = vmatprep.subr.bf16.mxu0 %v431_v0  ;;  %v436_v4 = vld [vmem:[%s665_s1 + $0x8] ss:$16 sps:$4 sm:$0xff]   ;;  %329 = vmatprep.subr.bf16.mxu1 %v433_v1  ;;  %v437_v5 = vld [vmem:[%s665_s1 + $0x24] ss:$16 sps:$4 sm:$0xff]   ;;  %v439_v6 = vld [vmem:[%s665_s1 + $0x2c] ss:$16 sps:$4 sm:$0xff]  }
   0x3   :  { %287 = vmatpush1.bf16.msra.mxu0 %v435_v3  ;;  %330 = vmatpush1.bf16.msra.mxu1 %v436_v4  ;;  %v441_v7 = vld [vmem:[%s665_s1 + $0x20] ss:$16 sps:$4 sm:$0xff]   ;;  %v442_v8 = vld [vmem:[%s665_s1 + $0x28] ss:$16 sps:$4 sm:$0xff]   ;;  %v443_v9 = vld [vmem:[%s665_s1 + $0x44] ss:$16 sps:$4 sm:$0xff]  }
   0x4   :  { %288 = vmatprep.subr.bf16.mxu0 %v437_v5  ;;  %331 = vmatprep.subr.bf16.mxu1 %v439_v6  ;;  %v445_v10 = vld [vmem:[%s665_s1 + $0x4c] ss:$16 sps:$4 sm:$0xff]   ;;  %v447_v11 = vld [vmem:[%s665_s1 + $0x40] ss:$16 sps:$4 sm:$0xff]   ;;  %v448_v12 = vld [vmem:[%s665_s1 + $0x48] ss:$16 sps:$4 sm:$0xff]  }
   0x5   :  { %v449_v13 = vld [vmem:[%s665_s1 + $0x64] ss:$16 sps:$4 sm:$0xff]   ;;  %v451_v14 = vld [vmem:[%s665_s1 + $0x6c] ss:$16 sps:$4 sm:$0xff]   ;;  %v453_v15 = vld [vmem:[%s665_s1 + $0x60] ss:$16 sps:$4 sm:$0xff]  }
   0x6   :  { %v454_v16 = vld [vmem:[%s665_s1 + $0x68] ss:$16 sps:$4 sm:$0xff]   ;;  %v455_v17 = vld [vmem:[%s665_s1 + $0x84] ss:$16 sps:$4 sm:$0xff]   ;;  %v457_v18 = vld [vmem:[%s665_s1 + $0x8c] ss:$16 sps:$4 sm:$0xff]  }
   0x7   :  { %289 = vmatpush1.bf16.msra.mxu0 %v441_v7  ;;  %332 = vmatpush1.bf16.msra.mxu1 %v442_v8  ;;  %v459_v19 = vld [vmem:[%s665_s1 + $0x80] ss:$16 sps:$4 sm:$0xff]   ;;  %v460_v20 = vld [vmem:[%s665_s1 + $0x88] ss:$16 sps:$4 sm:$0xff]   ;;  %v461_v21 = vld [vmem:[%s665_s1 + $0xa4] ss:$16 sps:$4 sm:$0xff]  }
   0x8   :  { %290 = vmatprep.subr.bf16.mxu0 %v443_v9  ;;  %333 = vmatprep.subr.bf16.mxu1 %v445_v10  ;;  %v463_v22 = vld [vmem:[%s665_s1 + $0xac] ss:$16 sps:$4 sm:$0xff]   ;;  %v465_v23 = vld [vmem:[%s665_s1 + $0xa0] ss:$16 sps:$4 sm:$0xff]   ;;  %v466_v24 = vld [vmem:[%s665_s1 + $0xa8] ss:$16 sps:$4 sm:$0xff]  }
   0x9   :  { %v467_v25 = vld [vmem:[%s665_s1 + $0xc4] ss:$16 sps:$4 sm:$0xff]   ;;  %v469_v26 = vld [vmem:[%s665_s1 + $0xcc] ss:$16 sps:$4 sm:$0xff]   ;;  %v471_v27 = vld [vmem:[%s665_s1 + $0xc0] ss:$16 sps:$4 sm:$0xff]  }
   0xa   :  { %v472_v28 = vld [vmem:[%s665_s1 + $0xc8] ss:$16 sps:$4 sm:$0xff]   ;;  %v473_v29 = vld [vmem:[%s665_s1 + $0xe4] ss:$16 sps:$4 sm:$0xff]   ;;  %v475_v30 = vld [vmem:[%s665_s1 + $0xec] ss:$16 sps:$4 sm:$0xff]  }
   0xb   :  { %291 = vmatpush1.bf16.msra.mxu0 %v447_v11  ;;  %334 = vmatpush1.bf16.msra.mxu1 %v448_v12  ;;  %v491_v31 = vld [vmem:[%s666_s0 + $0x4] ss:$8 sps:$4 sm:$0xff]   ;;  %v493_v34 = vmov 65535   ;;  %v477_v37 = vld [vmem:[%s665_s1 + $0xe0] ss:$16 sps:$4 sm:$0xff]  }
   0xc   :  { %292 = vmatprep.subr.bf16.mxu0 %v449_v13  ;;  %335 = vmatprep.subr.bf16.mxu1 %v451_v14  ;;  %v53_v32 = vld [vmem:[%s665_s1 + $0x120] sm:$0x33]  ;;  %v54_v33 = vld [vmem:[%s665_s1 + $0x128] sm:$0x33]  ;;  %v272_v35 = vsel %vm270_vm0, 4294967295, %v493_v34 }
   0xd   :  { %426 = vmatprep.mubr.msk.bf16.mxu0 %vm266_vm1, %v491_v31  ;;  %427 = vmatprep.mubr.msk.bf16.mxu1 %vm266_vm1, %v491_v31  ;;  %v55_v36 = vld [vmem:[%s667_s2] sm:$0xff]  ;;  %v478_v38 = vld [vmem:[%s665_s1 + $0xe8] ss:$16 sps:$4 sm:$0xff]   ;;  %v481_v40 = vld [vmem:[%s665_s1 + $0x10c] ss:$16 sps:$4 sm:$0xff]   ;;  %v423_v41 = vcombine.high %v53_v32, %v53_v32  ;;  %v425_v42 = vcombine.high %v54_v33, %v54_v33  ;;  %v273_v43 = vsel %vm271_vm2, %v272_v35, 0  ;;  %v422_v47 = vcombine.low %v53_v32, %v53_v32 }
   0xe   :  { %v479_v39 = vld [vmem:[%s665_s1 + $0x104] ss:$16 sps:$4 sm:$0xff]   ;;  %59 = vperm.xlu0 %430, %v55_v36   ;;  %v56_v44 = vld [vmem:[%s667_s2 + $0x8] sm:$0xff]  ;;  %v483_v45 = vld [vmem:[%s665_s1 + $0x100] ss:$16 sps:$4 sm:$0xff]   ;;  %v424_v48 = vcombine.low %v54_v33, %v54_v33 }
   0xf   :  { %293 = vmatpush1.bf16.msra.mxu0 %v453_v15  ;;  %336 = vmatpush1.bf16.msra.mxu1 %v454_v16  ;;  %v484_v46 = vld [vmem:[%s665_s1 + $0x108] ss:$16 sps:$4 sm:$0xff]   ;;  %v278_v49 = vand.u32 %v423_v41, %v273_v43  ;;  %v284_v50 = vand.u32 %v425_v42, %v273_v43  ;;  %v275_v51 = vand.u32 %v422_v47, %v273_v43 }
  0x10   :  { %294 = vmatprep.subr.bf16.mxu0 %v455_v17  ;;  %337 = vmatprep.subr.bf16.mxu1 %v457_v18  ;;  %v281_v52 = vand.u32 %v424_v48, %v273_v43  ;;  %v489_v53 = vld [vmem:[%s666_s0] ss:$8 sps:$4 sm:$0xff]  }
  0x12   :  { %64 = vperm.xlu0 %430, %v56_v44  }
  0x13   :  { %295 = vmatpush1.bf16.msra.mxu0 %v459_v19  ;;  %338 = vmatpush1.bf16.msra.mxu1 %v460_v20 }
  0x14   :  { %296 = vmatprep.subr.bf16.mxu0 %v461_v21  ;;  %339 = vmatprep.subr.bf16.mxu1 %v463_v22 }
  0x17   :  { %297 = vmatpush1.bf16.msra.mxu0 %v465_v23  ;;  %340 = vmatpush1.bf16.msra.mxu1 %v466_v24 }
  0x18   :  { %298 = vmatprep.subr.bf16.mxu0 %v467_v25  ;;  %341 = vmatprep.subr.bf16.mxu1 %v469_v26 }
  0x1b   :  { %299 = vmatpush1.bf16.msra.mxu0 %v471_v27  ;;  %342 = vmatpush1.bf16.msra.mxu1 %v472_v28 }
  0x1c   :  { %300 = vmatprep.subr.bf16.mxu0 %v473_v29  ;;  %343 = vmatprep.subr.bf16.mxu1 %v475_v30 }
  0x1f   :  { %301 = vmatpush1.bf16.msra.mxu0 %v477_v37  ;;  %344 = vmatpush1.bf16.msra.mxu1 %v478_v38 }
  0x20   :  { %302 = vmatprep.subr.bf16.mxu0 %v479_v39  ;;  %345 = vmatprep.subr.bf16.mxu1 %v481_v40 }
  0x23   :  { %303 = vmatpush1.bf16.msra.mxu0 %v483_v45  ;;  %346 = vmatpush1.bf16.msra.mxu1 %v484_v46 }
  0x24   :  { %304 = vmatprep.subr.bf16.mxu0 %v278_v49  ;;  %347 = vmatprep.subr.bf16.mxu1 %v284_v50 }
  0x27   :  { %305 = vmatpush1.bf16.msra.mxu0 %v275_v51  ;;  %348 = vmatpush1.bf16.msra.mxu1 %v281_v52 }
  0x2a   :  { %319 = vmatmul.mubr.bf16.vlgmr.msra.gmra.mrb[0].mxu0 %v489_v53  ;;  %362 = vmatmul.mubr.bf16.vlgmr.msra.gmra.mrb[0].mxu1 %v489_v53 }
  0x8d   :  { %v60_v54 = vpop.permute.xlu0 %59 }
  0x91   :  { %v65_v55 = vpop.permute.xlu0 %64 }
  0xfd   :  { %v320_v56 = vpop.f32.mrb[0].mxu0  ;;  %v363_v57 = vpop.f32.mrb[0].mxu1 }
  0xfe   :  { %v321_v58 = vadd.f32 %v320_v56, %v60_v54  ;;  %v364_v59 = vadd.f32 %v363_v57, %v60_v54  ;;  %v322_v60 = vpop.f32.mrb[1].mxu0  ;;  %v365_v61 = vpop.f32.mrb[1].mxu1 }
  0xff   :  { %v323_v62 = vadd.f32 %v322_v60, %v60_v54  ;;  %v366_v63 = vadd.f32 %v365_v61, %v60_v54  ;;  %v324_v0 = vpop.f32.mrb[2].mxu0  ;;  %v367_v1 = vpop.f32.mrb[2].mxu1 }
 0x100   :  { %372 = vst [vmem:[%s668_s3] sm:$0xff] %v321_v58  ;;  %374 = vst [vmem:[%s668_s3 + $0x10] sm:$0xff] %v364_v59  ;;  %v325_v2 = vadd.f32 %v324_v0, %v65_v55  ;;  %v368_v3 = vadd.f32 %v367_v1, %v65_v55  ;;  %v326_v4 = vpop.f32.mrb[3].mxu0  ;;  %v369_v5 = vpop.f32.mrb[3].mxu1 }
 0x101   :  { %373 = vst [vmem:[%s668_s3 + $0x8] sm:$0xff] %v323_v62  ;;  %375 = vst [vmem:[%s668_s3 + $0x18] sm:$0xff] %v366_v63  ;;  %v327_v6 = vadd.f32 %v326_v4, %v65_v55  ;;  %v370_v7 = vadd.f32 %v369_v5, %v65_v55 }
 0x102   :  { %376 = vst [vmem:[%s668_s3 + $0x20] sm:$0xff] %v325_v2  ;;  %378 = vst [vmem:[%s668_s3 + $0x30] sm:$0xff] %v368_v3 }
 0x103   :  { %377 = vst [vmem:[%s668_s3 + $0x28] sm:$0xff] %v327_v6  ;;  %379 = vst [vmem:[%s668_s3 + $0x38] sm:$0xff] %v370_v7 }

// kernel: network_forward.40
= control target key start
LH: loop header
LB: loop body
LE: loop exit
PB: predicated region body
PF: predicated region fallthrough
CT: control target
= control target key end

     0   :  { %v248_v0 = vmov 0   ;;  %vm133_vm0 = vcmask 130048   ;;  %s332_s1 = inlined_call_operand.vmem [shape: bf16[144,128], index: 1, kind: input, shape index: {}]   ;;  %s333_s0 = inlined_call_operand.vmem [shape: bf16[32,144], index: 0, kind: input, shape index: {}]   ;;  %s334_s2 = inlined_call_operand.vmem [shape: f32[32,1], index: 2, kind: input, shape index: {}]   ;;  %s335_s3 = inlined_call_operand.vmem [shape: f32[32,128], index: 3, kind: output, shape index: {}]  }
   0x1   :  { %140 = vmatprep.subr.bf16.mxu0 %v248_v0  ;;  %212 = vmatprep.subr.bf16.mxu1 %v248_v0  ;;  %v233_v1 = vld [vmem:[%s332_s1] sm:$0xff]   ;;  %v234_v2 = vld [vmem:[%s332_s1 + $0x8] sm:$0xff]   ;;  %v235_v3 = vld [vmem:[%s332_s1 + $0x10] sm:$0xff]  }
   0x2   :  { %232 = vset.pattern.permute.xlu1 %v248_v0  ;;  %231 = vset.pattern.permute.xlu0 %v248_v0  ;;  %v236_v4 = vld [vmem:[%s332_s1 + $0x18] sm:$0xff]   ;;  %v244_v5 = vld [vmem:[%s333_s0 + $0x4] ss:$8 sps:$4 sm:$0xff]   ;;  %v39_v7 = vld [vmem:[%s334_s2 + $0x10] sm:$0xff] }
   0x3   :  { %141 = vmatpush1.bf16.msra.mxu0 %v233_v1  ;;  %221 = vmatpush1.bf16.msra.mxu1 %v233_v1  ;;  %v247_v6 = vld [vmem:[%s333_s0 + $0x14] ss:$8 sps:$4 sm:$0xff]   ;;  %v37_v8 = vld [vmem:[%s334_s2] sm:$0xff]  ;;  %v38_v11 = vld [vmem:[%s334_s2 + $0x8] sm:$0xff] }
   0x4   :  { %142 = vmatprep.subr.bf16.mxu0 %v248_v0  ;;  %213 = vmatprep.subr.bf16.mxu1 %v248_v0  ;;  %v40_v9 = vld [vmem:[%s334_s2 + $0x18] sm:$0xff]  ;;  %v237_v10 = vld [vmem:[%s332_s1 + $0x20] sm:$0xff]   ;;  %v238_v12 = vld [vmem:[%s332_s1 + $0x28] sm:$0xff]  }
   0x5   :  { %210 = vmatprep.mubr.msk.bf16.mxu0 %vm133_vm0, %v244_v5  ;;  %53 = vperm.xlu1 %232, %v39_v7   ;;  %v239_v13 = vld [vmem:[%s332_s1 + $0x30] sm:$0xff]   ;;  %v240_v14 = vld [vmem:[%s332_s1 + $0x38] sm:$0xff]   ;;  %v241_v15 = vld [vmem:[%s332_s1 + $0x40] sm:$0xff]  }
   0x6   :  { %211 = vmatprep.mubr.msk.bf16.mxu1 %vm133_vm0, %v247_v6  ;;  %43 = vperm.xlu0 %231, %v37_v8   ;;  %v242_v16 = vld [vmem:[%s333_s0] ss:$8 sps:$4 sm:$0xff]   ;;  %v245_v17 = vld [vmem:[%s333_s0 + $0x10] ss:$8 sps:$4 sm:$0xff]  }
   0x7   :  { %143 = vmatpush1.bf16.msra.mxu0 %v234_v2  ;;  %222 = vmatpush1.bf16.msra.mxu1 %v234_v2 }
   0x8   :  { %144 = vmatprep.subr.bf16.mxu0 %v248_v0  ;;  %214 = vmatprep.subr.bf16.mxu1 %v248_v0 }
   0x9   :  { %58 = vperm.xlu1 %232, %v40_v9  }
   0xa   :  { %48 = vperm.xlu0 %231, %v38_v11  }
   0xb   :  { %145 = vmatpush1.bf16.msra.mxu0 %v235_v3  ;;  %223 = vmatpush1.bf16.msra.mxu1 %v235_v3 }
   0xc   :  { %146 = vmatprep.subr.bf16.mxu0 %v248_v0  ;;  %215 = vmatprep.subr.bf16.mxu1 %v248_v0 }
   0xf   :  { %147 = vmatpush1.bf16.msra.mxu0 %v236_v4  ;;  %224 = vmatpush1.bf16.msra.mxu1 %v236_v4 }
  0x10   :  { %148 = vmatprep.subr.bf16.mxu0 %v248_v0  ;;  %216 = vmatprep.subr.bf16.mxu1 %v248_v0 }
  0x13   :  { %149 = vmatpush1.bf16.msra.mxu0 %v237_v10  ;;  %225 = vmatpush1.bf16.msra.mxu1 %v237_v10 }
  0x14   :  { %150 = vmatprep.subr.bf16.mxu0 %v248_v0  ;;  %217 = vmatprep.subr.bf16.mxu1 %v248_v0 }
  0x17   :  { %151 = vmatpush1.bf16.msra.mxu0 %v238_v12  ;;  %226 = vmatpush1.bf16.msra.mxu1 %v238_v12 }
  0x18   :  { %152 = vmatprep.subr.bf16.mxu0 %v248_v0  ;;  %218 = vmatprep.subr.bf16.mxu1 %v248_v0 }
  0x1b   :  { %153 = vmatpush1.bf16.msra.mxu0 %v239_v13  ;;  %227 = vmatpush1.bf16.msra.mxu1 %v239_v13 }
  0x1c   :  { %154 = vmatprep.subr.bf16.mxu0 %v248_v0  ;;  %219 = vmatprep.subr.bf16.mxu1 %v248_v0 }
  0x1f   :  { %155 = vmatpush1.bf16.msra.mxu0 %v240_v14  ;;  %228 = vmatpush1.bf16.msra.mxu1 %v240_v14 }
  0x20   :  { %156 = vmatprep.subr.bf16.mxu0 %v248_v0  ;;  %220 = vmatprep.subr.bf16.mxu1 %v248_v0 }
  0x23   :  { %157 = vmatpush1.bf16.msra.mxu0 %v241_v15  ;;  %229 = vmatpush1.bf16.msra.mxu1 %v241_v15 }
  0x26   :  { %173 = vmatmul.mubr.bf16.vlgmr.msra.gmra.mrb[0].mxu0 %v242_v16  ;;  %181 = vmatmul.mubr.bf16.vlgmr.msra.gmra.mrb[0].mxu1 %v245_v17 }
  0x84   :  { %v54_v18 = vpop.permute.xlu1 %53 }
  0x85   :  { %v44_v19 = vpop.permute.xlu0 %43 }
  0x88   :  { %v59_v20 = vpop.permute.xlu1 %58 }
  0x89   :  { %v49_v21 = vpop.permute.xlu0 %48 }
  0xf9   :  { %v174_v22 = vpop.f32.mrb[0].mxu0  ;;  %v182_v23 = vpop.f32.mrb[0].mxu1 }
  0xfa   :  { %v175_v24 = vadd.f32 %v174_v22, %v44_v19  ;;  %v183_v25 = vadd.f32 %v182_v23, %v54_v18  ;;  %v176_v26 = vpop.f32.mrb[1].mxu0  ;;  %v184_v27 = vpop.f32.mrb[1].mxu1 }
  0xfb   :  { %v177_v28 = vpop.f32.mrb[2].mxu0  ;;  %v185_v29 = vpop.f32.mrb[2].mxu1 }
  0xfc   :  { %189 = vst [vmem:[%s335_s3] sm:$0xff] %v175_v24  ;;  %191 = vst [vmem:[%s335_s3 + $0x10] sm:$0xff] %v183_v25  ;;  %v178_v30 = vadd.f32 %v177_v28, %v49_v21  ;;  %v186_v31 = vadd.f32 %v185_v29, %v59_v20  ;;  %v179_v32 = vpop.f32.mrb[3].mxu0  ;;  %v187_v33 = vpop.f32.mrb[3].mxu1 }
  0xfe   :  { %190 = vst [vmem:[%s335_s3 + $0x8] sm:$0xff] %v178_v30  ;;  %192 = vst [vmem:[%s335_s3 + $0x18] sm:$0xff] %v186_v31 }

// kernel: network_forward.42
= control target key start
LH: loop header
LB: loop body
LE: loop exit
PB: predicated region body
PF: predicated region fallthrough
CT: control target
= control target key end

     0   :  { %v279_v1 = vmov 0   ;;  %vm122_vm0 = vcmask 1040384   ;;  %vm118_vm1 = vcmask 400384   ;;  %s375_s1 = inlined_call_operand.vmem [shape: bf16[49,512], index: 1, kind: input, shape index: {}]   ;;  %s376_s2 = inlined_call_operand.vmem [shape: f32[16,1], index: 2, kind: input, shape index: {}]   ;;  %s377_s0 = inlined_call_operand.vmem [shape: bf16[16,49], index: 0, kind: input, shape index: {}]   ;;  %s378_s3 = inlined_call_operand.vmem [shape: f32[16,512], index: 3, kind: output, shape index: {}]  }
   0x1   :  { %v256_v0 = vld [vmem:[%s375_s1 + $0x4] ss:$16 sps:$4 sm:$0xff]   ;;  %169 = vmatprep.mubr.bf16.mxu0 %v279_v1  ;;  %212 = vmatprep.mubr.bf16.mxu1 %v279_v1  ;;  %v258_v2 = vld [vmem:[%s375_s1 + $0xc] ss:$16 sps:$4 sm:$0xff]   ;;  %v260_v3 = vld [vmem:[%s375_s1] ss:$16 sps:$4 sm:$0xff]  }
   0x2   :  { %255 = vset.pattern.permute.xlu0 %v279_v1  ;;  %137 = vmatprep.subr.bf16.mxu0 %v256_v0  ;;  %v261_v4 = vld [vmem:[%s375_s1 + $0x8] ss:$16 sps:$4 sm:$0xff]   ;;  %v262_v5 = vld [vmem:[%s375_s1 + $0x24] ss:$16 sps:$4 sm:$0xff]   ;;  %v264_v6 = vld [vmem:[%s375_s1 + $0x2c] ss:$16 sps:$4 sm:$0xff]  }
   0x3   :  { %180 = vmatprep.subr.bf16.mxu1 %v258_v2  ;;  %138 = vmatpush1.bf16.msra.mxu0 %v260_v3  ;;  %v266_v7 = vld [vmem:[%s375_s1 + $0x20] ss:$16 sps:$4 sm:$0xff]   ;;  %v267_v8 = vld [vmem:[%s375_s1 + $0x28] ss:$16 sps:$4 sm:$0xff]   ;;  %v268_v9 = vld [vmem:[%s375_s1 + $0x44] ss:$16 sps:$4 sm:$0xff]  }
   0x4   :  { %181 = vmatpush1.bf16.msra.mxu1 %v261_v4  ;;  %139 = vmatprep.subr.bf16.mxu0 %v262_v5  ;;  %v124_v10 = vsel %vm122_vm0, 65535, %v279_v1  ;;  %v270_v11 = vld [vmem:[%s375_s1 + $0x4c] ss:$16 sps:$4 sm:$0xff]   ;;  %v272_v12 = vld [vmem:[%s375_s1 + $0x40] ss:$16 sps:$4 sm:$0xff]  }
   0x5   :  { %182 = vmatprep.subr.bf16.mxu1 %v264_v6  ;;  %v273_v13 = vld [vmem:[%s375_s1 + $0x48] ss:$16 sps:$4 sm:$0xff]   ;;  %v29_v14 = vld [vmem:[%s375_s1 + $0x60] sm:$0x11] }
   0x6   :  { %v30_v15 = vld [vmem:[%s375_s1 + $0x68] sm:$0x11]  ;;  %v249_v16 = vcombine.high %v29_v14, %v29_v14  ;;  %v248_v18 = vcombine.low %v29_v14, %v29_v14  ;;  %v31_v19 = vld [vmem:[%s376_s2] sm:$0xff] }
   0x7   :  { %140 = vmatpush1.bf16.msra.mxu0 %v266_v7  ;;  %v251_v17 = vcombine.high %v30_v15, %v30_v15  ;;  %v250_v20 = vcombine.low %v30_v15, %v30_v15  ;;  %35 = vperm.xlu0 %255, %v31_v19   ;;  %v32_v23 = vld [vmem:[%s376_s2 + $0x8] sm:$0xff]  ;;  %v278_v26 = vld [vmem:[%s377_s0] sm:$0xff]  }
   0x8   :  { %183 = vmatpush1.bf16.msra.mxu1 %v267_v8  ;;  %141 = vmatprep.subr.bf16.mxu0 %v268_v9  ;;  %v129_v21 = vand.u32 %v249_v16, %v124_v10  ;;  %v126_v24 = vand.u32 %v248_v18, %v124_v10 }
   0x9   :  { %184 = vmatprep.subr.bf16.mxu1 %v270_v11  ;;  %v135_v22 = vand.u32 %v251_v17, %v124_v10  ;;  %v132_v25 = vand.u32 %v250_v20, %v124_v10 }
   0xb   :  { %142 = vmatpush1.bf16.msra.mxu0 %v272_v12  ;;  %40 = vperm.xlu0 %255, %v32_v23  }
   0xc   :  { %185 = vmatpush1.bf16.msra.mxu1 %v273_v13  ;;  %143 = vmatprep.subr.bf16.mxu0 %v129_v21 }
   0xd   :  { %186 = vmatprep.subr.bf16.mxu1 %v135_v22 }
   0xf   :  { %144 = vmatpush1.bf16.msra.mxu0 %v126_v24 }
  0x10   :  { %187 = vmatpush1.bf16.msra.mxu1 %v132_v25 }
  0x12   :  { %252 = vmatmul.mubr.msk.bf16.vlgmr.msra.gmra.mrb[0].mxu0 %vm118_vm1, %v278_v26 }
  0x13   :  { %253 = vmatmul.mubr.msk.bf16.vlgmr.msra.gmra.mrb[0].mxu1 %vm118_vm1, %v278_v26 }
  0x86   :  { %v36_v27 = vpop.permute.xlu0 %35 }
  0x8a   :  { %v41_v28 = vpop.permute.xlu0 %40 }
  0xe5   :  { %v171_v29 = vpop.f32.mrb[0].mxu0 }
  0xe6   :  { %v214_v30 = vpop.f32.mrb[0].mxu1  ;;  %v172_v31 = vadd.f32 %v171_v29, %v36_v27  ;;  %v173_v33 = vpop.f32.mrb[1].mxu0 }
  0xe7   :  { %v215_v32 = vadd.f32 %v214_v30, %v36_v27  ;;  %v216_v34 = vpop.f32.mrb[1].mxu1  ;;  %v174_v35 = vadd.f32 %v173_v33, %v36_v27  ;;  %v175_v37 = vpop.f32.mrb[2].mxu0 }
  0xe8   :  { %v217_v36 = vadd.f32 %v216_v34, %v36_v27  ;;  %v218_v38 = vpop.f32.mrb[2].mxu1  ;;  %223 = vst [vmem:[%s378_s3] sm:$0xff] %v172_v31  ;;  %v176_v39 = vadd.f32 %v175_v37, %v41_v28  ;;  %v177_v41 = vpop.f32.mrb[3].mxu0 }
  0xe9   :  { %225 = vst [vmem:[%s378_s3 + $0x10] sm:$0xff] %v215_v32  ;;  %v219_v40 = vadd.f32 %v218_v38, %v41_v28  ;;  %v220_v42 = vpop.f32.mrb[3].mxu1  ;;  %224 = vst [vmem:[%s378_s3 + $0x8] sm:$0xff] %v174_v35  ;;  %v178_v43 = vadd.f32 %v177_v41, %v41_v28 }
  0xea   :  { %226 = vst [vmem:[%s378_s3 + $0x18] sm:$0xff] %v217_v36  ;;  %v221_v44 = vadd.f32 %v220_v42, %v41_v28  ;;  %227 = vst [vmem:[%s378_s3 + $0x20] sm:$0xff] %v176_v39 }
  0xeb   :  { %229 = vst [vmem:[%s378_s3 + $0x30] sm:$0xff] %v219_v40  ;;  %228 = vst [vmem:[%s378_s3 + $0x28] sm:$0xff] %v178_v43 }
  0xec   :  { %230 = vst [vmem:[%s378_s3 + $0x38] sm:$0xff] %v221_v44 }

// kernel: network_forward.41
= control target key start
LH: loop header
LB: loop body
LE: loop exit
PB: predicated region body
PF: predicated region fallthrough
CT: control target
= control target key end

     0   :  { %v583_v1 = vmov 0   ;;  %vm283_vm0 = vcmask 261120   ;;  %s746_s1 = inlined_call_operand.vmem [shape: bf16[288,128], index: 1, kind: input, shape index: {}]   ;;  %s747_s0 = inlined_call_operand.vmem [shape: bf16[64,288], index: 0, kind: input, shape index: {}]   ;;  %s748_s2 = inlined_call_operand.vmem [shape: f32[64,1], index: 2, kind: input, shape index: {}]   ;;  %s749_s3 = inlined_call_operand.vmem [shape: f32[64,128], index: 3, kind: output, shape index: {}]  }
   0x1   :  { %v549_v0 = vld [vmem:[%s746_s1 + $0x40] sm:$0xff]   ;;  %548 = vset.pattern.permute.xlu1 %v583_v1  ;;  %547 = vset.pattern.permute.xlu0 %v583_v1  ;;  %v551_v3 = vld [vmem:[%s746_s1 + $0x48] sm:$0xff]   ;;  %v553_v5 = vld [vmem:[%s746_s1 + $0x50] sm:$0xff]  }
   0x2   :  { %v550_v2 = vld [vmem:[%s746_s1] sm:$0xff]   ;;  %472 = vmatprep.subr.bf16.mxu0 %v549_v0  ;;  %530 = vmatprep.subr.bf16.mxu1 %v549_v0  ;;  %v552_v4 = vld [vmem:[%s746_s1 + $0x8] sm:$0xff]   ;;  %v554_v6 = vld [vmem:[%s746_s1 + $0x10] sm:$0xff]  }
   0x3   :  { %473 = vmatpush3.bf16.msra.mxu0 %v550_v2  ;;  %538 = vmatpush3.bf16.msra.mxu1 %v550_v2  ;;  %v555_v7 = vld [vmem:[%s746_s1 + $0x58] sm:$0xff]   ;;  %v557_v9 = vld [vmem:[%s746_s1 + $0x60] sm:$0xff]   ;;  %v559_v11 = vld [vmem:[%s746_s1 + $0x68] sm:$0xff]  }
   0x4   :  { %474 = vmatprep.subr.bf16.mxu0 %v551_v3  ;;  %531 = vmatprep.subr.bf16.mxu1 %v551_v3  ;;  %v556_v8 = vld [vmem:[%s746_s1 + $0x18] sm:$0xff]   ;;  %v558_v10 = vld [vmem:[%s746_s1 + $0x20] sm:$0xff]   ;;  %v560_v14 = vld [vmem:[%s746_s1 + $0x28] sm:$0xff]  }
   0x5   :  { %v567_v12 = vld [vmem:[%s747_s0 + $0x4] ss:$12 sps:$4 sm:$0xff]   ;;  %v570_v13 = vld [vmem:[%s747_s0 + $0x4c] ss:$12 sps:$4 sm:$0xff]   ;;  %v568_v23 = vld [vmem:[%s747_s0 + $0x48] ss:$12 sps:$4 sm:$0xff]  }
   0x6   :  { %v561_v15 = vld [vmem:[%s746_s1 + $0x70] sm:$0xff]   ;;  %328 = vmatprep.mubr.bf16.mxu0 %v567_v12  ;;  %352 = vmatprep.mubr.bf16.mxu1 %v570_v13  ;;  %v563_v17 = vld [vmem:[%s746_s1 + $0x78] sm:$0xff]   ;;  %v67_v20 = vld [vmem:[%s748_s2] sm:$0xff] }
   0x7   :  { %475 = vmatpush3.bf16.msra.mxu0 %v552_v4  ;;  %539 = vmatpush3.bf16.msra.mxu1 %v552_v4  ;;  %v562_v16 = vld [vmem:[%s746_s1 + $0x30] sm:$0xff]   ;;  %v564_v18 = vld [vmem:[%s746_s1 + $0x38] sm:$0xff]   ;;  %v571_v21 = vld [vmem:[%s746_s1 + $0x80] sm:$0xff]  }
   0x8   :  { %476 = vmatprep.subr.bf16.mxu0 %v553_v5  ;;  %532 = vmatprep.subr.bf16.mxu1 %v553_v5  ;;  %v69_v19 = vld [vmem:[%s748_s2 + $0x10] sm:$0xff]  ;;  %v565_v22 = vld [vmem:[%s747_s0] ss:$12 sps:$4 sm:$0xff]   ;;  %v70_v24 = vld [vmem:[%s748_s2 + $0x18] sm:$0xff] }
   0x9   :  { %87 = vperm.xlu1 %548, %v69_v19   ;;  %77 = vperm.xlu0 %547, %v67_v20   ;;  %v68_v25 = vld [vmem:[%s748_s2 + $0x8] sm:$0xff]  ;;  %v71_v30 = vld [vmem:[%s748_s2 + $0x20] sm:$0xff]  ;;  %v74_v33 = vld [vmem:[%s748_s2 + $0x38] sm:$0xff] }
   0xa   :  { %v573_v26 = vld [vmem:[%s747_s0 + $0x1c] ss:$12 sps:$4 sm:$0xff]   ;;  %v576_v31 = vld [vmem:[%s747_s0 + $0x18] ss:$12 sps:$4 sm:$0xff]   ;;  %v577_v32 = vld [vmem:[%s747_s0 + $0x20] ss:$12 sps:$4 sm:$0xff]  }
   0xb   :  { %477 = vmatpush3.bf16.msra.mxu0 %v554_v6  ;;  %540 = vmatpush3.bf16.msra.mxu1 %v554_v6  ;;  %v572_v27 = vld [vmem:[%s746_s1 + $0x88] sm:$0xff]   ;;  %v73_v34 = vld [vmem:[%s748_s2 + $0x30] sm:$0xff]  ;;  %v580_v36 = vld [vmem:[%s747_s0 + $0x38] ss:$12 sps:$4 sm:$0xff]  }
   0xc   :  { %478 = vmatprep.subr.bf16.mxu0 %v555_v7  ;;  %533 = vmatprep.subr.bf16.mxu1 %v555_v7  ;;  %v575_v28 = vld [vmem:[%s747_s0 + $0x8] ss:$12 sps:$4 sm:$0xff]   ;;  %v581_v37 = vld [vmem:[%s747_s0 + $0x30] ss:$12 sps:$4 sm:$0xff]  }
   0xd   :  { %92 = vperm.xlu1 %548, %v70_v24   ;;  %82 = vperm.xlu0 %547, %v68_v25   ;;  %v72_v29 = vld [vmem:[%s748_s2 + $0x28] sm:$0xff]  ;;  %v578_v35 = vld [vmem:[%s747_s0 + $0x34] ss:$12 sps:$4 sm:$0xff]   ;;  %v582_v38 = vld [vmem:[%s747_s0 + $0x50] ss:$12 sps:$4 sm:$0xff]  }
   0xf   :  { %479 = vmatpush3.bf16.msra.mxu0 %v556_v8  ;;  %541 = vmatpush3.bf16.msra.mxu1 %v556_v8 }
  0x10   :  { %480 = vmatprep.subr.bf16.mxu0 %v557_v9  ;;  %534 = vmatprep.subr.bf16.mxu1 %v557_v9 }
  0x11   :  { %102 = vperm.xlu1 %548, %v72_v29   ;;  %97 = vperm.xlu0 %547, %v71_v30  }
  0x13   :  { %481 = vmatpush3.bf16.msra.mxu0 %v558_v10  ;;  %542 = vmatpush3.bf16.msra.mxu1 %v558_v10 }
  0x14   :  { %482 = vmatprep.subr.bf16.mxu0 %v559_v11  ;;  %535 = vmatprep.subr.bf16.mxu1 %v559_v11 }
  0x15   :  { %112 = vperm.xlu1 %548, %v74_v33   ;;  %107 = vperm.xlu0 %547, %v73_v34  }
  0x17   :  { %483 = vmatpush3.bf16.msra.mxu0 %v560_v14  ;;  %543 = vmatpush3.bf16.msra.mxu1 %v560_v14 }
  0x18   :  { %484 = vmatprep.subr.bf16.mxu0 %v561_v15  ;;  %536 = vmatprep.subr.bf16.mxu1 %v561_v15 }
  0x1b   :  { %485 = vmatpush3.bf16.msra.mxu0 %v562_v16  ;;  %544 = vmatpush3.bf16.msra.mxu1 %v562_v16 }
  0x1c   :  { %486 = vmatprep.subr.bf16.mxu0 %v563_v17  ;;  %537 = vmatprep.subr.bf16.mxu1 %v563_v17 }
  0x1f   :  { %487 = vmatpush3.bf16.msra.mxu0 %v564_v18  ;;  %545 = vmatpush3.bf16.msra.mxu1 %v564_v18 }
  0x20   :  { %518 = vmatprep.subr.bf16.mxu1 %v571_v21 }
  0x22   :  { %329 = vmatmul.mubr.bf16.vlgmr.msra.gmra.mrb[0].mxu0 %v565_v22  ;;  %353 = vmatmul.mubr.bf16.vlgmr.msra.gmra.mrb[0].mxu1 %v568_v23 }
  0x23   :  { %519 = vmatpush3.bf16.msra.mxu1 %v571_v21  ;;  %336 = vmatprep.mubr.bf16.mxu0 %v573_v26 }
  0x24   :  { %520 = vmatprep.subr.bf16.mxu1 %v572_v27  ;;  %522 = vmatprep.mubr.msk.bf16.mxu1 %vm283_vm0, %v575_v28 }
  0x27   :  { %521 = vmatpush3.bf16.msra.mxu1 %v572_v27 }
  0x2a   :  { %337 = vmatmul.mubr.bf16.gmra.mrb[4].mxu0 %v576_v31  ;;  %523 = vmatmul.mubr.msk.bf16.vlgmr.msra.gmra.mrb[4].mxu1 %vm283_vm0, %v577_v32 }
  0x2b   :  { %344 = vmatprep.mubr.bf16.mxu0 %v578_v35  ;;  %526 = vmatprep.mubr.msk.bf16.mxu1 %vm283_vm0, %v580_v36 }
  0x32   :  { %345 = vmatmul.mubr.bf16.gmra.mrb[8].mxu0 %v581_v37  ;;  %527 = vmatmul.mubr.msk.bf16.gmra.mrb[8].mxu1 %vm283_vm0, %v582_v38 }
  0x88   :  { %v88_v39 = vpop.permute.xlu1 %87  ;;  %v78_v40 = vpop.permute.xlu0 %77 }
  0x8c   :  { %v93_v41 = vpop.permute.xlu1 %92  ;;  %v83_v42 = vpop.permute.xlu0 %82 }
  0x90   :  { %v98_v55 = vpop.permute.xlu0 %97  ;;  %v103_v56 = vpop.permute.xlu1 %102 }
  0x94   :  { %v108_v5 = vpop.permute.xlu0 %107  ;;  %v113_v9 = vpop.permute.xlu1 %112 }
  0xf5   :  { %v488_v43 = vpop.f32.mrb[0].mxu0  ;;  %v506_v44 = vpop.f32.mrb[0].mxu1 }
  0xf6   :  { %v489_v45 = vpop.f32.mrb[1].mxu0  ;;  %v507_v46 = vpop.f32.mrb[1].mxu1 }
  0xf7   :  { %v490_v47 = vadd.f32 %v489_v45, %v488_v43  ;;  %v491_v48 = vpop.f32.mrb[2].mxu0  ;;  %v508_v49 = vadd.f32 %v507_v46, %v506_v44  ;;  %v509_v50 = vpop.f32.mrb[2].mxu1 }
  0xf8   :  { %v492_v51 = vpop.f32.mrb[3].mxu0  ;;  %v510_v52 = vpop.f32.mrb[3].mxu1 }
  0xf9   :  { %v493_v53 = vadd.f32 %v492_v51, %v491_v48  ;;  %v511_v54 = vadd.f32 %v510_v52, %v509_v50  ;;  %v331_v59 = vadd.f32 %v490_v47, %v78_v40  ;;  %v355_v12 = vadd.f32 %v508_v49, %v108_v5 }
  0xfb   :  { %v334_v2 = vadd.f32 %v493_v53, %v83_v42  ;;  %v358_v16 = vadd.f32 %v511_v54, %v113_v9 }
  0xfd   :  { %v494_v57 = vpop.f32.mrb[4].mxu0  ;;  %v524_v58 = vpop.f32.mrb[4].mxu1 }
  0xfe   :  { %v495_v60 = vpop.f32.mrb[5].mxu0  ;;  %v395_v61 = vpop.f32.mrb[5].mxu1 }
  0xff   :  { %v496_v62 = vadd.f32 %v495_v60, %v494_v57  ;;  %v396_v63 = vadd.f32 %v395_v61, %v331_v59  ;;  %v497_v0 = vpop.f32.mrb[6].mxu0  ;;  %v525_v1 = vpop.f32.mrb[6].mxu1 }
 0x100   :  { %v498_v3 = vpop.f32.mrb[7].mxu0  ;;  %v398_v4 = vpop.f32.mrb[7].mxu1 }
 0x101   :  { %v339_v6 = vadd.f32 %v496_v62, %v88_v39  ;;  %426 = vst [vmem:[%s749_s3] sm:$0xff] %v396_v63  ;;  %v499_v7 = vadd.f32 %v498_v3, %v497_v0  ;;  %v399_v8 = vadd.f32 %v398_v4, %v334_v2 }
 0x103   :  { %v404_v10 = vadd.f32 %v524_v58, %v339_v6  ;;  %v342_v11 = vadd.f32 %v499_v7, %v93_v41  ;;  %427 = vst [vmem:[%s749_s3 + $0x8] sm:$0xff] %v399_v8 }
 0x105   :  { %428 = vst [vmem:[%s749_s3 + $0x10] sm:$0xff] %v404_v10  ;;  %v407_v13 = vadd.f32 %v525_v1, %v342_v11  ;;  %v500_v14 = vpop.f32.mrb[8].mxu0  ;;  %v528_v15 = vpop.f32.mrb[8].mxu1 }
 0x106   :  { %v420_v17 = vadd.f32 %v528_v15, %v355_v12  ;;  %v501_v18 = vpop.f32.mrb[9].mxu0  ;;  %v411_v19 = vpop.f32.mrb[9].mxu1 }
 0x107   :  { %429 = vst [vmem:[%s749_s3 + $0x18] sm:$0xff] %v407_v13  ;;  %v502_v20 = vadd.f32 %v501_v18, %v500_v14  ;;  %v503_v21 = vpop.f32.mrb[10].mxu0  ;;  %v529_v22 = vpop.f32.mrb[10].mxu1 }
 0x108   :  { %432 = vst [vmem:[%s749_s3 + $0x30] sm:$0xff] %v420_v17  ;;  %v423_v23 = vadd.f32 %v529_v22, %v358_v16  ;;  %v504_v24 = vpop.f32.mrb[11].mxu0  ;;  %v414_v25 = vpop.f32.mrb[11].mxu1 }
 0x109   :  { %v347_v26 = vadd.f32 %v502_v20, %v98_v55  ;;  %v505_v27 = vadd.f32 %v504_v24, %v503_v21 }
 0x10a   :  { %433 = vst [vmem:[%s749_s3 + $0x38] sm:$0xff] %v423_v23 }
 0x10b   :  { %v412_v28 = vadd.f32 %v411_v19, %v347_v26  ;;  %v350_v29 = vadd.f32 %v505_v27, %v103_v56 }
 0x10d   :  { %430 = vst [vmem:[%s749_s3 + $0x20] sm:$0xff] %v412_v28  ;;  %v415_v30 = vadd.f32 %v414_v25, %v350_v29 }
 0x10f   :  { %431 = vst [vmem:[%s749_s3 + $0x28] sm:$0xff] %v415_v30 }

// kernel: network_forward.45
= control target key start
LH: loop header
LB: loop body
LE: loop exit
PB: predicated region body
PF: predicated region fallthrough
CT: control target
= control target key end

     0   :  { %s256_s1 = inlined_call_operand.vmem [shape: bf16[128,128], index: 1, kind: input, shape index: {}]   ;;  %s257_s0 = inlined_call_operand.vmem [shape: bf16[32,128], index: 0, kind: input, shape index: {}]   ;;  %s258_s2 = inlined_call_operand.vmem [shape: f32[32,128], index: 2, kind: output, shape index: {}]  }
   0x1   :  { %v189_v0 = vld [vmem:[%s256_s1] sm:$0xff]   ;;  %v190_v1 = vld [vmem:[%s256_s1 + $0x8] sm:$0xff]   ;;  %v191_v2 = vld [vmem:[%s256_s1 + $0x10] sm:$0xff]  }
   0x2   :  { %169 = vmatprep.subr.bf16.mxu0 %v189_v0  ;;  %v192_v3 = vld [vmem:[%s256_s1 + $0x18] sm:$0xff]   ;;  %v197_v4 = vld [vmem:[%s257_s0] sm:$0xff]   ;;  %v194_v6 = vld [vmem:[%s256_s1 + $0x28] sm:$0xff]  }
   0x3   :  { %170 = vmatpush3.bf16.msra.mxu0 %v189_v0  ;;  %185 = vmatprep.mubr.bf16.mxu0 %v197_v4  ;;  %v193_v5 = vld [vmem:[%s256_s1 + $0x20] sm:$0xff]   ;;  %v195_v7 = vld [vmem:[%s256_s1 + $0x30] sm:$0xff]   ;;  %v196_v8 = vld [vmem:[%s256_s1 + $0x38] sm:$0xff]  }
   0x4   :  { %171 = vmatprep.subr.bf16.mxu0 %v190_v1  ;;  %v198_v9 = vld [vmem:[%s257_s0 + $0x8] sm:$0xff]  }
   0x7   :  { %172 = vmatpush3.bf16.msra.mxu0 %v190_v1 }
   0x8   :  { %173 = vmatprep.subr.bf16.mxu0 %v191_v2 }
   0xb   :  { %174 = vmatpush3.bf16.msra.mxu0 %v191_v2 }
   0xc   :  { %175 = vmatprep.subr.bf16.mxu0 %v192_v3 }
   0xf   :  { %176 = vmatpush3.bf16.msra.mxu0 %v192_v3 }
  0x10   :  { %177 = vmatprep.subr.bf16.mxu0 %v193_v5 }
  0x13   :  { %178 = vmatpush3.bf16.msra.mxu0 %v193_v5 }
  0x14   :  { %179 = vmatprep.subr.bf16.mxu0 %v194_v6 }
  0x17   :  { %180 = vmatpush3.bf16.msra.mxu0 %v194_v6 }
  0x18   :  { %181 = vmatprep.subr.bf16.mxu0 %v195_v7 }
  0x1b   :  { %182 = vmatpush3.bf16.msra.mxu0 %v195_v7 }
  0x1c   :  { %183 = vmatprep.subr.bf16.mxu0 %v196_v8 }
  0x1f   :  { %184 = vmatpush3.bf16.msra.mxu0 %v196_v8 }
  0x22   :  { %186 = vmatmul.mubr.bf16.vlgmr.msra.gmra.mrb[0].mxu0 %v198_v9 }
  0xf5   :  { %v187_v10 = vpop.f32.mrb[0].mxu0 }
  0xf6   :  { %143 = vst [vmem:[%s258_s2 + $0x10] sm:$0xff] %v187_v10  ;;  %v126_v11 = vpop.f32.mrb[1].mxu0 }
  0xf7   :  { %141 = vst [vmem:[%s258_s2] sm:$0xff] %v126_v11  ;;  %v188_v12 = vpop.f32.mrb[2].mxu0 }
  0xf8   :  { %144 = vst [vmem:[%s258_s2 + $0x18] sm:$0xff] %v188_v12  ;;  %v129_v13 = vpop.f32.mrb[3].mxu0 }
  0xf9   :  { %142 = vst [vmem:[%s258_s2 + $0x8] sm:$0xff] %v129_v13 }

// kernel: network_forward.46
= control target key start
LH: loop header
LB: loop body
LE: loop exit
PB: predicated region body
PF: predicated region fallthrough
CT: control target
= control target key end

     0   :  { %v180_v0 = vmov 0.0   ;;  %vm181_vm0 = vmmov 0   ;;  %s230_s1 = inlined_call_operand.vmem [shape: bf16[128,128], index: 1, kind: input, shape index: {}]   ;;  %s231_s0 = inlined_call_operand.vmem [shape: bf16[16,128], index: 0, kind: input, shape index: {}]   ;;  %s232_s2 = inlined_call_operand.vmem [shape: f32[16,128], index: 2, kind: output, shape index: {}]  }
   0x1   :  { %149 = vmatprep.subr.bf16.mxu0 %v180_v0  ;;  %v171_v1 = vld [vmem:[%s230_s1] sm:$0xff]   ;;  %165 = vmatprep.mubr.msk.bf16.mxu0 %vm181_vm0, %v180_v0  ;;  %v172_v2 = vld [vmem:[%s230_s1 + $0x8] sm:$0xff]   ;;  %v173_v3 = vld [vmem:[%s230_s1 + $0x10] sm:$0xff]  }
   0x2   :  { %150 = vmatpush3.bf16.msra.mxu0 %v171_v1  ;;  %v174_v4 = vld [vmem:[%s230_s1 + $0x18] sm:$0xff]   ;;  %v175_v5 = vld [vmem:[%s230_s1 + $0x20] sm:$0xff]   ;;  %v176_v6 = vld [vmem:[%s230_s1 + $0x28] sm:$0xff]  }
   0x3   :  { %151 = vmatprep.subr.bf16.mxu0 %v180_v0  ;;  %v177_v7 = vld [vmem:[%s230_s1 + $0x30] sm:$0xff]   ;;  %v178_v8 = vld [vmem:[%s230_s1 + $0x38] sm:$0xff]   ;;  %v179_v9 = vld [vmem:[%s231_s0] sm:$0xff]  }
   0x6   :  { %152 = vmatpush3.bf16.msra.mxu0 %v172_v2 }
   0x7   :  { %153 = vmatprep.subr.bf16.mxu0 %v180_v0 }
   0xa   :  { %154 = vmatpush3.bf16.msra.mxu0 %v173_v3 }
   0xb   :  { %155 = vmatprep.subr.bf16.mxu0 %v180_v0 }
   0xe   :  { %156 = vmatpush3.bf16.msra.mxu0 %v174_v4 }
   0xf   :  { %157 = vmatprep.subr.bf16.mxu0 %v180_v0 }
  0x12   :  { %158 = vmatpush3.bf16.msra.mxu0 %v175_v5 }
  0x13   :  { %159 = vmatprep.subr.bf16.mxu0 %v180_v0 }
  0x16   :  { %160 = vmatpush3.bf16.msra.mxu0 %v176_v6 }
  0x17   :  { %161 = vmatprep.subr.bf16.mxu0 %v180_v0 }
  0x1a   :  { %162 = vmatpush3.bf16.msra.mxu0 %v177_v7 }
  0x1b   :  { %163 = vmatprep.subr.bf16.mxu0 %v180_v0 }
  0x1e   :  { %164 = vmatpush3.bf16.msra.mxu0 %v178_v8 }
  0x21   :  { %166 = vmatmul.mubr.bf16.vlgmr.msra.gmra.mrb[0].mxu0 %v179_v9 }
  0xf4   :  { %v118_v10 = vpop.f32.mrb[0].mxu0 }
  0xf5   :  { %125 = vst [vmem:[%s232_s2] sm:$0xff] %v118_v10  ;;  %v167_v11 = vpop.f32.mrb[1].mxu0 }
  0xf6   :  { %v121_v12 = vpop.f32.mrb[2].mxu0 }
  0xf7   :  { %126 = vst [vmem:[%s232_s2 + $0x8] sm:$0xff] %v121_v12  ;;  %v168_v13 = vpop.f32.mrb[3].mxu0 }

// kernel: network_forward.47
= control target key start
LH: loop header
LB: loop body
LE: loop exit
PB: predicated region body
PF: predicated region fallthrough
CT: control target
= control target key end

     0   :  { %vm96_vm0 = vcmask 916480   ;;  %s335_s1 = inlined_call_operand.vmem [shape: bf16[112,128], index: 1, kind: input, shape index: {}]   ;;  %s336_s0 = inlined_call_operand.vmem [shape: bf16[64,112], index: 0, kind: input, shape index: {}]   ;;  %s337_s2 = inlined_call_operand.vmem [shape: f32[64,128], index: 2, kind: output, shape index: {}]  }
   0x1   :  { %v248_v0 = vld [vmem:[%s335_s1] sm:$0xff]   ;;  %v249_v1 = vld [vmem:[%s335_s1 + $0x8] sm:$0xff]   ;;  %v250_v2 = vld [vmem:[%s335_s1 + $0x10] sm:$0xff]  }
   0x2   :  { %212 = vmatprep.subr.bf16.mxu0 %v248_v0  ;;  %234 = vmatprep.subr.bf16.mxu1 %v248_v0  ;;  %v251_v3 = vld [vmem:[%s335_s1 + $0x18] sm:$0xff]   ;;  %v255_v4 = vld [vmem:[%s336_s0] sm:$0xff]   ;;  %v256_v5 = vld [vmem:[%s336_s0 + $0x10] sm:$0xff]  }
   0x3   :  { %213 = vmatpush3.bf16.msra.mxu0 %v248_v0  ;;  %241 = vmatpush3.bf16.msra.mxu1 %v248_v0  ;;  %v252_v6 = vld [vmem:[%s335_s1 + $0x20] sm:$0xff]   ;;  %v253_v7 = vld [vmem:[%s335_s1 + $0x28] sm:$0xff]   ;;  %v254_v8 = vld [vmem:[%s335_s1 + $0x30] sm:$0xff]  }
   0x4   :  { %214 = vmatprep.subr.bf16.mxu0 %v249_v1  ;;  %235 = vmatprep.subr.bf16.mxu1 %v249_v1  ;;  %v257_v9 = vld [vmem:[%s336_s0 + $0x8] sm:$0xff]   ;;  %v258_v10 = vld [vmem:[%s336_s0 + $0x18] sm:$0xff]  }
   0x5   :  { %226 = vmatprep.mubr.msk.bf16.mxu0 %vm96_vm0, %v255_v4  ;;  %230 = vmatprep.mubr.msk.bf16.mxu1 %vm96_vm0, %v256_v5 }
   0x7   :  { %215 = vmatpush3.bf16.msra.mxu0 %v249_v1  ;;  %242 = vmatpush3.bf16.msra.mxu1 %v249_v1 }
   0x8   :  { %216 = vmatprep.subr.bf16.mxu0 %v250_v2  ;;  %236 = vmatprep.subr.bf16.mxu1 %v250_v2 }
   0xb   :  { %217 = vmatpush3.bf16.msra.mxu0 %v250_v2  ;;  %243 = vmatpush3.bf16.msra.mxu1 %v250_v2 }
   0xc   :  { %218 = vmatprep.subr.bf16.mxu0 %v251_v3  ;;  %237 = vmatprep.subr.bf16.mxu1 %v251_v3 }
   0xf   :  { %219 = vmatpush3.bf16.msra.mxu0 %v251_v3  ;;  %244 = vmatpush3.bf16.msra.mxu1 %v251_v3 }
  0x10   :  { %220 = vmatprep.subr.bf16.mxu0 %v252_v6  ;;  %238 = vmatprep.subr.bf16.mxu1 %v252_v6 }
  0x13   :  { %221 = vmatpush3.bf16.msra.mxu0 %v252_v6  ;;  %245 = vmatpush3.bf16.msra.mxu1 %v252_v6 }
  0x14   :  { %222 = vmatprep.subr.bf16.mxu0 %v253_v7  ;;  %239 = vmatprep.subr.bf16.mxu1 %v253_v7 }
  0x17   :  { %223 = vmatpush3.bf16.msra.mxu0 %v253_v7  ;;  %246 = vmatpush3.bf16.msra.mxu1 %v253_v7 }
  0x18   :  { %224 = vmatprep.subr.bf16.mxu0 %v254_v8  ;;  %240 = vmatprep.subr.bf16.mxu1 %v254_v8 }
  0x1b   :  { %225 = vmatpush3.bf16.msra.mxu0 %v254_v8  ;;  %247 = vmatpush3.bf16.msra.mxu1 %v254_v8 }
  0x1e   :  { %227 = vmatmul.mubr.msk.bf16.vlgmr.msra.gmra.mrb[0].mxu0 %vm96_vm0, %v257_v9  ;;  %231 = vmatmul.mubr.msk.bf16.vlgmr.msra.gmra.mrb[0].mxu1 %vm96_vm0, %v258_v10 }
  0xf1   :  { %v228_v11 = vpop.f32.mrb[0].mxu0  ;;  %v232_v12 = vpop.f32.mrb[0].mxu1 }
  0xf2   :  { %176 = vst [vmem:[%s337_s2 + $0x10] sm:$0xff] %v228_v11  ;;  %180 = vst [vmem:[%s337_s2 + $0x30] sm:$0xff] %v232_v12  ;;  %v143_v13 = vpop.f32.mrb[1].mxu0  ;;  %v159_v14 = vpop.f32.mrb[1].mxu1 }
  0xf3   :  { %174 = vst [vmem:[%s337_s2] sm:$0xff] %v143_v13  ;;  %178 = vst [vmem:[%s337_s2 + $0x20] sm:$0xff] %v159_v14  ;;  %v229_v15 = vpop.f32.mrb[2].mxu0  ;;  %v233_v16 = vpop.f32.mrb[2].mxu1 }
  0xf4   :  { %177 = vst [vmem:[%s337_s2 + $0x18] sm:$0xff] %v229_v15  ;;  %181 = vst [vmem:[%s337_s2 + $0x38] sm:$0xff] %v233_v16  ;;  %v146_v17 = vpop.f32.mrb[3].mxu0  ;;  %v162_v18 = vpop.f32.mrb[3].mxu1 }
  0xf5   :  { %175 = vst [vmem:[%s337_s2 + $0x8] sm:$0xff] %v146_v17  ;;  %179 = vst [vmem:[%s337_s2 + $0x28] sm:$0xff] %v162_v18 }

// kernel: network_forward.48
= control target key start
LH: loop header
LB: loop body
LE: loop exit
PB: predicated region body
PF: predicated region fallthrough
CT: control target
= control target key end

     0   :  { %v934_v1 = vmov 0   ;;  %vm475_vm0 = vcmask 523264   ;;  %s1178_s1 = inlined_call_operand.vmem [shape: bf16[576,128], index: 1, kind: input, shape index: {}]   ;;  %s1179_s0 = inlined_call_operand.vmem [shape: bf16[64,576], index: 0, kind: input, shape index: {}]   ;;  %s1180_s2 = inlined_call_operand.vmem [shape: f32[64,1], index: 2, kind: input, shape index: {}]   ;;  %s1181_s3 = inlined_call_operand.vmem [shape: f32[64,128], index: 3, kind: output, shape index: {}]  }
   0x1   :  { %v870_v0 = vld [vmem:[%s1178_s1 + $0x40] sm:$0xff]   ;;  %868 = vset.pattern.permute.xlu0 %v934_v1  ;;  %869 = vset.pattern.permute.xlu1 %v934_v1  ;;  %v874_v5 = vld [vmem:[%s1178_s1 + $0x48] sm:$0xff]   ;;  %v878_v9 = vld [vmem:[%s1178_s1 + $0x50] sm:$0xff]  }
   0x2   :  { %v871_v2 = vld [vmem:[%s1178_s1 + $0xc0] sm:$0xff]   ;;  %755 = vmatprep.subr.bf16.mxu0 %v870_v0  ;;  %v875_v6 = vld [vmem:[%s1178_s1 + $0xc8] sm:$0xff]   ;;  %v879_v10 = vld [vmem:[%s1178_s1 + $0xd0] sm:$0xff]  }
   0x3   :  { %v872_v3 = vld [vmem:[%s1178_s1] sm:$0xff]   ;;  %795 = vmatprep.subr.bf16.mxu1 %v871_v2  ;;  %v876_v7 = vld [vmem:[%s1178_s1 + $0x8] sm:$0xff]   ;;  %v880_v11 = vld [vmem:[%s1178_s1 + $0x10] sm:$0xff]  }
   0x4   :  { %v873_v4 = vld [vmem:[%s1178_s1 + $0x80] sm:$0xff]   ;;  %756 = vmatpush3.bf16.msra.mxu0 %v872_v3  ;;  %v877_v8 = vld [vmem:[%s1178_s1 + $0x88] sm:$0xff]   ;;  %v881_v12 = vld [vmem:[%s1178_s1 + $0x90] sm:$0xff]  }
   0x5   :  { %796 = vmatpush3.bf16.msra.mxu1 %v873_v4  ;;  %757 = vmatprep.subr.bf16.mxu0 %v874_v5  ;;  %v882_v13 = vld [vmem:[%s1178_s1 + $0x58] sm:$0xff]   ;;  %v886_v17 = vld [vmem:[%s1178_s1 + $0x60] sm:$0xff]   ;;  %v890_v21 = vld [vmem:[%s1178_s1 + $0x68] sm:$0xff]  }
   0x6   :  { %797 = vmatprep.subr.bf16.mxu1 %v875_v6  ;;  %v883_v14 = vld [vmem:[%s1178_s1 + $0xd8] sm:$0xff]   ;;  %v887_v18 = vld [vmem:[%s1178_s1 + $0xe0] sm:$0xff]   ;;  %v891_v22 = vld [vmem:[%s1178_s1 + $0xe8] sm:$0xff]  }
   0x7   :  { %v884_v15 = vld [vmem:[%s1178_s1 + $0x18] sm:$0xff]   ;;  %v888_v19 = vld [vmem:[%s1178_s1 + $0x20] sm:$0xff]   ;;  %v892_v23 = vld [vmem:[%s1178_s1 + $0x28] sm:$0xff]  }
   0x8   :  { %758 = vmatpush3.bf16.msra.mxu0 %v876_v7  ;;  %v885_v16 = vld [vmem:[%s1178_s1 + $0x98] sm:$0xff]   ;;  %v889_v20 = vld [vmem:[%s1178_s1 + $0xa0] sm:$0xff]   ;;  %v893_v24 = vld [vmem:[%s1178_s1 + $0xa8] sm:$0xff]  }
   0x9   :  { %798 = vmatpush3.bf16.msra.mxu1 %v877_v8  ;;  %759 = vmatprep.subr.bf16.mxu0 %v878_v9  ;;  %v894_v25 = vld [vmem:[%s1178_s1 + $0x70] sm:$0xff]   ;;  %v898_v29 = vld [vmem:[%s1178_s1 + $0x78] sm:$0xff]   ;;  %v907_v36 = vld [vmem:[%s1179_s0 + $0xc] ss:$20 sps:$4 sm:$0xff]  }
   0xa   :  { %799 = vmatprep.subr.bf16.mxu1 %v879_v10  ;;  %v895_v26 = vld [vmem:[%s1178_s1 + $0xf0] sm:$0xff]   ;;  %v899_v30 = vld [vmem:[%s1178_s1 + $0xf8] sm:$0xff]   ;;  %v908_v37 = vld [vmem:[%s1178_s1 + $0x100] sm:$0xff]   ;;  %585 = vmatprep.mubr.bf16.mxu1 %v907_v36 }
   0xb   :  { %v896_v27 = vld [vmem:[%s1178_s1 + $0x30] sm:$0xff]   ;;  %v900_v31 = vld [vmem:[%s1178_s1 + $0x38] sm:$0xff]   ;;  %v909_v38 = vld [vmem:[%s1179_s0 + $0x2c] ss:$20 sps:$4 sm:$0xff]  }
   0xc   :  { %760 = vmatpush3.bf16.msra.mxu0 %v880_v11  ;;  %v897_v28 = vld [vmem:[%s1178_s1 + $0xb0] sm:$0xff]   ;;  %v901_v32 = vld [vmem:[%s1178_s1 + $0xb8] sm:$0xff]   ;;  %v915_v40 = vld [vmem:[%s1178_s1 + $0x108] sm:$0xff]  }
   0xd   :  { %800 = vmatpush3.bf16.msra.mxu1 %v881_v12  ;;  %761 = vmatprep.subr.bf16.mxu0 %v882_v13  ;;  %v902_v33 = vld [vmem:[%s1179_s0] ss:$20 sps:$4 sm:$0xff]   ;;  %v904_v34 = vld [vmem:[%s1179_s0 + $0x4] ss:$20 sps:$4 sm:$0xff]   ;;  %v905_v35 = vld [vmem:[%s1179_s0 + $0x8] ss:$20 sps:$4 sm:$0xff]  }
   0xe   :  { %801 = vmatprep.subr.bf16.mxu1 %v883_v14  ;;  %520 = vmatprep.mubr.bf16.mxu0 %v904_v34  ;;  %v911_v39 = vld [vmem:[%s1179_s0 + $0x34] ss:$20 sps:$4 sm:$0xff]   ;;  %v914_v42 = vld [vmem:[%s1179_s0 + $0x30] ss:$20 sps:$4 sm:$0xff]   ;;  %v929_v46 = vld [vmem:[%s1178_s1 + $0x118] sm:$0xff]  }
   0xf   :  { %v913_v41 = vld [vmem:[%s1179_s0 + $0x28] ss:$20 sps:$4 sm:$0xff]   ;;  %v922_v45 = vld [vmem:[%s1178_s1 + $0x110] sm:$0xff]   ;;  %v921_v48 = vld [vmem:[%s1179_s0 + $0x58] ss:$20 sps:$4 sm:$0xff]  }
  0x10   :  { %762 = vmatpush3.bf16.msra.mxu0 %v884_v15  ;;  %v916_v43 = vld [vmem:[%s1179_s0 + $0x54] ss:$20 sps:$4 sm:$0xff]   ;;  %v918_v44 = vld [vmem:[%s1179_s0 + $0x5c] ss:$20 sps:$4 sm:$0xff]   ;;  %v925_v50 = vld [vmem:[%s1179_s0 + $0x84] ss:$20 sps:$4 sm:$0xff]  }
  0x11   :  { %802 = vmatpush3.bf16.msra.mxu1 %v885_v16  ;;  %763 = vmatprep.subr.bf16.mxu0 %v886_v17  ;;  %v920_v47 = vld [vmem:[%s1179_s0 + $0x50] ss:$20 sps:$4 sm:$0xff]   ;;  %v112_v53 = vld [vmem:[%s1180_s2 + $0x8] sm:$0xff]  ;;  %v114_v54 = vld [vmem:[%s1180_s2 + $0x18] sm:$0xff] }
  0x12   :  { %803 = vmatprep.subr.bf16.mxu1 %v887_v18  ;;  %v923_v49 = vld [vmem:[%s1179_s0 + $0x7c] ss:$20 sps:$4 sm:$0xff]   ;;  %v111_v51 = vld [vmem:[%s1180_s2] sm:$0xff]  ;;  %v927_v55 = vld [vmem:[%s1179_s0 + $0x78] ss:$20 sps:$4 sm:$0xff]  }
  0x13   :  { %v113_v52 = vld [vmem:[%s1180_s2 + $0x10] sm:$0xff]  ;;  %121 = vperm.xlu0 %868, %v111_v51   ;;  %v115_v58 = vld [vmem:[%s1180_s2 + $0x20] sm:$0xff]  ;;  %v116_v60 = vld [vmem:[%s1180_s2 + $0x28] sm:$0xff] }
  0x14   :  { %764 = vmatpush3.bf16.msra.mxu0 %v888_v19  ;;  %131 = vperm.xlu1 %869, %v113_v52   ;;  %v928_v56 = vld [vmem:[%s1179_s0 + $0x80] ss:$20 sps:$4 sm:$0xff]   ;;  %v930_v57 = vld [vmem:[%s1179_s0 + $0x10] ss:$20 sps:$4 sm:$0xff]   ;;  %v118_v62 = vld [vmem:[%s1180_s2 + $0x38] sm:$0xff] }
  0x15   :  { %804 = vmatpush3.bf16.msra.mxu1 %v889_v20  ;;  %765 = vmatprep.subr.bf16.mxu0 %v890_v21  ;;  %v931_v59 = vld [vmem:[%s1179_s0 + $0x60] ss:$20 sps:$4 sm:$0xff]   ;;  %v932_v63 = vld [vmem:[%s1179_s0 + $0x38] ss:$20 sps:$4 sm:$0xff]   ;;  %v933_v0 = vld [vmem:[%s1179_s0 + $0x88] ss:$20 sps:$4 sm:$0xff]  }
  0x16   :  { %805 = vmatprep.subr.bf16.mxu1 %v891_v22  ;;  %v117_v61 = vld [vmem:[%s1180_s2 + $0x30] sm:$0xff] }
  0x17   :  { %126 = vperm.xlu0 %868, %v112_v53  }
  0x18   :  { %766 = vmatpush3.bf16.msra.mxu0 %v892_v23  ;;  %136 = vperm.xlu1 %869, %v114_v54  }
  0x19   :  { %806 = vmatpush3.bf16.msra.mxu1 %v893_v24  ;;  %767 = vmatprep.subr.bf16.mxu0 %v894_v25 }
  0x1a   :  { %807 = vmatprep.subr.bf16.mxu1 %v895_v26 }
  0x1b   :  { %141 = vperm.xlu0 %868, %v115_v58  }
  0x1c   :  { %768 = vmatpush3.bf16.msra.mxu0 %v896_v27  ;;  %146 = vperm.xlu1 %869, %v116_v60  }
  0x1d   :  { %808 = vmatpush3.bf16.msra.mxu1 %v897_v28  ;;  %769 = vmatprep.subr.bf16.mxu0 %v898_v29 }
  0x1e   :  { %809 = vmatprep.subr.bf16.mxu1 %v899_v30 }
  0x1f   :  { %151 = vperm.xlu0 %868, %v117_v61  }
  0x20   :  { %770 = vmatpush3.bf16.msra.mxu0 %v900_v31  ;;  %156 = vperm.xlu1 %869, %v118_v62  }
  0x21   :  { %810 = vmatpush3.bf16.msra.mxu1 %v901_v32  ;;  %843 = vmatprep.subr.bf16.mxu0 %v908_v37 }
  0x22   :  { %859 = vmatprep.subr.bf16.mxu1 %v908_v37 }
  0x23   :  { %521 = vmatmul.mubr.bf16.vlgmr.msra.gmra.mrb[0].mxu0 %v902_v33 }
  0x24   :  { %586 = vmatmul.mubr.bf16.vlgmr.msra.gmra.mrb[0].mxu1 %v905_v35  ;;  %844 = vmatpush3.bf16.msra.mxu0 %v908_v37 }
  0x25   :  { %863 = vmatpush3.bf16.msra.mxu1 %v908_v37  ;;  %528 = vmatprep.mubr.bf16.mxu0 %v909_v38 }
  0x26   :  { %593 = vmatprep.mubr.bf16.mxu1 %v911_v39  ;;  %845 = vmatprep.subr.bf16.mxu0 %v915_v40 }
  0x27   :  { %860 = vmatprep.subr.bf16.mxu1 %v915_v40 }
  0x28   :  { %846 = vmatpush3.bf16.msra.mxu0 %v915_v40 }
  0x29   :  { %864 = vmatpush3.bf16.msra.mxu1 %v915_v40  ;;  %847 = vmatprep.subr.bf16.mxu0 %v922_v45 }
  0x2a   :  { %861 = vmatprep.subr.bf16.mxu1 %v922_v45 }
  0x2b   :  { %529 = vmatmul.mubr.bf16.gmra.mrb[4].mxu0 %v913_v41 }
  0x2c   :  { %594 = vmatmul.mubr.bf16.gmra.mrb[4].mxu1 %v914_v42  ;;  %536 = vmatprep.mubr.bf16.mxu0 %v916_v43 }
  0x2d   :  { %601 = vmatprep.mubr.bf16.mxu1 %v918_v44  ;;  %848 = vmatpush3.bf16.msra.mxu0 %v922_v45 }
  0x2e   :  { %865 = vmatpush3.bf16.msra.mxu1 %v922_v45  ;;  %849 = vmatprep.subr.bf16.mxu0 %v929_v46 }
  0x2f   :  { %862 = vmatprep.subr.bf16.mxu1 %v929_v46 }
  0x31   :  { %850 = vmatpush3.bf16.msra.mxu0 %v929_v46 }
  0x32   :  { %866 = vmatpush3.bf16.msra.mxu1 %v929_v46 }
  0x33   :  { %537 = vmatmul.mubr.bf16.gmra.mrb[8].mxu0 %v920_v47 }
  0x34   :  { %602 = vmatmul.mubr.bf16.gmra.mrb[8].mxu1 %v921_v48  ;;  %544 = vmatprep.mubr.bf16.mxu0 %v923_v49 }
  0x35   :  { %609 = vmatprep.mubr.bf16.mxu1 %v925_v50 }
  0x3b   :  { %545 = vmatmul.mubr.bf16.gmra.mrb[12].mxu0 %v927_v55 }
  0x3c   :  { %610 = vmatmul.mubr.bf16.gmra.mrb[12].mxu1 %v928_v56  ;;  %851 = vmatprep.mubr.msk.bf16.mxu0 %vm475_vm0, %v930_v57 }
  0x3d   :  { %855 = vmatprep.mubr.msk.bf16.mxu1 %vm475_vm0, %v931_v59 }
  0x43   :  { %852 = vmatmul.mubr.msk.bf16.vlgmr.msra.gmra.mrb[16].mxu0 %vm475_vm0, %v932_v63 }
  0x44   :  { %856 = vmatmul.mubr.msk.bf16.vlgmr.msra.gmra.mrb[16].mxu1 %vm475_vm0, %v933_v0 }
  0x92   :  { %v122_v1 = vpop.permute.xlu0 %121 }
  0x93   :  { %v132_v18 = vpop.permute.xlu1 %131 }
  0x96   :  { %v127_v3 = vpop.permute.xlu0 %126 }
  0x97   :  { %v137_v33 = vpop.permute.xlu1 %136 }
  0x9a   :  { %v142_v36 = vpop.permute.xlu0 %141 }
  0x9b   :  { %v147_v50 = vpop.permute.xlu1 %146 }
  0x9e   :  { %v152_v54 = vpop.permute.xlu0 %151 }
  0xf6   :  { %v771_v2 = vpop.f32.mrb[0].mxu0 }
  0xf7   :  { %v811_v4 = vpop.f32.mrb[0].mxu1  ;;  %v772_v5 = vpop.f32.mrb[1].mxu0 }
  0xf8   :  { %v773_v6 = vadd.f32 %v772_v5, %v771_v2  ;;  %v812_v7 = vpop.f32.mrb[1].mxu1  ;;  %v774_v8 = vpop.f32.mrb[2].mxu0 }
  0xf9   :  { %v813_v9 = vadd.f32 %v812_v7, %v811_v4  ;;  %v814_v10 = vpop.f32.mrb[2].mxu1  ;;  %v775_v11 = vpop.f32.mrb[3].mxu0 }
  0xfa   :  { %v523_v12 = vadd.f32 %v773_v6, %v122_v1  ;;  %v776_v13 = vadd.f32 %v775_v11, %v774_v8  ;;  %v815_v14 = vpop.f32.mrb[3].mxu1  ;;  %v157_v4 = vpop.permute.xlu1 %156 }
  0xfb   :  { %v816_v15 = vadd.f32 %v815_v14, %v814_v10 }
  0xfc   :  { %v526_v16 = vadd.f32 %v776_v13, %v127_v3  ;;  %v588_v17 = vadd.f32 %v813_v9, %v523_v12 }
  0xfe   :  { %v777_v19 = vpop.f32.mrb[4].mxu0  ;;  %v1151_v20 = vadd.f32 %v816_v15, %v526_v16 }
  0xff   :  { %v817_v21 = vpop.f32.mrb[4].mxu1  ;;  %v778_v22 = vpop.f32.mrb[5].mxu0 }
 0x100   :  { %v779_v23 = vadd.f32 %v778_v22, %v777_v19  ;;  %v818_v24 = vpop.f32.mrb[5].mxu1  ;;  %v780_v25 = vpop.f32.mrb[6].mxu0 }
 0x101   :  { %v819_v26 = vadd.f32 %v818_v24, %v817_v21  ;;  %v820_v27 = vpop.f32.mrb[6].mxu1  ;;  %v781_v28 = vpop.f32.mrb[7].mxu0 }
 0x102   :  { %v531_v29 = vadd.f32 %v779_v23, %v132_v18  ;;  %v782_v30 = vadd.f32 %v781_v28, %v780_v25  ;;  %v821_v31 = vpop.f32.mrb[7].mxu1 }
 0x103   :  { %v822_v32 = vadd.f32 %v821_v31, %v820_v27 }
 0x104   :  { %v534_v34 = vadd.f32 %v782_v30, %v137_v33  ;;  %v596_v35 = vadd.f32 %v819_v26, %v531_v29 }
 0x106   :  { %v783_v37 = vpop.f32.mrb[8].mxu0  ;;  %v599_v38 = vadd.f32 %v822_v32, %v534_v34 }
 0x107   :  { %v823_v39 = vpop.f32.mrb[8].mxu1  ;;  %v784_v40 = vpop.f32.mrb[9].mxu0 }
 0x108   :  { %v785_v41 = vadd.f32 %v784_v40, %v783_v37  ;;  %v824_v42 = vpop.f32.mrb[9].mxu1  ;;  %v786_v43 = vpop.f32.mrb[10].mxu0 }
 0x109   :  { %v825_v44 = vadd.f32 %v824_v42, %v823_v39  ;;  %v826_v45 = vpop.f32.mrb[10].mxu1  ;;  %v787_v46 = vpop.f32.mrb[11].mxu0 }
 0x10a   :  { %v539_v47 = vadd.f32 %v785_v41, %v142_v36  ;;  %v788_v48 = vadd.f32 %v787_v46, %v786_v43  ;;  %v827_v49 = vpop.f32.mrb[11].mxu1 }
 0x10b   :  { %v828_v51 = vadd.f32 %v827_v49, %v826_v45 }
 0x10c   :  { %v542_v52 = vadd.f32 %v788_v48, %v147_v50  ;;  %v604_v53 = vadd.f32 %v825_v44, %v539_v47 }
 0x10e   :  { %v789_v55 = vpop.f32.mrb[12].mxu0  ;;  %v607_v56 = vadd.f32 %v828_v51, %v542_v52 }
 0x10f   :  { %v829_v57 = vpop.f32.mrb[12].mxu1  ;;  %v790_v58 = vpop.f32.mrb[13].mxu0 }
 0x110   :  { %v791_v59 = vadd.f32 %v790_v58, %v789_v55  ;;  %v830_v60 = vpop.f32.mrb[13].mxu1  ;;  %v792_v61 = vpop.f32.mrb[14].mxu0 }
 0x111   :  { %v831_v62 = vadd.f32 %v830_v60, %v829_v57  ;;  %v832_v63 = vpop.f32.mrb[14].mxu1  ;;  %v793_v0 = vpop.f32.mrb[15].mxu0 }
 0x112   :  { %v547_v1 = vadd.f32 %v791_v59, %v152_v54  ;;  %v794_v2 = vadd.f32 %v793_v0, %v792_v61  ;;  %v833_v3 = vpop.f32.mrb[15].mxu1 }
 0x113   :  { %v834_v5 = vadd.f32 %v833_v3, %v832_v63 }
 0x114   :  { %v550_v6 = vadd.f32 %v794_v2, %v157_v4  ;;  %v612_v7 = vadd.f32 %v831_v62, %v547_v1 }
 0x116   :  { %v853_v8 = vpop.f32.mrb[16].mxu0  ;;  %v615_v9 = vadd.f32 %v834_v5, %v550_v6 }
 0x117   :  { %v661_v10 = vadd.f32 %v853_v8, %v596_v35  ;;  %v857_v11 = vpop.f32.mrb[16].mxu1  ;;  %v652_v12 = vpop.f32.mrb[17].mxu0 }
 0x118   :  { %v677_v13 = vadd.f32 %v857_v11, %v612_v7  ;;  %v653_v14 = vadd.f32 %v652_v12, %v588_v17  ;;  %v668_v15 = vpop.f32.mrb[17].mxu1  ;;  %v854_v16 = vpop.f32.mrb[18].mxu0 }
 0x119   :  { %685 = vst [vmem:[%s1181_s3 + $0x10] sm:$0xff] %v661_v10  ;;  %v669_v18 = vadd.f32 %v668_v15, %v604_v53  ;;  %v664_v19 = vadd.f32 %v854_v16, %v599_v38  ;;  %v858_v21 = vpop.f32.mrb[18].mxu1  ;;  %v655_v22 = vpop.f32.mrb[19].mxu0 }
 0x11a   :  { %689 = vst [vmem:[%s1181_s3 + $0x30] sm:$0xff] %v677_v13  ;;  %683 = vst [vmem:[%s1181_s3] sm:$0xff] %v653_v14  ;;  %v680_v23 = vadd.f32 %v858_v21, %v615_v9  ;;  %v656_v17 = vadd.f32 %v655_v22, %v1151_v20  ;;  %v671_v24 = vpop.f32.mrb[19].mxu1 }
 0x11b   :  { %687 = vst [vmem:[%s1181_s3 + $0x20] sm:$0xff] %v669_v18  ;;  %686 = vst [vmem:[%s1181_s3 + $0x18] sm:$0xff] %v664_v19  ;;  %v672_v25 = vadd.f32 %v671_v24, %v607_v56 }
 0x11c   :  { %690 = vst [vmem:[%s1181_s3 + $0x38] sm:$0xff] %v680_v23  ;;  %684 = vst [vmem:[%s1181_s3 + $0x8] sm:$0xff] %v656_v17 }
 0x11d   :  { %688 = vst [vmem:[%s1181_s3 + $0x28] sm:$0xff] %v672_v25 }

// kernel: network_forward.69
= control target key start
LH: loop header
LB: loop body
LE: loop exit
PB: predicated region body
PF: predicated region fallthrough
CT: control target
= control target key end

     0   :  { %v726_v1 = vmov 0   ;;  %vm389_vm0 = vcmask 523264   ;;  %s911_s1 = inlined_call_operand.vmem [shape: bf16[576,128], index: 1, kind: input, shape index: {}]   ;;  %s912_s0 = inlined_call_operand.vmem [shape: bf16[32,576], index: 0, kind: input, shape index: {}]   ;;  %s913_s2 = inlined_call_operand.vmem [shape: f32[32,1], index: 2, kind: input, shape index: {}]   ;;  %s914_s3 = inlined_call_operand.vmem [shape: f32[32,128], index: 3, kind: output, shape index: {}]  }
   0x1   :  { %v676_v0 = vld [vmem:[%s911_s1 + $0x40] sm:$0xff]   ;;  %674 = vset.pattern.permute.xlu0 %v726_v1  ;;  %675 = vset.pattern.permute.xlu1 %v726_v1  ;;  %v680_v5 = vld [vmem:[%s911_s1 + $0x48] sm:$0xff]   ;;  %v684_v9 = vld [vmem:[%s911_s1 + $0x50] sm:$0xff]  }
   0x2   :  { %v677_v2 = vld [vmem:[%s911_s1] sm:$0xff]   ;;  %599 = vmatprep.subr.bf16.mxu0 %v676_v0  ;;  %v681_v6 = vld [vmem:[%s911_s1 + $0x8] sm:$0xff]   ;;  %v685_v10 = vld [vmem:[%s911_s1 + $0x10] sm:$0xff]  }
   0x3   :  { %v678_v3 = vld [vmem:[%s911_s1 + $0xc0] sm:$0xff]   ;;  %600 = vmatpush3.bf16.msra.mxu0 %v677_v2  ;;  %v682_v7 = vld [vmem:[%s911_s1 + $0xc8] sm:$0xff]   ;;  %v686_v11 = vld [vmem:[%s911_s1 + $0xd0] sm:$0xff]  }
   0x4   :  { %v679_v4 = vld [vmem:[%s911_s1 + $0x80] sm:$0xff]   ;;  %627 = vmatprep.subr.bf16.mxu1 %v678_v3  ;;  %601 = vmatprep.subr.bf16.mxu0 %v680_v5  ;;  %v683_v8 = vld [vmem:[%s911_s1 + $0x88] sm:$0xff]   ;;  %v687_v12 = vld [vmem:[%s911_s1 + $0x90] sm:$0xff]  }
   0x5   :  { %628 = vmatpush3.bf16.msra.mxu1 %v679_v4  ;;  %v688_v13 = vld [vmem:[%s911_s1 + $0x58] sm:$0xff]   ;;  %v692_v17 = vld [vmem:[%s911_s1 + $0x60] sm:$0xff]   ;;  %v696_v21 = vld [vmem:[%s911_s1 + $0x68] sm:$0xff]  }
   0x6   :  { %629 = vmatprep.subr.bf16.mxu1 %v682_v7  ;;  %v689_v14 = vld [vmem:[%s911_s1 + $0x18] sm:$0xff]   ;;  %v693_v18 = vld [vmem:[%s911_s1 + $0x20] sm:$0xff]   ;;  %v697_v22 = vld [vmem:[%s911_s1 + $0x28] sm:$0xff]  }
   0x7   :  { %602 = vmatpush3.bf16.msra.mxu0 %v681_v6  ;;  %v690_v15 = vld [vmem:[%s911_s1 + $0xd8] sm:$0xff]   ;;  %v694_v19 = vld [vmem:[%s911_s1 + $0xe0] sm:$0xff]   ;;  %v698_v23 = vld [vmem:[%s911_s1 + $0xe8] sm:$0xff]  }
   0x8   :  { %603 = vmatprep.subr.bf16.mxu0 %v684_v9  ;;  %v691_v16 = vld [vmem:[%s911_s1 + $0x98] sm:$0xff]   ;;  %v695_v20 = vld [vmem:[%s911_s1 + $0xa0] sm:$0xff]   ;;  %v699_v24 = vld [vmem:[%s911_s1 + $0xa8] sm:$0xff]  }
   0x9   :  { %630 = vmatpush3.bf16.msra.mxu1 %v683_v8  ;;  %v700_v25 = vld [vmem:[%s911_s1 + $0x70] sm:$0xff]   ;;  %v704_v29 = vld [vmem:[%s911_s1 + $0x78] sm:$0xff]   ;;  %v711_v35 = vld [vmem:[%s911_s1 + $0x100] sm:$0xff]  }
   0xa   :  { %631 = vmatprep.subr.bf16.mxu1 %v686_v11  ;;  %v701_v26 = vld [vmem:[%s911_s1 + $0x30] sm:$0xff]   ;;  %v705_v30 = vld [vmem:[%s911_s1 + $0x38] sm:$0xff]   ;;  %v714_v37 = vld [vmem:[%s912_s0 + $0xc] ss:$20 sps:$4 sm:$0xff]  }
   0xb   :  { %604 = vmatpush3.bf16.msra.mxu0 %v685_v10  ;;  %v702_v27 = vld [vmem:[%s911_s1 + $0xf0] sm:$0xff]   ;;  %v706_v31 = vld [vmem:[%s911_s1 + $0xf8] sm:$0xff]   ;;  %v715_v38 = vld [vmem:[%s911_s1 + $0x108] sm:$0xff]   ;;  %477 = vmatprep.mubr.bf16.mxu1 %v714_v37 }
   0xc   :  { %605 = vmatprep.subr.bf16.mxu0 %v688_v13  ;;  %v703_v28 = vld [vmem:[%s911_s1 + $0xb0] sm:$0xff]   ;;  %v709_v33 = vld [vmem:[%s912_s0 + $0x4] ss:$20 sps:$4 sm:$0xff]   ;;  %v712_v36 = vld [vmem:[%s912_s0 + $0x8] ss:$20 sps:$4 sm:$0xff]  }
   0xd   :  { %632 = vmatpush3.bf16.msra.mxu1 %v687_v12  ;;  %v707_v32 = vld [vmem:[%s912_s0] ss:$20 sps:$4 sm:$0xff]   ;;  %v710_v34 = vld [vmem:[%s911_s1 + $0xb8] sm:$0xff]   ;;  %428 = vmatprep.mubr.bf16.mxu0 %v709_v33  ;;  %v722_v43 = vld [vmem:[%s912_s0 + $0x30] ss:$20 sps:$4 sm:$0xff]  }
   0xe   :  { %633 = vmatprep.subr.bf16.mxu1 %v690_v15  ;;  %v716_v39 = vld [vmem:[%s912_s0 + $0x2c] ss:$20 sps:$4 sm:$0xff]   ;;  %v718_v40 = vld [vmem:[%s912_s0 + $0x28] ss:$20 sps:$4 sm:$0xff]   ;;  %v719_v41 = vld [vmem:[%s911_s1 + $0x110] sm:$0xff]  }
   0xf   :  { %606 = vmatpush3.bf16.msra.mxu0 %v689_v14  ;;  %v720_v42 = vld [vmem:[%s912_s0 + $0x34] ss:$20 sps:$4 sm:$0xff]   ;;  %v723_v44 = vld [vmem:[%s911_s1 + $0x118] sm:$0xff]   ;;  %v724_v45 = vld [vmem:[%s912_s0 + $0x10] ss:$20 sps:$4 sm:$0xff]  }
  0x10   :  { %607 = vmatprep.subr.bf16.mxu0 %v692_v17  ;;  %v99_v46 = vld [vmem:[%s913_s2] sm:$0xff]  ;;  %v101_v47 = vld [vmem:[%s913_s2 + $0x10] sm:$0xff]  ;;  %v100_v48 = vld [vmem:[%s913_s2 + $0x8] sm:$0xff] }
  0x11   :  { %634 = vmatpush3.bf16.msra.mxu1 %v691_v16  ;;  %105 = vperm.xlu0 %674, %v99_v46   ;;  %v102_v49 = vld [vmem:[%s913_s2 + $0x18] sm:$0xff] }
  0x12   :  { %635 = vmatprep.subr.bf16.mxu1 %v694_v19  ;;  %115 = vperm.xlu1 %675, %v101_v47   ;;  %v725_v50 = vld [vmem:[%s912_s0 + $0x38] ss:$20 sps:$4 sm:$0xff]  }
  0x13   :  { %608 = vmatpush3.bf16.msra.mxu0 %v693_v18 }
  0x14   :  { %609 = vmatprep.subr.bf16.mxu0 %v696_v21 }
  0x15   :  { %636 = vmatpush3.bf16.msra.mxu1 %v695_v20  ;;  %110 = vperm.xlu0 %674, %v100_v48  }
  0x16   :  { %637 = vmatprep.subr.bf16.mxu1 %v698_v23  ;;  %120 = vperm.xlu1 %675, %v102_v49  }
  0x17   :  { %610 = vmatpush3.bf16.msra.mxu0 %v697_v22 }
  0x18   :  { %611 = vmatprep.subr.bf16.mxu0 %v700_v25 }
  0x19   :  { %638 = vmatpush3.bf16.msra.mxu1 %v699_v24 }
  0x1a   :  { %639 = vmatprep.subr.bf16.mxu1 %v702_v27 }
  0x1b   :  { %612 = vmatpush3.bf16.msra.mxu0 %v701_v26 }
  0x1c   :  { %613 = vmatprep.subr.bf16.mxu0 %v704_v29 }
  0x1d   :  { %640 = vmatpush3.bf16.msra.mxu1 %v703_v28 }
  0x1e   :  { %641 = vmatprep.subr.bf16.mxu1 %v706_v31 }
  0x1f   :  { %614 = vmatpush3.bf16.msra.mxu0 %v705_v30 }
  0x20   :  { %661 = vmatprep.subr.bf16.mxu0 %v711_v35 }
  0x21   :  { %642 = vmatpush3.bf16.msra.mxu1 %v710_v34 }
  0x22   :  { %429 = vmatmul.mubr.bf16.vlgmr.msra.gmra.mrb[0].mxu0 %v707_v32 }
  0x23   :  { %662 = vmatpush3.bf16.msra.mxu0 %v711_v35  ;;  %436 = vmatprep.mubr.bf16.mxu0 %v716_v39 }
  0x24   :  { %478 = vmatmul.mubr.bf16.vlgmr.msra.gmra.mrb[0].mxu1 %v712_v36  ;;  %663 = vmatprep.subr.bf16.mxu0 %v715_v38 }
  0x25   :  { %485 = vmatprep.mubr.bf16.mxu1 %v720_v42 }
  0x27   :  { %664 = vmatpush3.bf16.msra.mxu0 %v715_v38 }
  0x28   :  { %665 = vmatprep.subr.bf16.mxu0 %v719_v41 }
  0x2a   :  { %437 = vmatmul.mubr.bf16.gmra.mrb[4].mxu0 %v718_v40 }
  0x2b   :  { %669 = vmatprep.mubr.msk.bf16.mxu0 %vm389_vm0, %v724_v45  ;;  %666 = vmatpush3.bf16.msra.mxu0 %v719_v41 }
  0x2c   :  { %486 = vmatmul.mubr.bf16.gmra.mrb[4].mxu1 %v722_v43  ;;  %667 = vmatprep.subr.bf16.mxu0 %v723_v44 }
  0x2f   :  { %668 = vmatpush3.bf16.msra.mxu0 %v723_v44 }
  0x32   :  { %670 = vmatmul.mubr.msk.bf16.vlgmr.msra.gmra.mrb[8].mxu0 %vm389_vm0, %v725_v50 }
  0x90   :  { %v106_v51 = vpop.permute.xlu0 %105 }
  0x91   :  { %v116_v3 = vpop.permute.xlu1 %115 }
  0x94   :  { %v111_v56 = vpop.permute.xlu0 %110 }
  0x95   :  { %v121_v16 = vpop.permute.xlu1 %120 }
  0xf5   :  { %v615_v52 = vpop.f32.mrb[0].mxu0 }
  0xf6   :  { %v616_v53 = vpop.f32.mrb[1].mxu0 }
  0xf7   :  { %v617_v54 = vadd.f32 %v616_v53, %v615_v52  ;;  %v618_v55 = vpop.f32.mrb[2].mxu0  ;;  %v643_v57 = vpop.f32.mrb[0].mxu1 }
  0xf8   :  { %v619_v58 = vpop.f32.mrb[3].mxu0  ;;  %v644_v61 = vpop.f32.mrb[1].mxu1 }
  0xf9   :  { %v431_v59 = vadd.f32 %v617_v54, %v106_v51  ;;  %v620_v60 = vadd.f32 %v619_v58, %v618_v55  ;;  %v645_v62 = vadd.f32 %v644_v61, %v643_v57  ;;  %v646_v63 = vpop.f32.mrb[2].mxu1 }
  0xfa   :  { %v647_v1 = vpop.f32.mrb[3].mxu1 }
  0xfb   :  { %v434_v0 = vadd.f32 %v620_v60, %v111_v56  ;;  %v648_v2 = vadd.f32 %v647_v1, %v646_v63  ;;  %v480_v4 = vadd.f32 %v645_v62, %v431_v59 }
  0xfd   :  { %v621_v5 = vpop.f32.mrb[4].mxu0  ;;  %v483_v7 = vadd.f32 %v648_v2, %v434_v0 }
  0xfe   :  { %v622_v6 = vpop.f32.mrb[5].mxu0 }
  0xff   :  { %v623_v8 = vadd.f32 %v622_v6, %v621_v5  ;;  %v624_v9 = vpop.f32.mrb[6].mxu0  ;;  %v649_v10 = vpop.f32.mrb[4].mxu1 }
 0x100   :  { %v625_v11 = vpop.f32.mrb[7].mxu0  ;;  %v650_v14 = vpop.f32.mrb[5].mxu1 }
 0x101   :  { %v439_v12 = vadd.f32 %v623_v8, %v116_v3  ;;  %v626_v13 = vadd.f32 %v625_v11, %v624_v9  ;;  %v651_v15 = vadd.f32 %v650_v14, %v649_v10  ;;  %v652_v17 = vpop.f32.mrb[6].mxu1 }
 0x102   :  { %v653_v19 = vpop.f32.mrb[7].mxu1 }
 0x103   :  { %v442_v18 = vadd.f32 %v626_v13, %v121_v16  ;;  %v654_v20 = vadd.f32 %v653_v19, %v652_v17  ;;  %v488_v21 = vadd.f32 %v651_v15, %v439_v12 }
 0x105   :  { %v671_v22 = vpop.f32.mrb[8].mxu0  ;;  %v491_v23 = vadd.f32 %v654_v20, %v442_v18 }
 0x106   :  { %v537_v24 = vadd.f32 %v671_v22, %v488_v21  ;;  %v528_v25 = vpop.f32.mrb[9].mxu0 }
 0x107   :  { %v529_v26 = vadd.f32 %v528_v25, %v480_v4  ;;  %v672_v27 = vpop.f32.mrb[10].mxu0 }
 0x108   :  { %545 = vst [vmem:[%s914_s3 + $0x10] sm:$0xff] %v537_v24  ;;  %v540_v28 = vadd.f32 %v672_v27, %v491_v23  ;;  %v531_v29 = vpop.f32.mrb[11].mxu0 }
 0x109   :  { %543 = vst [vmem:[%s914_s3] sm:$0xff] %v529_v26  ;;  %v532_v30 = vadd.f32 %v531_v29, %v483_v7 }
 0x10a   :  { %546 = vst [vmem:[%s914_s3 + $0x18] sm:$0xff] %v540_v28 }
 0x10b   :  { %544 = vst [vmem:[%s914_s3 + $0x8] sm:$0xff] %v532_v30 }

// kernel: network_forward.70
= control target key start
LH: loop header
LB: loop body
LE: loop exit
PB: predicated region body
PF: predicated region fallthrough
CT: control target
= control target key end

     0   :  { %v1596_v22 = vmov 0   ;;  %vm922_vm0 = vcmask 523264   ;;  %s2097_s1 = inlined_call_operand.vmem [shape: bf16[576,512], index: 1, kind: input, shape index: {}]   ;;  %s2098_s0 = inlined_call_operand.vmem [shape: bf16[16,576], index: 0, kind: input, shape index: {}]   ;;  %s2099_s2 = inlined_call_operand.vmem [shape: f32[16,1], index: 2, kind: input, shape index: {}]   ;;  %s2100_s3 = inlined_call_operand.vmem [shape: f32[16,512], index: 3, kind: output, shape index: {}]  }
   0x1   :  { %v1373_v0 = vld [vmem:[%s2097_s1 + $0x4] ss:$16 sps:$4 sm:$0xff]   ;;  %v1375_v1 = vld [vmem:[%s2097_s1 + $0xc] ss:$16 sps:$4 sm:$0xff]   ;;  %v1377_v2 = vld [vmem:[%s2097_s1] ss:$16 sps:$4 sm:$0xff]   ;;  %1372 = vset.pattern.permute.xlu0 %v1596_v22 }
   0x2   :  { %926 = vmatprep.subr.bf16.mxu0 %v1373_v0  ;;  %v1378_v3 = vld [vmem:[%s2097_s1 + $0x8] ss:$16 sps:$4 sm:$0xff]   ;;  %1055 = vmatprep.subr.bf16.mxu1 %v1375_v1  ;;  %v1379_v4 = vld [vmem:[%s2097_s1 + $0x24] ss:$16 sps:$4 sm:$0xff]   ;;  %v1381_v5 = vld [vmem:[%s2097_s1 + $0x2c] ss:$16 sps:$4 sm:$0xff]  }
   0x3   :  { %927 = vmatpush1.bf16.msra.mxu0 %v1377_v2  ;;  %1056 = vmatpush1.bf16.msra.mxu1 %v1378_v3  ;;  %v1383_v6 = vld [vmem:[%s2097_s1 + $0x20] ss:$16 sps:$4 sm:$0xff]   ;;  %v1384_v7 = vld [vmem:[%s2097_s1 + $0x28] ss:$16 sps:$4 sm:$0xff]   ;;  %v1385_v8 = vld [vmem:[%s2097_s1 + $0x44] ss:$16 sps:$4 sm:$0xff]  }
   0x4   :  { %928 = vmatprep.subr.bf16.mxu0 %v1379_v4  ;;  %1057 = vmatprep.subr.bf16.mxu1 %v1381_v5  ;;  %v1387_v9 = vld [vmem:[%s2097_s1 + $0x4c] ss:$16 sps:$4 sm:$0xff]   ;;  %v1389_v10 = vld [vmem:[%s2097_s1 + $0x40] ss:$16 sps:$4 sm:$0xff]   ;;  %v1390_v11 = vld [vmem:[%s2097_s1 + $0x48] ss:$16 sps:$4 sm:$0xff]  }
   0x5   :  { %v1391_v12 = vld [vmem:[%s2097_s1 + $0x64] ss:$16 sps:$4 sm:$0xff]   ;;  %v1393_v13 = vld [vmem:[%s2097_s1 + $0x6c] ss:$16 sps:$4 sm:$0xff]   ;;  %v1395_v14 = vld [vmem:[%s2097_s1 + $0x60] ss:$16 sps:$4 sm:$0xff]  }
   0x6   :  { %v1396_v15 = vld [vmem:[%s2097_s1 + $0x68] ss:$16 sps:$4 sm:$0xff]   ;;  %v1397_v16 = vld [vmem:[%s2097_s1 + $0x84] ss:$16 sps:$4 sm:$0xff]   ;;  %v1399_v17 = vld [vmem:[%s2097_s1 + $0x8c] ss:$16 sps:$4 sm:$0xff]  }
   0x7   :  { %929 = vmatpush1.bf16.msra.mxu0 %v1383_v6  ;;  %1058 = vmatpush1.bf16.msra.mxu1 %v1384_v7  ;;  %v1401_v18 = vld [vmem:[%s2097_s1 + $0x80] ss:$16 sps:$4 sm:$0xff]   ;;  %v1402_v19 = vld [vmem:[%s2097_s1 + $0x88] ss:$16 sps:$4 sm:$0xff]   ;;  %v1403_v20 = vld [vmem:[%s2097_s1 + $0xa4] ss:$16 sps:$4 sm:$0xff]  }
   0x8   :  { %930 = vmatprep.subr.bf16.mxu0 %v1385_v8  ;;  %1059 = vmatprep.subr.bf16.mxu1 %v1387_v9  ;;  %v1405_v21 = vld [vmem:[%s2097_s1 + $0xac] ss:$16 sps:$4 sm:$0xff]   ;;  %v1407_v23 = vld [vmem:[%s2097_s1 + $0xa0] ss:$16 sps:$4 sm:$0xff]   ;;  %v1408_v24 = vld [vmem:[%s2097_s1 + $0xa8] ss:$16 sps:$4 sm:$0xff]  }
   0x9   :  { %v1409_v25 = vld [vmem:[%s2097_s1 + $0xc4] ss:$16 sps:$4 sm:$0xff]   ;;  %v1411_v26 = vld [vmem:[%s2097_s1 + $0xcc] ss:$16 sps:$4 sm:$0xff]   ;;  %v1413_v27 = vld [vmem:[%s2097_s1 + $0xc0] ss:$16 sps:$4 sm:$0xff]  }
   0xa   :  { %v1414_v28 = vld [vmem:[%s2097_s1 + $0xc8] ss:$16 sps:$4 sm:$0xff]   ;;  %v1415_v29 = vld [vmem:[%s2097_s1 + $0xe4] ss:$16 sps:$4 sm:$0xff]   ;;  %v1417_v30 = vld [vmem:[%s2097_s1 + $0xec] ss:$16 sps:$4 sm:$0xff]  }
   0xb   :  { %931 = vmatpush1.bf16.msra.mxu0 %v1389_v10  ;;  %1060 = vmatpush1.bf16.msra.mxu1 %v1390_v11  ;;  %v1419_v31 = vld [vmem:[%s2097_s1 + $0xe0] ss:$16 sps:$4 sm:$0xff]   ;;  %v1420_v32 = vld [vmem:[%s2097_s1 + $0xe8] ss:$16 sps:$4 sm:$0xff]   ;;  %v1421_v33 = vld [vmem:[%s2097_s1 + $0x104] ss:$16 sps:$4 sm:$0xff]  }
   0xc   :  { %932 = vmatprep.subr.bf16.mxu0 %v1391_v12  ;;  %1061 = vmatprep.subr.bf16.mxu1 %v1393_v13  ;;  %v1423_v34 = vld [vmem:[%s2097_s1 + $0x10c] ss:$16 sps:$4 sm:$0xff]   ;;  %v1425_v35 = vld [vmem:[%s2097_s1 + $0x100] ss:$16 sps:$4 sm:$0xff]   ;;  %v1426_v36 = vld [vmem:[%s2097_s1 + $0x108] ss:$16 sps:$4 sm:$0xff]  }
   0xd   :  { %v1427_v37 = vld [vmem:[%s2097_s1 + $0x124] ss:$16 sps:$4 sm:$0xff]   ;;  %v1429_v38 = vld [vmem:[%s2097_s1 + $0x12c] ss:$16 sps:$4 sm:$0xff]   ;;  %v1431_v39 = vld [vmem:[%s2097_s1 + $0x120] ss:$16 sps:$4 sm:$0xff]  }
   0xe   :  { %v1432_v40 = vld [vmem:[%s2097_s1 + $0x128] ss:$16 sps:$4 sm:$0xff]   ;;  %v1433_v41 = vld [vmem:[%s2097_s1 + $0x144] ss:$16 sps:$4 sm:$0xff]   ;;  %v1435_v42 = vld [vmem:[%s2097_s1 + $0x14c] ss:$16 sps:$4 sm:$0xff]  }
   0xf   :  { %933 = vmatpush1.bf16.msra.mxu0 %v1395_v14  ;;  %1062 = vmatpush1.bf16.msra.mxu1 %v1396_v15  ;;  %v1437_v43 = vld [vmem:[%s2097_s1 + $0x140] ss:$16 sps:$4 sm:$0xff]   ;;  %v1438_v44 = vld [vmem:[%s2097_s1 + $0x148] ss:$16 sps:$4 sm:$0xff]   ;;  %v1439_v45 = vld [vmem:[%s2097_s1 + $0x164] ss:$16 sps:$4 sm:$0xff]  }
  0x10   :  { %934 = vmatprep.subr.bf16.mxu0 %v1397_v16  ;;  %1063 = vmatprep.subr.bf16.mxu1 %v1399_v17  ;;  %v1441_v46 = vld [vmem:[%s2097_s1 + $0x16c] ss:$16 sps:$4 sm:$0xff]   ;;  %v1443_v47 = vld [vmem:[%s2097_s1 + $0x160] ss:$16 sps:$4 sm:$0xff]   ;;  %v1444_v48 = vld [vmem:[%s2097_s1 + $0x168] ss:$16 sps:$4 sm:$0xff]  }
  0x11   :  { %v1471_v49 = vld [vmem:[%s2098_s0 + $0x4] ss:$20 sps:$4 sm:$0xff]   ;;  %v1447_v51 = vld [vmem:[%s2097_s1 + $0x18c] ss:$16 sps:$4 sm:$0xff]   ;;  %v1449_v52 = vld [vmem:[%s2097_s1 + $0x180] ss:$16 sps:$4 sm:$0xff]  }
  0x12   :  { %v1445_v50 = vld [vmem:[%s2097_s1 + $0x184] ss:$16 sps:$4 sm:$0xff]   ;;  %958 = vmatprep.mubr.bf16.mxu0 %v1471_v49  ;;  %1087 = vmatprep.mubr.bf16.mxu1 %v1471_v49  ;;  %v1450_v53 = vld [vmem:[%s2097_s1 + $0x188] ss:$16 sps:$4 sm:$0xff]   ;;  %v1453_v55 = vld [vmem:[%s2097_s1 + $0x1ac] ss:$16 sps:$4 sm:$0xff]  }
  0x13   :  { %935 = vmatpush1.bf16.msra.mxu0 %v1401_v18  ;;  %1064 = vmatpush1.bf16.msra.mxu1 %v1402_v19  ;;  %v1451_v54 = vld [vmem:[%s2097_s1 + $0x1a4] ss:$16 sps:$4 sm:$0xff]   ;;  %v1455_v56 = vld [vmem:[%s2097_s1 + $0x1a0] ss:$16 sps:$4 sm:$0xff]   ;;  %v1456_v57 = vld [vmem:[%s2097_s1 + $0x1a8] ss:$16 sps:$4 sm:$0xff]  }
  0x14   :  { %936 = vmatprep.subr.bf16.mxu0 %v1403_v20  ;;  %1065 = vmatprep.subr.bf16.mxu1 %v1405_v21  ;;  %v1457_v58 = vld [vmem:[%s2097_s1 + $0x1c4] ss:$16 sps:$4 sm:$0xff]   ;;  %v1459_v59 = vld [vmem:[%s2097_s1 + $0x1cc] ss:$16 sps:$4 sm:$0xff]   ;;  %v1461_v60 = vld [vmem:[%s2097_s1 + $0x1c0] ss:$16 sps:$4 sm:$0xff]  }
  0x15   :  { %v1462_v61 = vld [vmem:[%s2097_s1 + $0x1c8] ss:$16 sps:$4 sm:$0xff]   ;;  %v1463_v62 = vld [vmem:[%s2097_s1 + $0x1e4] ss:$16 sps:$4 sm:$0xff]   ;;  %v1465_v63 = vld [vmem:[%s2097_s1 + $0x1ec] ss:$16 sps:$4 sm:$0xff]  }
  0x16   :  { %v1467_v0 = vld [vmem:[%s2097_s1 + $0x1e0] ss:$16 sps:$4 sm:$0xff]   ;;  %v1468_v1 = vld [vmem:[%s2097_s1 + $0x1e8] ss:$16 sps:$4 sm:$0xff]   ;;  %v1474_v2 = vld [vmem:[%s2097_s1 + $0x204] ss:$16 sps:$4 sm:$0xff]  }
  0x17   :  { %937 = vmatpush1.bf16.msra.mxu0 %v1407_v23  ;;  %1066 = vmatpush1.bf16.msra.mxu1 %v1408_v24  ;;  %v1477_v3 = vld [vmem:[%s2097_s1 + $0x20c] ss:$16 sps:$4 sm:$0xff]   ;;  %v1469_v4 = vld [vmem:[%s2098_s0] ss:$20 sps:$4 sm:$0xff]   ;;  %v1475_v6 = vld [vmem:[%s2097_s1 + $0x208] ss:$16 sps:$4 sm:$0xff]  }
  0x18   :  { %938 = vmatprep.subr.bf16.mxu0 %v1409_v25  ;;  %1067 = vmatprep.subr.bf16.mxu1 %v1411_v26  ;;  %v1472_v5 = vld [vmem:[%s2097_s1 + $0x200] ss:$16 sps:$4 sm:$0xff]   ;;  %v1480_v7 = vld [vmem:[%s2097_s1 + $0x224] ss:$16 sps:$4 sm:$0xff]   ;;  %v1483_v8 = vld [vmem:[%s2097_s1 + $0x22c] ss:$16 sps:$4 sm:$0xff]  }
  0x19   :  { %v1478_v9 = vld [vmem:[%s2097_s1 + $0x220] ss:$16 sps:$4 sm:$0xff]   ;;  %v1481_v10 = vld [vmem:[%s2097_s1 + $0x228] ss:$16 sps:$4 sm:$0xff]   ;;  %v1486_v11 = vld [vmem:[%s2097_s1 + $0x244] ss:$16 sps:$4 sm:$0xff]  }
  0x1a   :  { %v1489_v12 = vld [vmem:[%s2097_s1 + $0x24c] ss:$16 sps:$4 sm:$0xff]   ;;  %v1484_v13 = vld [vmem:[%s2097_s1 + $0x240] ss:$16 sps:$4 sm:$0xff]   ;;  %v1487_v14 = vld [vmem:[%s2097_s1 + $0x248] ss:$16 sps:$4 sm:$0xff]  }
  0x1b   :  { %939 = vmatpush1.bf16.msra.mxu0 %v1413_v27  ;;  %1068 = vmatpush1.bf16.msra.mxu1 %v1414_v28  ;;  %v1492_v15 = vld [vmem:[%s2097_s1 + $0x264] ss:$16 sps:$4 sm:$0xff]   ;;  %v1495_v16 = vld [vmem:[%s2097_s1 + $0x26c] ss:$16 sps:$4 sm:$0xff]   ;;  %v1490_v17 = vld [vmem:[%s2097_s1 + $0x260] ss:$16 sps:$4 sm:$0xff]  }
  0x1c   :  { %940 = vmatprep.subr.bf16.mxu0 %v1415_v29  ;;  %1069 = vmatprep.subr.bf16.mxu1 %v1417_v30  ;;  %v1493_v18 = vld [vmem:[%s2097_s1 + $0x268] ss:$16 sps:$4 sm:$0xff]   ;;  %v1498_v19 = vld [vmem:[%s2097_s1 + $0x284] ss:$16 sps:$4 sm:$0xff]   ;;  %v1501_v20 = vld [vmem:[%s2097_s1 + $0x28c] ss:$16 sps:$4 sm:$0xff]  }
  0x1d   :  { %v1496_v21 = vld [vmem:[%s2097_s1 + $0x280] ss:$16 sps:$4 sm:$0xff]   ;;  %v1499_v23 = vld [vmem:[%s2097_s1 + $0x288] ss:$16 sps:$4 sm:$0xff]   ;;  %v1504_v24 = vld [vmem:[%s2097_s1 + $0x2a4] ss:$16 sps:$4 sm:$0xff]  }
  0x1e   :  { %v1507_v25 = vld [vmem:[%s2097_s1 + $0x2ac] ss:$16 sps:$4 sm:$0xff]   ;;  %v1502_v26 = vld [vmem:[%s2097_s1 + $0x2a0] ss:$16 sps:$4 sm:$0xff]   ;;  %v1505_v27 = vld [vmem:[%s2097_s1 + $0x2a8] ss:$16 sps:$4 sm:$0xff]  }
  0x1f   :  { %941 = vmatpush1.bf16.msra.mxu0 %v1419_v31  ;;  %1070 = vmatpush1.bf16.msra.mxu1 %v1420_v32  ;;  %v1510_v28 = vld [vmem:[%s2097_s1 + $0x2c4] ss:$16 sps:$4 sm:$0xff]   ;;  %v1513_v29 = vld [vmem:[%s2097_s1 + $0x2cc] ss:$16 sps:$4 sm:$0xff]   ;;  %v1508_v30 = vld [vmem:[%s2097_s1 + $0x2c0] ss:$16 sps:$4 sm:$0xff]  }
  0x20   :  { %942 = vmatprep.subr.bf16.mxu0 %v1421_v33  ;;  %1071 = vmatprep.subr.bf16.mxu1 %v1423_v34  ;;  %v1511_v31 = vld [vmem:[%s2097_s1 + $0x2c8] ss:$16 sps:$4 sm:$0xff]   ;;  %v1570_v32 = vld [vmem:[%s2098_s0 + $0xc] ss:$20 sps:$4 sm:$0xff]   ;;  %v1516_v33 = vld [vmem:[%s2097_s1 + $0x2e4] ss:$16 sps:$4 sm:$0xff]  }
  0x21   :  { %v1519_v34 = vld [vmem:[%s2097_s1 + $0x2ec] ss:$16 sps:$4 sm:$0xff]   ;;  %v1532_v49 = vld [vmem:[%s2097_s1 + $0x340] ss:$16 sps:$4 sm:$0xff]  }
  0x23   :  { %943 = vmatpush1.bf16.msra.mxu0 %v1425_v35  ;;  %1072 = vmatpush1.bf16.msra.mxu1 %v1426_v36  ;;  %v1514_v35 = vld [vmem:[%s2097_s1 + $0x2e0] ss:$16 sps:$4 sm:$0xff]   ;;  %v1517_v36 = vld [vmem:[%s2097_s1 + $0x2e8] ss:$16 sps:$4 sm:$0xff]  }
  0x24   :  { %944 = vmatprep.subr.bf16.mxu0 %v1427_v37  ;;  %1073 = vmatprep.subr.bf16.mxu1 %v1429_v38  ;;  %v1522_v37 = vld [vmem:[%s2097_s1 + $0x304] ss:$16 sps:$4 sm:$0xff]   ;;  %v1525_v38 = vld [vmem:[%s2097_s1 + $0x30c] ss:$16 sps:$4 sm:$0xff]  }
  0x27   :  { %945 = vmatpush1.bf16.msra.mxu0 %v1431_v39  ;;  %1074 = vmatpush1.bf16.msra.mxu1 %v1432_v40  ;;  %v1520_v39 = vld [vmem:[%s2097_s1 + $0x300] ss:$16 sps:$4 sm:$0xff]   ;;  %v1523_v40 = vld [vmem:[%s2097_s1 + $0x308] ss:$16 sps:$4 sm:$0xff]  }
  0x28   :  { %946 = vmatprep.subr.bf16.mxu0 %v1433_v41  ;;  %1075 = vmatprep.subr.bf16.mxu1 %v1435_v42  ;;  %v1528_v41 = vld [vmem:[%s2097_s1 + $0x324] ss:$16 sps:$4 sm:$0xff]   ;;  %v1531_v42 = vld [vmem:[%s2097_s1 + $0x32c] ss:$16 sps:$4 sm:$0xff]  }
  0x2b   :  { %947 = vmatpush1.bf16.msra.mxu0 %v1437_v43  ;;  %1076 = vmatpush1.bf16.msra.mxu1 %v1438_v44  ;;  %v165_v43 = vld [vmem:[%s2099_s2] sm:$0xff] }
  0x2c   :  { %948 = vmatprep.subr.bf16.mxu0 %v1439_v45  ;;  %1077 = vmatprep.subr.bf16.mxu1 %v1441_v46  ;;  %v1526_v44 = vld [vmem:[%s2097_s1 + $0x320] ss:$16 sps:$4 sm:$0xff]   ;;  %v1529_v45 = vld [vmem:[%s2097_s1 + $0x328] ss:$16 sps:$4 sm:$0xff]   ;;  %v1534_v46 = vld [vmem:[%s2097_s1 + $0x344] ss:$16 sps:$4 sm:$0xff]  }
  0x2d   :  { %169 = vperm.xlu0 %1372, %v165_v43  }
  0x2f   :  { %949 = vmatpush1.bf16.msra.mxu0 %v1443_v47  ;;  %1078 = vmatpush1.bf16.msra.mxu1 %v1444_v48  ;;  %v1537_v47 = vld [vmem:[%s2097_s1 + $0x34c] ss:$16 sps:$4 sm:$0xff]  }
  0x30   :  { %950 = vmatprep.subr.bf16.mxu0 %v1445_v50  ;;  %1079 = vmatprep.subr.bf16.mxu1 %v1447_v51  ;;  %v166_v48 = vld [vmem:[%s2099_s2 + $0x8] sm:$0xff]  ;;  %v1540_v51 = vld [vmem:[%s2097_s1 + $0x364] ss:$16 sps:$4 sm:$0xff]  }
  0x31   :  { %v1535_v50 = vld [vmem:[%s2097_s1 + $0x348] ss:$16 sps:$4 sm:$0xff]   ;;  %174 = vperm.xlu0 %1372, %v166_v48  }
  0x33   :  { %951 = vmatpush1.bf16.msra.mxu0 %v1449_v52  ;;  %1080 = vmatpush1.bf16.msra.mxu1 %v1450_v53  ;;  %v1543_v52 = vld [vmem:[%s2097_s1 + $0x36c] ss:$16 sps:$4 sm:$0xff]   ;;  %v1538_v53 = vld [vmem:[%s2097_s1 + $0x360] ss:$16 sps:$4 sm:$0xff]  }
  0x34   :  { %952 = vmatprep.subr.bf16.mxu0 %v1451_v54  ;;  %1081 = vmatprep.subr.bf16.mxu1 %v1453_v55  ;;  %v1541_v54 = vld [vmem:[%s2097_s1 + $0x368] ss:$16 sps:$4 sm:$0xff]   ;;  %v1546_v55 = vld [vmem:[%s2097_s1 + $0x384] ss:$16 sps:$4 sm:$0xff]  }
  0x37   :  { %953 = vmatpush1.bf16.msra.mxu0 %v1455_v56  ;;  %1082 = vmatpush1.bf16.msra.mxu1 %v1456_v57  ;;  %v1549_v56 = vld [vmem:[%s2097_s1 + $0x38c] ss:$16 sps:$4 sm:$0xff]   ;;  %v1544_v57 = vld [vmem:[%s2097_s1 + $0x380] ss:$16 sps:$4 sm:$0xff]  }
  0x38   :  { %954 = vmatprep.subr.bf16.mxu0 %v1457_v58  ;;  %1083 = vmatprep.subr.bf16.mxu1 %v1459_v59  ;;  %v1547_v58 = vld [vmem:[%s2097_s1 + $0x388] ss:$16 sps:$4 sm:$0xff]   ;;  %v1552_v59 = vld [vmem:[%s2097_s1 + $0x3a4] ss:$16 sps:$4 sm:$0xff]  }
  0x3b   :  { %955 = vmatpush1.bf16.msra.mxu0 %v1461_v60  ;;  %1084 = vmatpush1.bf16.msra.mxu1 %v1462_v61  ;;  %v1555_v60 = vld [vmem:[%s2097_s1 + $0x3ac] ss:$16 sps:$4 sm:$0xff]   ;;  %v1550_v61 = vld [vmem:[%s2097_s1 + $0x3a0] ss:$16 sps:$4 sm:$0xff]  }
  0x3c   :  { %956 = vmatprep.subr.bf16.mxu0 %v1463_v62  ;;  %1085 = vmatprep.subr.bf16.mxu1 %v1465_v63  ;;  %v1553_v62 = vld [vmem:[%s2097_s1 + $0x3a8] ss:$16 sps:$4 sm:$0xff]   ;;  %v1558_v63 = vld [vmem:[%s2097_s1 + $0x3c4] ss:$16 sps:$4 sm:$0xff]  }
  0x3f   :  { %957 = vmatpush1.bf16.msra.mxu0 %v1467_v0  ;;  %1086 = vmatpush1.bf16.msra.mxu1 %v1468_v1  ;;  %v1561_v0 = vld [vmem:[%s2097_s1 + $0x3cc] ss:$16 sps:$4 sm:$0xff]   ;;  %v1556_v1 = vld [vmem:[%s2097_s1 + $0x3c0] ss:$16 sps:$4 sm:$0xff]  }
  0x40   :  { %969 = vmatprep.subr.bf16.mxu0 %v1474_v2  ;;  %1098 = vmatprep.subr.bf16.mxu1 %v1477_v3  ;;  %v1559_v2 = vld [vmem:[%s2097_s1 + $0x3c8] ss:$16 sps:$4 sm:$0xff]   ;;  %v1564_v3 = vld [vmem:[%s2097_s1 + $0x3e4] ss:$16 sps:$4 sm:$0xff]  }
  0x42   :  { %959 = vmatmul.mubr.bf16.vlgmr.msra.gmra.mrb[0].mxu0 %v1469_v4  ;;  %1088 = vmatmul.mubr.bf16.vlgmr.msra.gmra.mrb[0].mxu1 %v1469_v4  ;;  %v1567_v4 = vld [vmem:[%s2097_s1 + $0x3ec] ss:$16 sps:$4 sm:$0xff]  }
  0x43   :  { %970 = vmatpush1.bf16.msra.mxu0 %v1472_v5  ;;  %1099 = vmatpush1.bf16.msra.mxu1 %v1475_v6  ;;  %v1562_v5 = vld [vmem:[%s2097_s1 + $0x3e0] ss:$16 sps:$4 sm:$0xff]   ;;  %v1565_v6 = vld [vmem:[%s2097_s1 + $0x3e8] ss:$16 sps:$4 sm:$0xff]  }
  0x44   :  { %971 = vmatprep.subr.bf16.mxu0 %v1480_v7  ;;  %1100 = vmatprep.subr.bf16.mxu1 %v1483_v8  ;;  %v1573_v7 = vld [vmem:[%s2097_s1 + $0x404] ss:$16 sps:$4 sm:$0xff]   ;;  %v1576_v8 = vld [vmem:[%s2097_s1 + $0x40c] ss:$16 sps:$4 sm:$0xff]  }
  0x45   :  { %1001 = vmatprep.mubr.bf16.mxu0 %v1570_v32  ;;  %1130 = vmatprep.mubr.bf16.mxu1 %v1570_v32 }
  0x47   :  { %972 = vmatpush1.bf16.msra.mxu0 %v1478_v9  ;;  %1101 = vmatpush1.bf16.msra.mxu1 %v1481_v10  ;;  %v1568_v9 = vld [vmem:[%s2098_s0 + $0x8] ss:$20 sps:$4 sm:$0xff]   ;;  %v1571_v10 = vld [vmem:[%s2097_s1 + $0x400] ss:$16 sps:$4 sm:$0xff]  }
  0x48   :  { %973 = vmatprep.subr.bf16.mxu0 %v1486_v11  ;;  %1102 = vmatprep.subr.bf16.mxu1 %v1489_v12  ;;  %v1574_v11 = vld [vmem:[%s2097_s1 + $0x408] ss:$16 sps:$4 sm:$0xff]   ;;  %v1579_v12 = vld [vmem:[%s2097_s1 + $0x424] ss:$16 sps:$4 sm:$0xff]  }
  0x4b   :  { %974 = vmatpush1.bf16.msra.mxu0 %v1484_v13  ;;  %1103 = vmatpush1.bf16.msra.mxu1 %v1487_v14  ;;  %v1582_v13 = vld [vmem:[%s2097_s1 + $0x42c] ss:$16 sps:$4 sm:$0xff]   ;;  %v1577_v14 = vld [vmem:[%s2097_s1 + $0x420] ss:$16 sps:$4 sm:$0xff]  }
  0x4c   :  { %975 = vmatprep.subr.bf16.mxu0 %v1492_v15  ;;  %1104 = vmatprep.subr.bf16.mxu1 %v1495_v16  ;;  %v1580_v15 = vld [vmem:[%s2097_s1 + $0x428] ss:$16 sps:$4 sm:$0xff]   ;;  %v1585_v16 = vld [vmem:[%s2097_s1 + $0x444] ss:$16 sps:$4 sm:$0xff]  }
  0x4f   :  { %976 = vmatpush1.bf16.msra.mxu0 %v1490_v17  ;;  %1105 = vmatpush1.bf16.msra.mxu1 %v1493_v18  ;;  %v1588_v17 = vld [vmem:[%s2097_s1 + $0x44c] ss:$16 sps:$4 sm:$0xff]   ;;  %v1583_v18 = vld [vmem:[%s2097_s1 + $0x440] ss:$16 sps:$4 sm:$0xff]  }
  0x50   :  { %977 = vmatprep.subr.bf16.mxu0 %v1498_v19  ;;  %1106 = vmatprep.subr.bf16.mxu1 %v1501_v20  ;;  %v1586_v19 = vld [vmem:[%s2097_s1 + $0x448] ss:$16 sps:$4 sm:$0xff]   ;;  %v1591_v20 = vld [vmem:[%s2097_s1 + $0x464] ss:$16 sps:$4 sm:$0xff]  }
  0x53   :  { %978 = vmatpush1.bf16.msra.mxu0 %v1496_v21  ;;  %1107 = vmatpush1.bf16.msra.mxu1 %v1499_v23  ;;  %v1589_v21 = vld [vmem:[%s2097_s1 + $0x460] ss:$16 sps:$4 sm:$0xff]   ;;  %v1592_v23 = vld [vmem:[%s2097_s1 + $0x468] ss:$16 sps:$4 sm:$0xff]  }
  0x54   :  { %979 = vmatprep.subr.bf16.mxu0 %v1504_v24  ;;  %1108 = vmatprep.subr.bf16.mxu1 %v1507_v25  ;;  %v1595_v24 = vld [vmem:[%s2098_s0 + $0x10] ss:$20 sps:$4 sm:$0xff]  }
  0x57   :  { %980 = vmatpush1.bf16.msra.mxu0 %v1502_v26  ;;  %1109 = vmatpush1.bf16.msra.mxu1 %v1505_v27 }
  0x58   :  { %981 = vmatprep.subr.bf16.mxu0 %v1510_v28  ;;  %1110 = vmatprep.subr.bf16.mxu1 %v1513_v29 }
  0x5b   :  { %982 = vmatpush1.bf16.msra.mxu0 %v1508_v30  ;;  %1111 = vmatpush1.bf16.msra.mxu1 %v1511_v31 }
  0x5c   :  { %983 = vmatprep.subr.bf16.mxu0 %v1516_v33  ;;  %1112 = vmatprep.subr.bf16.mxu1 %v1519_v34 }
  0x5f   :  { %984 = vmatpush1.bf16.msra.mxu0 %v1514_v35  ;;  %1113 = vmatpush1.bf16.msra.mxu1 %v1517_v36 }
  0x60   :  { %985 = vmatprep.subr.bf16.mxu0 %v1522_v37  ;;  %1114 = vmatprep.subr.bf16.mxu1 %v1525_v38 }
  0x63   :  { %986 = vmatpush1.bf16.msra.mxu0 %v1520_v39  ;;  %1115 = vmatpush1.bf16.msra.mxu1 %v1523_v40 }
  0x64   :  { %987 = vmatprep.subr.bf16.mxu0 %v1528_v41  ;;  %1116 = vmatprep.subr.bf16.mxu1 %v1531_v42 }
  0x67   :  { %988 = vmatpush1.bf16.msra.mxu0 %v1526_v44  ;;  %1117 = vmatpush1.bf16.msra.mxu1 %v1529_v45 }
  0x68   :  { %989 = vmatprep.subr.bf16.mxu0 %v1534_v46  ;;  %1118 = vmatprep.subr.bf16.mxu1 %v1537_v47 }
  0x6b   :  { %990 = vmatpush1.bf16.msra.mxu0 %v1532_v49  ;;  %1119 = vmatpush1.bf16.msra.mxu1 %v1535_v50 }
  0x6c   :  { %991 = vmatprep.subr.bf16.mxu0 %v1540_v51  ;;  %1120 = vmatprep.subr.bf16.mxu1 %v1543_v52 }
  0x6f   :  { %992 = vmatpush1.bf16.msra.mxu0 %v1538_v53  ;;  %1121 = vmatpush1.bf16.msra.mxu1 %v1541_v54 }
  0x70   :  { %993 = vmatprep.subr.bf16.mxu0 %v1546_v55  ;;  %1122 = vmatprep.subr.bf16.mxu1 %v1549_v56 }
  0x73   :  { %994 = vmatpush1.bf16.msra.mxu0 %v1544_v57  ;;  %1123 = vmatpush1.bf16.msra.mxu1 %v1547_v58 }
  0x74   :  { %995 = vmatprep.subr.bf16.mxu0 %v1552_v59  ;;  %1124 = vmatprep.subr.bf16.mxu1 %v1555_v60 }
  0x77   :  { %996 = vmatpush1.bf16.msra.mxu0 %v1550_v61  ;;  %1125 = vmatpush1.bf16.msra.mxu1 %v1553_v62 }
  0x78   :  { %997 = vmatprep.subr.bf16.mxu0 %v1558_v63  ;;  %1126 = vmatprep.subr.bf16.mxu1 %v1561_v0 }
  0x7b   :  { %998 = vmatpush1.bf16.msra.mxu0 %v1556_v1  ;;  %1127 = vmatpush1.bf16.msra.mxu1 %v1559_v2 }
  0x7c   :  { %999 = vmatprep.subr.bf16.mxu0 %v1564_v3  ;;  %1128 = vmatprep.subr.bf16.mxu1 %v1567_v4 }
  0x7f   :  { %1000 = vmatpush1.bf16.msra.mxu0 %v1562_v5  ;;  %1129 = vmatpush1.bf16.msra.mxu1 %v1565_v6 }
  0x80   :  { %1012 = vmatprep.subr.bf16.mxu0 %v1573_v7  ;;  %1141 = vmatprep.subr.bf16.mxu1 %v1576_v8 }
  0x82   :  { %1002 = vmatmul.mubr.bf16.vlgmr.msra.gmra.mrb[0].mxu0 %v1568_v9  ;;  %1131 = vmatmul.mubr.bf16.vlgmr.msra.gmra.mrb[0].mxu1 %v1568_v9 }
  0x83   :  { %1013 = vmatpush1.bf16.msra.mxu0 %v1571_v10  ;;  %1142 = vmatpush1.bf16.msra.mxu1 %v1574_v11 }
  0x84   :  { %1014 = vmatprep.subr.bf16.mxu0 %v1579_v12  ;;  %1143 = vmatprep.subr.bf16.mxu1 %v1582_v13 }
  0x85   :  { %1044 = vmatprep.mubr.bf16.mxu0 %v1596_v22  ;;  %1173 = vmatprep.mubr.bf16.mxu1 %v1596_v22  ;;  %v1594_v22 = vld [vmem:[%s2097_s1 + $0x46c] ss:$16 sps:$4 sm:$0xff]  }
  0x87   :  { %1015 = vmatpush1.bf16.msra.mxu0 %v1577_v14  ;;  %1144 = vmatpush1.bf16.msra.mxu1 %v1580_v15 }
  0x88   :  { %1016 = vmatprep.subr.bf16.mxu0 %v1585_v16  ;;  %1145 = vmatprep.subr.bf16.mxu1 %v1588_v17 }
  0x8b   :  { %1017 = vmatpush1.bf16.msra.mxu0 %v1583_v18  ;;  %1146 = vmatpush1.bf16.msra.mxu1 %v1586_v19 }
  0x8c   :  { %1018 = vmatprep.subr.bf16.mxu0 %v1591_v20  ;;  %1147 = vmatprep.subr.bf16.mxu1 %v1594_v22 }
  0x8f   :  { %1019 = vmatpush1.bf16.msra.mxu0 %v1589_v21  ;;  %1148 = vmatpush1.bf16.msra.mxu1 %v1592_v23 }
  0x92   :  { %1345 = vmatmul.mubr.msk.bf16.vlgmr.msra.gmra.mrb[0].mxu0 %vm922_vm0, %v1595_v24  ;;  %1346 = vmatmul.mubr.msk.bf16.vlgmr.msra.gmra.mrb[0].mxu1 %vm922_vm0, %v1595_v24 }
  0xac   :  { %v170_v25 = vpop.permute.xlu0 %169 }
  0xb0   :  { %v175_v26 = vpop.permute.xlu0 %174 }
 0x165   :  { %v1046_v27 = vpop.f32.mrb[0].mxu0  ;;  %v1175_v28 = vpop.f32.mrb[0].mxu1 }
 0x166   :  { %v1347_v29 = vadd.f32 %v1046_v27, %v170_v25  ;;  %v1351_v30 = vadd.f32 %v1175_v28, %v170_v25  ;;  %v1048_v31 = vpop.f32.mrb[1].mxu0  ;;  %v1177_v32 = vpop.f32.mrb[1].mxu1 }
 0x167   :  { %v1348_v33 = vadd.f32 %v1048_v31, %v170_v25  ;;  %v1352_v34 = vadd.f32 %v1177_v32, %v170_v25  ;;  %v1050_v35 = vpop.f32.mrb[2].mxu0  ;;  %v1179_v36 = vpop.f32.mrb[2].mxu1 }
 0x168   :  { %1184 = vst [vmem:[%s2100_s3] sm:$0xff] %v1347_v29  ;;  %1186 = vst [vmem:[%s2100_s3 + $0x10] sm:$0xff] %v1351_v30  ;;  %v1349_v37 = vadd.f32 %v1050_v35, %v175_v26  ;;  %v1353_v38 = vadd.f32 %v1179_v36, %v175_v26  ;;  %v1052_v39 = vpop.f32.mrb[3].mxu0  ;;  %v1181_v40 = vpop.f32.mrb[3].mxu1 }
 0x169   :  { %1185 = vst [vmem:[%s2100_s3 + $0x8] sm:$0xff] %v1348_v33  ;;  %1187 = vst [vmem:[%s2100_s3 + $0x18] sm:$0xff] %v1352_v34  ;;  %v1350_v41 = vadd.f32 %v1052_v39, %v175_v26  ;;  %v1354_v42 = vadd.f32 %v1181_v40, %v175_v26 }
 0x16a   :  { %1188 = vst [vmem:[%s2100_s3 + $0x20] sm:$0xff] %v1349_v37  ;;  %1190 = vst [vmem:[%s2100_s3 + $0x30] sm:$0xff] %v1353_v38 }
 0x16b   :  { %1189 = vst [vmem:[%s2100_s3 + $0x28] sm:$0xff] %v1350_v41  ;;  %1191 = vst [vmem:[%s2100_s3 + $0x38] sm:$0xff] %v1354_v42 }

// kernel: network_forward.63
= control target key start
LH: loop header
LB: loop body
LE: loop exit
PB: predicated region body
PF: predicated region fallthrough
CT: control target
= control target key end

     0   :  { %v873_v1 = vmov 0   ;;  %vm478_vm0 = vcmask 261120   ;;  %s1152_s1 = inlined_call_operand.vmem [shape: bf16[288,512], index: 1, kind: input, shape index: {}]   ;;  %s1153_s0 = inlined_call_operand.vmem [shape: bf16[16,288], index: 0, kind: input, shape index: {}]   ;;  %s1154_s2 = inlined_call_operand.vmem [shape: f32[16,1], index: 2, kind: input, shape index: {}]   ;;  %s1155_s3 = inlined_call_operand.vmem [shape: f32[16,512], index: 3, kind: output, shape index: {}]  }
   0x1   :  { %v761_v0 = vld [vmem:[%s1152_s1 + $0x4] ss:$16 sps:$4 sm:$0xff]   ;;  %760 = vset.pattern.permute.xlu0 %v873_v1  ;;  %v763_v2 = vld [vmem:[%s1152_s1 + $0xc] ss:$16 sps:$4 sm:$0xff]   ;;  %v765_v3 = vld [vmem:[%s1152_s1] ss:$16 sps:$4 sm:$0xff]  }
   0x2   :  { %482 = vmatprep.subr.bf16.mxu0 %v761_v0  ;;  %v766_v4 = vld [vmem:[%s1152_s1 + $0x8] ss:$16 sps:$4 sm:$0xff]   ;;  %568 = vmatprep.subr.bf16.mxu1 %v763_v2  ;;  %v767_v5 = vld [vmem:[%s1152_s1 + $0x24] ss:$16 sps:$4 sm:$0xff]   ;;  %v769_v6 = vld [vmem:[%s1152_s1 + $0x2c] ss:$16 sps:$4 sm:$0xff]  }
   0x3   :  { %483 = vmatpush1.bf16.msra.mxu0 %v765_v3  ;;  %569 = vmatpush1.bf16.msra.mxu1 %v766_v4  ;;  %v771_v7 = vld [vmem:[%s1152_s1 + $0x20] ss:$16 sps:$4 sm:$0xff]   ;;  %v772_v8 = vld [vmem:[%s1152_s1 + $0x28] ss:$16 sps:$4 sm:$0xff]   ;;  %v773_v9 = vld [vmem:[%s1152_s1 + $0x44] ss:$16 sps:$4 sm:$0xff]  }
   0x4   :  { %484 = vmatprep.subr.bf16.mxu0 %v767_v5  ;;  %570 = vmatprep.subr.bf16.mxu1 %v769_v6  ;;  %v775_v10 = vld [vmem:[%s1152_s1 + $0x4c] ss:$16 sps:$4 sm:$0xff]   ;;  %v777_v11 = vld [vmem:[%s1152_s1 + $0x40] ss:$16 sps:$4 sm:$0xff]   ;;  %v778_v12 = vld [vmem:[%s1152_s1 + $0x48] ss:$16 sps:$4 sm:$0xff]  }
   0x5   :  { %v779_v13 = vld [vmem:[%s1152_s1 + $0x64] ss:$16 sps:$4 sm:$0xff]   ;;  %v781_v14 = vld [vmem:[%s1152_s1 + $0x6c] ss:$16 sps:$4 sm:$0xff]   ;;  %v783_v15 = vld [vmem:[%s1152_s1 + $0x60] ss:$16 sps:$4 sm:$0xff]  }
   0x6   :  { %v784_v16 = vld [vmem:[%s1152_s1 + $0x68] ss:$16 sps:$4 sm:$0xff]   ;;  %v785_v17 = vld [vmem:[%s1152_s1 + $0x84] ss:$16 sps:$4 sm:$0xff]   ;;  %v787_v18 = vld [vmem:[%s1152_s1 + $0x8c] ss:$16 sps:$4 sm:$0xff]  }
   0x7   :  { %485 = vmatpush1.bf16.msra.mxu0 %v771_v7  ;;  %571 = vmatpush1.bf16.msra.mxu1 %v772_v8  ;;  %v789_v19 = vld [vmem:[%s1152_s1 + $0x80] ss:$16 sps:$4 sm:$0xff]   ;;  %v790_v20 = vld [vmem:[%s1152_s1 + $0x88] ss:$16 sps:$4 sm:$0xff]   ;;  %v791_v21 = vld [vmem:[%s1152_s1 + $0xa4] ss:$16 sps:$4 sm:$0xff]  }
   0x8   :  { %486 = vmatprep.subr.bf16.mxu0 %v773_v9  ;;  %572 = vmatprep.subr.bf16.mxu1 %v775_v10  ;;  %v793_v22 = vld [vmem:[%s1152_s1 + $0xac] ss:$16 sps:$4 sm:$0xff]   ;;  %v795_v23 = vld [vmem:[%s1152_s1 + $0xa0] ss:$16 sps:$4 sm:$0xff]   ;;  %v796_v24 = vld [vmem:[%s1152_s1 + $0xa8] ss:$16 sps:$4 sm:$0xff]  }
   0x9   :  { %v797_v25 = vld [vmem:[%s1152_s1 + $0xc4] ss:$16 sps:$4 sm:$0xff]   ;;  %v799_v26 = vld [vmem:[%s1152_s1 + $0xcc] ss:$16 sps:$4 sm:$0xff]   ;;  %v801_v27 = vld [vmem:[%s1152_s1 + $0xc0] ss:$16 sps:$4 sm:$0xff]  }
   0xa   :  { %v802_v28 = vld [vmem:[%s1152_s1 + $0xc8] ss:$16 sps:$4 sm:$0xff]   ;;  %v803_v29 = vld [vmem:[%s1152_s1 + $0xe4] ss:$16 sps:$4 sm:$0xff]   ;;  %v805_v30 = vld [vmem:[%s1152_s1 + $0xec] ss:$16 sps:$4 sm:$0xff]  }
   0xb   :  { %487 = vmatpush1.bf16.msra.mxu0 %v777_v11  ;;  %573 = vmatpush1.bf16.msra.mxu1 %v778_v12  ;;  %v807_v31 = vld [vmem:[%s1152_s1 + $0xe0] ss:$16 sps:$4 sm:$0xff]   ;;  %v808_v32 = vld [vmem:[%s1152_s1 + $0xe8] ss:$16 sps:$4 sm:$0xff]   ;;  %v809_v33 = vld [vmem:[%s1152_s1 + $0x104] ss:$16 sps:$4 sm:$0xff]  }
   0xc   :  { %488 = vmatprep.subr.bf16.mxu0 %v779_v13  ;;  %574 = vmatprep.subr.bf16.mxu1 %v781_v14  ;;  %v811_v34 = vld [vmem:[%s1152_s1 + $0x10c] ss:$16 sps:$4 sm:$0xff]   ;;  %v813_v35 = vld [vmem:[%s1152_s1 + $0x100] ss:$16 sps:$4 sm:$0xff]   ;;  %v814_v36 = vld [vmem:[%s1152_s1 + $0x108] ss:$16 sps:$4 sm:$0xff]  }
   0xd   :  { %v815_v37 = vld [vmem:[%s1152_s1 + $0x124] ss:$16 sps:$4 sm:$0xff]   ;;  %v817_v38 = vld [vmem:[%s1152_s1 + $0x12c] ss:$16 sps:$4 sm:$0xff]   ;;  %v819_v39 = vld [vmem:[%s1152_s1 + $0x120] ss:$16 sps:$4 sm:$0xff]  }
   0xe   :  { %v820_v40 = vld [vmem:[%s1152_s1 + $0x128] ss:$16 sps:$4 sm:$0xff]   ;;  %v821_v41 = vld [vmem:[%s1152_s1 + $0x144] ss:$16 sps:$4 sm:$0xff]   ;;  %v823_v42 = vld [vmem:[%s1152_s1 + $0x14c] ss:$16 sps:$4 sm:$0xff]  }
   0xf   :  { %489 = vmatpush1.bf16.msra.mxu0 %v783_v15  ;;  %575 = vmatpush1.bf16.msra.mxu1 %v784_v16  ;;  %v825_v43 = vld [vmem:[%s1152_s1 + $0x140] ss:$16 sps:$4 sm:$0xff]   ;;  %v826_v44 = vld [vmem:[%s1152_s1 + $0x148] ss:$16 sps:$4 sm:$0xff]   ;;  %v827_v45 = vld [vmem:[%s1152_s1 + $0x164] ss:$16 sps:$4 sm:$0xff]  }
  0x10   :  { %490 = vmatprep.subr.bf16.mxu0 %v785_v17  ;;  %576 = vmatprep.subr.bf16.mxu1 %v787_v18  ;;  %v829_v46 = vld [vmem:[%s1152_s1 + $0x16c] ss:$16 sps:$4 sm:$0xff]   ;;  %v831_v47 = vld [vmem:[%s1152_s1 + $0x160] ss:$16 sps:$4 sm:$0xff]   ;;  %v832_v48 = vld [vmem:[%s1152_s1 + $0x168] ss:$16 sps:$4 sm:$0xff]  }
  0x11   :  { %v833_v49 = vld [vmem:[%s1152_s1 + $0x184] ss:$16 sps:$4 sm:$0xff]   ;;  %v835_v51 = vld [vmem:[%s1152_s1 + $0x18c] ss:$16 sps:$4 sm:$0xff]   ;;  %v837_v52 = vld [vmem:[%s1152_s1 + $0x180] ss:$16 sps:$4 sm:$0xff]  }
  0x12   :  { %v859_v50 = vld [vmem:[%s1153_s0 + $0x4] ss:$12 sps:$4 sm:$0xff]   ;;  %v838_v53 = vld [vmem:[%s1152_s1 + $0x188] ss:$16 sps:$4 sm:$0xff]   ;;  %v841_v55 = vld [vmem:[%s1152_s1 + $0x1ac] ss:$16 sps:$4 sm:$0xff]  }
  0x13   :  { %491 = vmatpush1.bf16.msra.mxu0 %v789_v19  ;;  %577 = vmatpush1.bf16.msra.mxu1 %v790_v20  ;;  %v839_v54 = vld [vmem:[%s1152_s1 + $0x1a4] ss:$16 sps:$4 sm:$0xff]   ;;  %v843_v57 = vld [vmem:[%s1152_s1 + $0x1a0] ss:$16 sps:$4 sm:$0xff]   ;;  %v844_v58 = vld [vmem:[%s1152_s1 + $0x1a8] ss:$16 sps:$4 sm:$0xff]  }
  0x14   :  { %492 = vmatprep.subr.bf16.mxu0 %v791_v21  ;;  %578 = vmatprep.subr.bf16.mxu1 %v793_v22  ;;  %v91_v56 = vld [vmem:[%s1154_s2] sm:$0xff]  ;;  %v92_v59 = vld [vmem:[%s1154_s2 + $0x8] sm:$0xff] }
  0x15   :  { %514 = vmatprep.mubr.bf16.mxu0 %v859_v50  ;;  %600 = vmatprep.mubr.bf16.mxu1 %v859_v50  ;;  %v845_v60 = vld [vmem:[%s1152_s1 + $0x1c4] ss:$16 sps:$4 sm:$0xff]   ;;  %v847_v61 = vld [vmem:[%s1152_s1 + $0x1cc] ss:$16 sps:$4 sm:$0xff]   ;;  %v849_v62 = vld [vmem:[%s1152_s1 + $0x1c0] ss:$16 sps:$4 sm:$0xff]  }
  0x16   :  { %95 = vperm.xlu0 %760, %v91_v56   ;;  %v850_v63 = vld [vmem:[%s1152_s1 + $0x1c8] ss:$16 sps:$4 sm:$0xff]   ;;  %v851_v0 = vld [vmem:[%s1152_s1 + $0x1e4] ss:$16 sps:$4 sm:$0xff]   ;;  %v853_v2 = vld [vmem:[%s1152_s1 + $0x1ec] ss:$16 sps:$4 sm:$0xff]  }
  0x17   :  { %493 = vmatpush1.bf16.msra.mxu0 %v795_v23  ;;  %579 = vmatpush1.bf16.msra.mxu1 %v796_v24  ;;  %v855_v3 = vld [vmem:[%s1152_s1 + $0x1e0] ss:$16 sps:$4 sm:$0xff]   ;;  %v856_v4 = vld [vmem:[%s1152_s1 + $0x1e8] ss:$16 sps:$4 sm:$0xff]   ;;  %v863_v5 = vld [vmem:[%s1152_s1 + $0x204] ss:$16 sps:$4 sm:$0xff]  }
  0x18   :  { %494 = vmatprep.subr.bf16.mxu0 %v797_v25  ;;  %580 = vmatprep.subr.bf16.mxu1 %v799_v26  ;;  %v866_v6 = vld [vmem:[%s1152_s1 + $0x20c] ss:$16 sps:$4 sm:$0xff]   ;;  %v861_v8 = vld [vmem:[%s1152_s1 + $0x200] ss:$16 sps:$4 sm:$0xff]   ;;  %v864_v9 = vld [vmem:[%s1152_s1 + $0x208] ss:$16 sps:$4 sm:$0xff]  }
  0x19   :  { %v857_v7 = vld [vmem:[%s1153_s0] ss:$12 sps:$4 sm:$0xff]   ;;  %v869_v10 = vld [vmem:[%s1152_s1 + $0x224] ss:$16 sps:$4 sm:$0xff]   ;;  %v870_v13 = vld [vmem:[%s1152_s1 + $0x228] ss:$16 sps:$4 sm:$0xff]  }
  0x1a   :  { %100 = vperm.xlu0 %760, %v92_v59   ;;  %v872_v11 = vld [vmem:[%s1152_s1 + $0x22c] ss:$16 sps:$4 sm:$0xff]   ;;  %v867_v12 = vld [vmem:[%s1152_s1 + $0x220] ss:$16 sps:$4 sm:$0xff]   ;;  %v860_v14 = vld [vmem:[%s1153_s0 + $0x8] ss:$12 sps:$4 sm:$0xff]  }
  0x1b   :  { %495 = vmatpush1.bf16.msra.mxu0 %v801_v27  ;;  %581 = vmatpush1.bf16.msra.mxu1 %v802_v28 }
  0x1c   :  { %496 = vmatprep.subr.bf16.mxu0 %v803_v29  ;;  %582 = vmatprep.subr.bf16.mxu1 %v805_v30 }
  0x1f   :  { %497 = vmatpush1.bf16.msra.mxu0 %v807_v31  ;;  %583 = vmatpush1.bf16.msra.mxu1 %v808_v32 }
  0x20   :  { %498 = vmatprep.subr.bf16.mxu0 %v809_v33  ;;  %584 = vmatprep.subr.bf16.mxu1 %v811_v34 }
  0x23   :  { %499 = vmatpush1.bf16.msra.mxu0 %v813_v35  ;;  %585 = vmatpush1.bf16.msra.mxu1 %v814_v36 }
  0x24   :  { %500 = vmatprep.subr.bf16.mxu0 %v815_v37  ;;  %586 = vmatprep.subr.bf16.mxu1 %v817_v38 }
  0x27   :  { %501 = vmatpush1.bf16.msra.mxu0 %v819_v39  ;;  %587 = vmatpush1.bf16.msra.mxu1 %v820_v40 }
  0x28   :  { %502 = vmatprep.subr.bf16.mxu0 %v821_v41  ;;  %588 = vmatprep.subr.bf16.mxu1 %v823_v42 }
  0x2b   :  { %503 = vmatpush1.bf16.msra.mxu0 %v825_v43  ;;  %589 = vmatpush1.bf16.msra.mxu1 %v826_v44 }
  0x2c   :  { %504 = vmatprep.subr.bf16.mxu0 %v827_v45  ;;  %590 = vmatprep.subr.bf16.mxu1 %v829_v46 }
  0x2f   :  { %505 = vmatpush1.bf16.msra.mxu0 %v831_v47  ;;  %591 = vmatpush1.bf16.msra.mxu1 %v832_v48 }
  0x30   :  { %506 = vmatprep.subr.bf16.mxu0 %v833_v49  ;;  %592 = vmatprep.subr.bf16.mxu1 %v835_v51 }
  0x33   :  { %507 = vmatpush1.bf16.msra.mxu0 %v837_v52  ;;  %593 = vmatpush1.bf16.msra.mxu1 %v838_v53 }
  0x34   :  { %508 = vmatprep.subr.bf16.mxu0 %v839_v54  ;;  %594 = vmatprep.subr.bf16.mxu1 %v841_v55 }
  0x37   :  { %509 = vmatpush1.bf16.msra.mxu0 %v843_v57  ;;  %595 = vmatpush1.bf16.msra.mxu1 %v844_v58 }
  0x38   :  { %510 = vmatprep.subr.bf16.mxu0 %v845_v60  ;;  %596 = vmatprep.subr.bf16.mxu1 %v847_v61 }
  0x3b   :  { %511 = vmatpush1.bf16.msra.mxu0 %v849_v62  ;;  %597 = vmatpush1.bf16.msra.mxu1 %v850_v63 }
  0x3c   :  { %512 = vmatprep.subr.bf16.mxu0 %v851_v0  ;;  %598 = vmatprep.subr.bf16.mxu1 %v853_v2 }
  0x3f   :  { %513 = vmatpush1.bf16.msra.mxu0 %v855_v3  ;;  %599 = vmatpush1.bf16.msra.mxu1 %v856_v4 }
  0x40   :  { %525 = vmatprep.subr.bf16.mxu0 %v863_v5  ;;  %611 = vmatprep.subr.bf16.mxu1 %v866_v6 }
  0x42   :  { %515 = vmatmul.mubr.bf16.vlgmr.msra.gmra.mrb[0].mxu0 %v857_v7  ;;  %601 = vmatmul.mubr.bf16.vlgmr.msra.gmra.mrb[0].mxu1 %v857_v7 }
  0x43   :  { %526 = vmatpush1.bf16.msra.mxu0 %v861_v8  ;;  %612 = vmatpush1.bf16.msra.mxu1 %v864_v9 }
  0x44   :  { %527 = vmatprep.subr.bf16.mxu0 %v869_v10  ;;  %613 = vmatprep.subr.bf16.mxu1 %v872_v11 }
  0x45   :  { %557 = vmatprep.mubr.bf16.mxu0 %v873_v1  ;;  %643 = vmatprep.mubr.bf16.mxu1 %v873_v1 }
  0x47   :  { %528 = vmatpush1.bf16.msra.mxu0 %v867_v12  ;;  %614 = vmatpush1.bf16.msra.mxu1 %v870_v13 }
  0x4e   :  { %741 = vmatmul.mubr.msk.bf16.vlgmr.msra.gmra.mrb[0].mxu0 %vm478_vm0, %v860_v14  ;;  %742 = vmatmul.mubr.msk.bf16.vlgmr.msra.gmra.mrb[0].mxu1 %vm478_vm0, %v860_v14 }
  0x95   :  { %v96_v15 = vpop.permute.xlu0 %95 }
  0x99   :  { %v101_v16 = vpop.permute.xlu0 %100 }
 0x121   :  { %v559_v17 = vpop.f32.mrb[0].mxu0  ;;  %v645_v18 = vpop.f32.mrb[0].mxu1 }
 0x122   :  { %v743_v19 = vadd.f32 %v559_v17, %v96_v15  ;;  %v747_v20 = vadd.f32 %v645_v18, %v96_v15  ;;  %v561_v21 = vpop.f32.mrb[1].mxu0  ;;  %v647_v22 = vpop.f32.mrb[1].mxu1 }
 0x123   :  { %v744_v23 = vadd.f32 %v561_v21, %v96_v15  ;;  %v748_v24 = vadd.f32 %v647_v22, %v96_v15  ;;  %v563_v1 = vpop.f32.mrb[2].mxu0  ;;  %v649_v25 = vpop.f32.mrb[2].mxu1 }
 0x124   :  { %654 = vst [vmem:[%s1155_s3] sm:$0xff] %v743_v19  ;;  %656 = vst [vmem:[%s1155_s3 + $0x10] sm:$0xff] %v747_v20  ;;  %v745_v26 = vadd.f32 %v563_v1, %v101_v16  ;;  %v749_v27 = vadd.f32 %v649_v25, %v101_v16  ;;  %v565_v28 = vpop.f32.mrb[3].mxu0  ;;  %v651_v29 = vpop.f32.mrb[3].mxu1 }
 0x125   :  { %655 = vst [vmem:[%s1155_s3 + $0x8] sm:$0xff] %v744_v23  ;;  %657 = vst [vmem:[%s1155_s3 + $0x18] sm:$0xff] %v748_v24  ;;  %v746_v30 = vadd.f32 %v565_v28, %v101_v16  ;;  %v750_v31 = vadd.f32 %v651_v29, %v101_v16 }
 0x126   :  { %658 = vst [vmem:[%s1155_s3 + $0x20] sm:$0xff] %v745_v26  ;;  %660 = vst [vmem:[%s1155_s3 + $0x30] sm:$0xff] %v749_v27 }
 0x127   :  { %659 = vst [vmem:[%s1155_s3 + $0x28] sm:$0xff] %v746_v30  ;;  %661 = vst [vmem:[%s1155_s3 + $0x38] sm:$0xff] %v750_v31 }

// kernel: network_forward.71
= control target key start
LH: loop header
LB: loop body
LE: loop exit
PB: predicated region body
PF: predicated region fallthrough
CT: control target
= control target key end

     0   :  { %vm1225_vm0 = vcmask 130048   ;;  %s2752_s1 = inlined_call_operand.vmem [shape: bf16[784,512], index: 1, kind: input, shape index: {}]   ;;  %s2753_s0 = inlined_call_operand.vmem [shape: bf16[8,784], index: 0, kind: input, shape index: {}]   ;;  %s2754_s2 = inlined_call_operand.vmem [shape: f32[8,1], index: 2, kind: input, shape index: {}]   ;;  %s2755_s3 = inlined_call_operand.vmem [shape: f32[8,512], index: 3, kind: output, shape index: {}]  }
   0x1   :  { %v1800_v0 = vld [vmem:[%s2752_s1 + $0x4] ss:$16 sps:$4 sm:$0xff]   ;;  %v1802_v1 = vld [vmem:[%s2752_s1 + $0xc] ss:$16 sps:$4 sm:$0xff]   ;;  %v1804_v2 = vld [vmem:[%s2752_s1] ss:$16 sps:$4 sm:$0xff]  }
   0x2   :  { %1229 = vmatprep.subr.bf16.mxu0 %v1800_v0  ;;  %v1805_v3 = vld [vmem:[%s2752_s1 + $0x8] ss:$16 sps:$4 sm:$0xff]   ;;  %1393 = vmatprep.subr.bf16.mxu1 %v1802_v1  ;;  %v1806_v4 = vld [vmem:[%s2752_s1 + $0x24] ss:$16 sps:$4 sm:$0xff]   ;;  %v1808_v5 = vld [vmem:[%s2752_s1 + $0x2c] ss:$16 sps:$4 sm:$0xff]  }
   0x3   :  { %1230 = vmatpush1.bf16.msra.mxu0 %v1804_v2  ;;  %1394 = vmatpush1.bf16.msra.mxu1 %v1805_v3  ;;  %v1810_v6 = vld [vmem:[%s2752_s1 + $0x20] ss:$16 sps:$4 sm:$0xff]   ;;  %v1811_v7 = vld [vmem:[%s2752_s1 + $0x28] ss:$16 sps:$4 sm:$0xff]   ;;  %v1812_v8 = vld [vmem:[%s2752_s1 + $0x44] ss:$16 sps:$4 sm:$0xff]  }
   0x4   :  { %1231 = vmatprep.subr.bf16.mxu0 %v1806_v4  ;;  %1395 = vmatprep.subr.bf16.mxu1 %v1808_v5  ;;  %v1814_v9 = vld [vmem:[%s2752_s1 + $0x4c] ss:$16 sps:$4 sm:$0xff]   ;;  %v1816_v10 = vld [vmem:[%s2752_s1 + $0x40] ss:$16 sps:$4 sm:$0xff]   ;;  %v1817_v11 = vld [vmem:[%s2752_s1 + $0x48] ss:$16 sps:$4 sm:$0xff]  }
   0x5   :  { %v1818_v12 = vld [vmem:[%s2752_s1 + $0x64] ss:$16 sps:$4 sm:$0xff]   ;;  %v1820_v13 = vld [vmem:[%s2752_s1 + $0x6c] ss:$16 sps:$4 sm:$0xff]   ;;  %v1822_v14 = vld [vmem:[%s2752_s1 + $0x60] ss:$16 sps:$4 sm:$0xff]  }
   0x6   :  { %v1823_v15 = vld [vmem:[%s2752_s1 + $0x68] ss:$16 sps:$4 sm:$0xff]   ;;  %v1824_v16 = vld [vmem:[%s2752_s1 + $0x84] ss:$16 sps:$4 sm:$0xff]   ;;  %v1826_v17 = vld [vmem:[%s2752_s1 + $0x8c] ss:$16 sps:$4 sm:$0xff]  }
   0x7   :  { %1232 = vmatpush1.bf16.msra.mxu0 %v1810_v6  ;;  %1396 = vmatpush1.bf16.msra.mxu1 %v1811_v7  ;;  %v1828_v18 = vld [vmem:[%s2752_s1 + $0x80] ss:$16 sps:$4 sm:$0xff]   ;;  %v1829_v19 = vld [vmem:[%s2752_s1 + $0x88] ss:$16 sps:$4 sm:$0xff]   ;;  %v1830_v20 = vld [vmem:[%s2752_s1 + $0xa4] ss:$16 sps:$4 sm:$0xff]  }
   0x8   :  { %1233 = vmatprep.subr.bf16.mxu0 %v1812_v8  ;;  %1397 = vmatprep.subr.bf16.mxu1 %v1814_v9  ;;  %v1832_v21 = vld [vmem:[%s2752_s1 + $0xac] ss:$16 sps:$4 sm:$0xff]   ;;  %v1834_v22 = vld [vmem:[%s2752_s1 + $0xa0] ss:$16 sps:$4 sm:$0xff]   ;;  %v1835_v23 = vld [vmem:[%s2752_s1 + $0xa8] ss:$16 sps:$4 sm:$0xff]  }
   0x9   :  { %v1836_v24 = vld [vmem:[%s2752_s1 + $0xc4] ss:$16 sps:$4 sm:$0xff]   ;;  %v1838_v25 = vld [vmem:[%s2752_s1 + $0xcc] ss:$16 sps:$4 sm:$0xff]   ;;  %v1840_v26 = vld [vmem:[%s2752_s1 + $0xc0] ss:$16 sps:$4 sm:$0xff]  }
   0xa   :  { %v1841_v27 = vld [vmem:[%s2752_s1 + $0xc8] ss:$16 sps:$4 sm:$0xff]   ;;  %v1842_v28 = vld [vmem:[%s2752_s1 + $0xe4] ss:$16 sps:$4 sm:$0xff]   ;;  %v1844_v29 = vld [vmem:[%s2752_s1 + $0xec] ss:$16 sps:$4 sm:$0xff]  }
   0xb   :  { %1234 = vmatpush1.bf16.msra.mxu0 %v1816_v10  ;;  %1398 = vmatpush1.bf16.msra.mxu1 %v1817_v11  ;;  %v1846_v30 = vld [vmem:[%s2752_s1 + $0xe0] ss:$16 sps:$4 sm:$0xff]   ;;  %v1847_v31 = vld [vmem:[%s2752_s1 + $0xe8] ss:$16 sps:$4 sm:$0xff]   ;;  %v1848_v32 = vld [vmem:[%s2752_s1 + $0x104] ss:$16 sps:$4 sm:$0xff]  }
   0xc   :  { %1235 = vmatprep.subr.bf16.mxu0 %v1818_v12  ;;  %1399 = vmatprep.subr.bf16.mxu1 %v1820_v13  ;;  %v1850_v33 = vld [vmem:[%s2752_s1 + $0x10c] ss:$16 sps:$4 sm:$0xff]   ;;  %v1852_v34 = vld [vmem:[%s2752_s1 + $0x100] ss:$16 sps:$4 sm:$0xff]   ;;  %v1853_v35 = vld [vmem:[%s2752_s1 + $0x108] ss:$16 sps:$4 sm:$0xff]  }
   0xd   :  { %v1854_v36 = vld [vmem:[%s2752_s1 + $0x124] ss:$16 sps:$4 sm:$0xff]   ;;  %v1856_v37 = vld [vmem:[%s2752_s1 + $0x12c] ss:$16 sps:$4 sm:$0xff]   ;;  %v1858_v38 = vld [vmem:[%s2752_s1 + $0x120] ss:$16 sps:$4 sm:$0xff]  }
   0xe   :  { %v1859_v39 = vld [vmem:[%s2752_s1 + $0x128] ss:$16 sps:$4 sm:$0xff]   ;;  %v1860_v40 = vld [vmem:[%s2752_s1 + $0x144] ss:$16 sps:$4 sm:$0xff]   ;;  %v1862_v41 = vld [vmem:[%s2752_s1 + $0x14c] ss:$16 sps:$4 sm:$0xff]  }
   0xf   :  { %1236 = vmatpush1.bf16.msra.mxu0 %v1822_v14  ;;  %1400 = vmatpush1.bf16.msra.mxu1 %v1823_v15  ;;  %v1864_v42 = vld [vmem:[%s2752_s1 + $0x140] ss:$16 sps:$4 sm:$0xff]   ;;  %v1865_v43 = vld [vmem:[%s2752_s1 + $0x148] ss:$16 sps:$4 sm:$0xff]   ;;  %v1866_v44 = vld [vmem:[%s2752_s1 + $0x164] ss:$16 sps:$4 sm:$0xff]  }
  0x10   :  { %1237 = vmatprep.subr.bf16.mxu0 %v1824_v16  ;;  %1401 = vmatprep.subr.bf16.mxu1 %v1826_v17  ;;  %v1868_v45 = vld [vmem:[%s2752_s1 + $0x16c] ss:$16 sps:$4 sm:$0xff]   ;;  %v15_v46 = vld [vmem:[%s2753_s0] sm:$0xff]  ;;  %v1871_v49 = vld [vmem:[%s2752_s1 + $0x168] ss:$16 sps:$4 sm:$0xff]   ;;  %v2101_v13 = vmov 0  }
  0x11   :  { %v1870_v47 = vld [vmem:[%s2752_s1 + $0x160] ss:$16 sps:$4 sm:$0xff]   ;;  %v1566_v48 = vcombine.high %v15_v46, %v15_v46  ;;  %v1872_v50 = vld [vmem:[%s2752_s1 + $0x184] ss:$16 sps:$4 sm:$0xff]   ;;  %v1874_v51 = vld [vmem:[%s2752_s1 + $0x18c] ss:$16 sps:$4 sm:$0xff]   ;;  %v1565_v4 = vcombine.low %v15_v46, %v15_v46  ;;  %1799 = vset.pattern.permute.xlu0 %v2101_v13 }
  0x12   :  { %v1876_v52 = vld [vmem:[%s2752_s1 + $0x180] ss:$16 sps:$4 sm:$0xff]   ;;  %v1877_v53 = vld [vmem:[%s2752_s1 + $0x188] ss:$16 sps:$4 sm:$0xff]   ;;  %v1878_v54 = vld [vmem:[%s2752_s1 + $0x1a4] ss:$16 sps:$4 sm:$0xff]  }
  0x13   :  { %1238 = vmatpush1.bf16.msra.mxu0 %v1828_v18  ;;  %1402 = vmatpush1.bf16.msra.mxu1 %v1829_v19  ;;  %v1880_v55 = vld [vmem:[%s2752_s1 + $0x1ac] ss:$16 sps:$4 sm:$0xff]   ;;  %v1882_v56 = vld [vmem:[%s2752_s1 + $0x1a0] ss:$16 sps:$4 sm:$0xff]   ;;  %v1883_v57 = vld [vmem:[%s2752_s1 + $0x1a8] ss:$16 sps:$4 sm:$0xff]  }
  0x14   :  { %1239 = vmatprep.subr.bf16.mxu0 %v1830_v20  ;;  %1403 = vmatprep.subr.bf16.mxu1 %v1832_v21  ;;  %v1884_v58 = vld [vmem:[%s2752_s1 + $0x1c4] ss:$16 sps:$4 sm:$0xff]   ;;  %v1886_v59 = vld [vmem:[%s2752_s1 + $0x1cc] ss:$16 sps:$4 sm:$0xff]   ;;  %v1888_v60 = vld [vmem:[%s2752_s1 + $0x1c0] ss:$16 sps:$4 sm:$0xff]  }
  0x15   :  { %1261 = vmatprep.mubr.bf16.mxu0 %v1566_v48  ;;  %1425 = vmatprep.mubr.bf16.mxu1 %v1566_v48  ;;  %v1889_v61 = vld [vmem:[%s2752_s1 + $0x1c8] ss:$16 sps:$4 sm:$0xff]   ;;  %v1890_v62 = vld [vmem:[%s2752_s1 + $0x1e4] ss:$16 sps:$4 sm:$0xff]   ;;  %v1892_v63 = vld [vmem:[%s2752_s1 + $0x1ec] ss:$16 sps:$4 sm:$0xff]  }
  0x16   :  { %v1894_v0 = vld [vmem:[%s2752_s1 + $0x1e0] ss:$16 sps:$4 sm:$0xff]   ;;  %v1895_v1 = vld [vmem:[%s2752_s1 + $0x1e8] ss:$16 sps:$4 sm:$0xff]   ;;  %v1901_v2 = vld [vmem:[%s2752_s1 + $0x204] ss:$16 sps:$4 sm:$0xff]  }
  0x17   :  { %1240 = vmatpush1.bf16.msra.mxu0 %v1834_v22  ;;  %1404 = vmatpush1.bf16.msra.mxu1 %v1835_v23  ;;  %v1904_v3 = vld [vmem:[%s2752_s1 + $0x20c] ss:$16 sps:$4 sm:$0xff]   ;;  %v1899_v5 = vld [vmem:[%s2752_s1 + $0x200] ss:$16 sps:$4 sm:$0xff]   ;;  %v1902_v6 = vld [vmem:[%s2752_s1 + $0x208] ss:$16 sps:$4 sm:$0xff]  }
  0x18   :  { %1241 = vmatprep.subr.bf16.mxu0 %v1836_v24  ;;  %1405 = vmatprep.subr.bf16.mxu1 %v1838_v25  ;;  %v1907_v7 = vld [vmem:[%s2752_s1 + $0x224] ss:$16 sps:$4 sm:$0xff]   ;;  %v1910_v8 = vld [vmem:[%s2752_s1 + $0x22c] ss:$16 sps:$4 sm:$0xff]   ;;  %v1905_v9 = vld [vmem:[%s2752_s1 + $0x220] ss:$16 sps:$4 sm:$0xff]  }
  0x19   :  { %v1908_v10 = vld [vmem:[%s2752_s1 + $0x228] ss:$16 sps:$4 sm:$0xff]   ;;  %v1913_v11 = vld [vmem:[%s2752_s1 + $0x244] ss:$16 sps:$4 sm:$0xff]   ;;  %v1916_v12 = vld [vmem:[%s2752_s1 + $0x24c] ss:$16 sps:$4 sm:$0xff]  }
  0x1a   :  { %v1911_v14 = vld [vmem:[%s2752_s1 + $0x240] ss:$16 sps:$4 sm:$0xff]   ;;  %v1914_v15 = vld [vmem:[%s2752_s1 + $0x248] ss:$16 sps:$4 sm:$0xff]   ;;  %v1919_v16 = vld [vmem:[%s2752_s1 + $0x264] ss:$16 sps:$4 sm:$0xff]  }
  0x1b   :  { %1242 = vmatpush1.bf16.msra.mxu0 %v1840_v26  ;;  %1406 = vmatpush1.bf16.msra.mxu1 %v1841_v27  ;;  %v1922_v17 = vld [vmem:[%s2752_s1 + $0x26c] ss:$16 sps:$4 sm:$0xff]   ;;  %v1917_v18 = vld [vmem:[%s2752_s1 + $0x260] ss:$16 sps:$4 sm:$0xff]   ;;  %v1920_v19 = vld [vmem:[%s2752_s1 + $0x268] ss:$16 sps:$4 sm:$0xff]  }
  0x1c   :  { %1243 = vmatprep.subr.bf16.mxu0 %v1842_v28  ;;  %1407 = vmatprep.subr.bf16.mxu1 %v1844_v29  ;;  %v1925_v20 = vld [vmem:[%s2752_s1 + $0x284] ss:$16 sps:$4 sm:$0xff]   ;;  %v1928_v21 = vld [vmem:[%s2752_s1 + $0x28c] ss:$16 sps:$4 sm:$0xff]   ;;  %v1923_v22 = vld [vmem:[%s2752_s1 + $0x280] ss:$16 sps:$4 sm:$0xff]  }
  0x1d   :  { %v1926_v23 = vld [vmem:[%s2752_s1 + $0x288] ss:$16 sps:$4 sm:$0xff]   ;;  %v1931_v24 = vld [vmem:[%s2752_s1 + $0x2a4] ss:$16 sps:$4 sm:$0xff]   ;;  %v1934_v25 = vld [vmem:[%s2752_s1 + $0x2ac] ss:$16 sps:$4 sm:$0xff]  }
  0x1e   :  { %v1929_v26 = vld [vmem:[%s2752_s1 + $0x2a0] ss:$16 sps:$4 sm:$0xff]   ;;  %v1932_v27 = vld [vmem:[%s2752_s1 + $0x2a8] ss:$16 sps:$4 sm:$0xff]   ;;  %v1937_v28 = vld [vmem:[%s2752_s1 + $0x2c4] ss:$16 sps:$4 sm:$0xff]  }
  0x1f   :  { %1244 = vmatpush1.bf16.msra.mxu0 %v1846_v30  ;;  %1408 = vmatpush1.bf16.msra.mxu1 %v1847_v31  ;;  %v1940_v29 = vld [vmem:[%s2752_s1 + $0x2cc] ss:$16 sps:$4 sm:$0xff]   ;;  %v1935_v31 = vld [vmem:[%s2752_s1 + $0x2c0] ss:$16 sps:$4 sm:$0xff]   ;;  %v1961_v46 = vld [vmem:[%s2752_s1 + $0x344] ss:$16 sps:$4 sm:$0xff]  }
  0x20   :  { %1245 = vmatprep.subr.bf16.mxu0 %v1848_v32  ;;  %1409 = vmatprep.subr.bf16.mxu1 %v1850_v33  ;;  %v2399_v30 = vld [vmem:[%s2753_s0 + $0x8] sm:$0xff]  ;;  %v1959_v48 = vld [vmem:[%s2752_s1 + $0x340] ss:$16 sps:$4 sm:$0xff]  }
  0x21   :  { %v1938_v32 = vld [vmem:[%s2752_s1 + $0x2c8] ss:$16 sps:$4 sm:$0xff]   ;;  %v1568_v33 = vcombine.high %v2399_v30, %v2399_v30 }
  0x23   :  { %1246 = vmatpush1.bf16.msra.mxu0 %v1852_v34  ;;  %1410 = vmatpush1.bf16.msra.mxu1 %v1853_v35  ;;  %v1943_v34 = vld [vmem:[%s2752_s1 + $0x2e4] ss:$16 sps:$4 sm:$0xff]   ;;  %v1946_v35 = vld [vmem:[%s2752_s1 + $0x2ec] ss:$16 sps:$4 sm:$0xff]  }
  0x24   :  { %1247 = vmatprep.subr.bf16.mxu0 %v1854_v36  ;;  %1411 = vmatprep.subr.bf16.mxu1 %v1856_v37  ;;  %v1941_v36 = vld [vmem:[%s2752_s1 + $0x2e0] ss:$16 sps:$4 sm:$0xff]   ;;  %v1944_v37 = vld [vmem:[%s2752_s1 + $0x2e8] ss:$16 sps:$4 sm:$0xff]  }
  0x27   :  { %1248 = vmatpush1.bf16.msra.mxu0 %v1858_v38  ;;  %1412 = vmatpush1.bf16.msra.mxu1 %v1859_v39  ;;  %v1949_v38 = vld [vmem:[%s2752_s1 + $0x304] ss:$16 sps:$4 sm:$0xff]   ;;  %v1952_v39 = vld [vmem:[%s2752_s1 + $0x30c] ss:$16 sps:$4 sm:$0xff]  }
  0x28   :  { %1249 = vmatprep.subr.bf16.mxu0 %v1860_v40  ;;  %1413 = vmatprep.subr.bf16.mxu1 %v1862_v41  ;;  %v1947_v40 = vld [vmem:[%s2752_s1 + $0x300] ss:$16 sps:$4 sm:$0xff]   ;;  %v1950_v41 = vld [vmem:[%s2752_s1 + $0x308] ss:$16 sps:$4 sm:$0xff]  }
  0x2b   :  { %1250 = vmatpush1.bf16.msra.mxu0 %v1864_v42  ;;  %1414 = vmatpush1.bf16.msra.mxu1 %v1865_v43  ;;  %v1955_v42 = vld [vmem:[%s2752_s1 + $0x324] ss:$16 sps:$4 sm:$0xff]   ;;  %v1958_v43 = vld [vmem:[%s2752_s1 + $0x32c] ss:$16 sps:$4 sm:$0xff]  }
  0x2c   :  { %1251 = vmatprep.subr.bf16.mxu0 %v1866_v44  ;;  %1415 = vmatprep.subr.bf16.mxu1 %v1868_v45  ;;  %v1953_v44 = vld [vmem:[%s2752_s1 + $0x320] ss:$16 sps:$4 sm:$0xff]   ;;  %v1956_v45 = vld [vmem:[%s2752_s1 + $0x328] ss:$16 sps:$4 sm:$0xff]  }
  0x2f   :  { %1252 = vmatpush1.bf16.msra.mxu0 %v1870_v47  ;;  %1416 = vmatpush1.bf16.msra.mxu1 %v1871_v49  ;;  %v1964_v47 = vld [vmem:[%s2752_s1 + $0x34c] ss:$16 sps:$4 sm:$0xff]   ;;  %v1962_v49 = vld [vmem:[%s2752_s1 + $0x348] ss:$16 sps:$4 sm:$0xff]  }
  0x30   :  { %1253 = vmatprep.subr.bf16.mxu0 %v1872_v50  ;;  %1417 = vmatprep.subr.bf16.mxu1 %v1874_v51  ;;  %v1967_v50 = vld [vmem:[%s2752_s1 + $0x364] ss:$16 sps:$4 sm:$0xff]   ;;  %v1970_v51 = vld [vmem:[%s2752_s1 + $0x36c] ss:$16 sps:$4 sm:$0xff]  }
  0x33   :  { %1254 = vmatpush1.bf16.msra.mxu0 %v1876_v52  ;;  %1418 = vmatpush1.bf16.msra.mxu1 %v1877_v53  ;;  %v1965_v52 = vld [vmem:[%s2752_s1 + $0x360] ss:$16 sps:$4 sm:$0xff]   ;;  %v1968_v53 = vld [vmem:[%s2752_s1 + $0x368] ss:$16 sps:$4 sm:$0xff]  }
  0x34   :  { %1255 = vmatprep.subr.bf16.mxu0 %v1878_v54  ;;  %1419 = vmatprep.subr.bf16.mxu1 %v1880_v55  ;;  %v1973_v54 = vld [vmem:[%s2752_s1 + $0x384] ss:$16 sps:$4 sm:$0xff]   ;;  %v1976_v55 = vld [vmem:[%s2752_s1 + $0x38c] ss:$16 sps:$4 sm:$0xff]  }
  0x37   :  { %1256 = vmatpush1.bf16.msra.mxu0 %v1882_v56  ;;  %1420 = vmatpush1.bf16.msra.mxu1 %v1883_v57  ;;  %v1971_v56 = vld [vmem:[%s2752_s1 + $0x380] ss:$16 sps:$4 sm:$0xff]   ;;  %v1974_v57 = vld [vmem:[%s2752_s1 + $0x388] ss:$16 sps:$4 sm:$0xff]  }
  0x38   :  { %1257 = vmatprep.subr.bf16.mxu0 %v1884_v58  ;;  %1421 = vmatprep.subr.bf16.mxu1 %v1886_v59  ;;  %v1979_v58 = vld [vmem:[%s2752_s1 + $0x3a4] ss:$16 sps:$4 sm:$0xff]   ;;  %v1982_v59 = vld [vmem:[%s2752_s1 + $0x3ac] ss:$16 sps:$4 sm:$0xff]  }
  0x3b   :  { %1258 = vmatpush1.bf16.msra.mxu0 %v1888_v60  ;;  %1422 = vmatpush1.bf16.msra.mxu1 %v1889_v61  ;;  %v1977_v60 = vld [vmem:[%s2752_s1 + $0x3a0] ss:$16 sps:$4 sm:$0xff]   ;;  %v1980_v61 = vld [vmem:[%s2752_s1 + $0x3a8] ss:$16 sps:$4 sm:$0xff]  }
  0x3c   :  { %1259 = vmatprep.subr.bf16.mxu0 %v1890_v62  ;;  %1423 = vmatprep.subr.bf16.mxu1 %v1892_v63  ;;  %v1985_v62 = vld [vmem:[%s2752_s1 + $0x3c4] ss:$16 sps:$4 sm:$0xff]   ;;  %v1988_v63 = vld [vmem:[%s2752_s1 + $0x3cc] ss:$16 sps:$4 sm:$0xff]  }
  0x3f   :  { %1260 = vmatpush1.bf16.msra.mxu0 %v1894_v0  ;;  %1424 = vmatpush1.bf16.msra.mxu1 %v1895_v1  ;;  %v1983_v0 = vld [vmem:[%s2752_s1 + $0x3c0] ss:$16 sps:$4 sm:$0xff]   ;;  %v1986_v1 = vld [vmem:[%s2752_s1 + $0x3c8] ss:$16 sps:$4 sm:$0xff]  }
  0x40   :  { %1270 = vmatprep.subr.bf16.mxu0 %v1901_v2  ;;  %1434 = vmatprep.subr.bf16.mxu1 %v1904_v3  ;;  %v1991_v2 = vld [vmem:[%s2752_s1 + $0x3e4] ss:$16 sps:$4 sm:$0xff]   ;;  %v1994_v3 = vld [vmem:[%s2752_s1 + $0x3ec] ss:$16 sps:$4 sm:$0xff]  }
  0x42   :  { %1262 = vmatmul.mubr.bf16.vlgmr.msra.gmra.mrb[0].mxu0 %v1565_v4  ;;  %1426 = vmatmul.mubr.bf16.vlgmr.msra.gmra.mrb[0].mxu1 %v1565_v4  ;;  %v1989_v4 = vld [vmem:[%s2752_s1 + $0x3e0] ss:$16 sps:$4 sm:$0xff]  }
  0x43   :  { %1271 = vmatpush1.bf16.msra.mxu0 %v1899_v5  ;;  %1435 = vmatpush1.bf16.msra.mxu1 %v1902_v6  ;;  %v1992_v5 = vld [vmem:[%s2752_s1 + $0x3e8] ss:$16 sps:$4 sm:$0xff]   ;;  %v1999_v6 = vld [vmem:[%s2752_s1 + $0x404] ss:$16 sps:$4 sm:$0xff]  }
  0x44   :  { %1272 = vmatprep.subr.bf16.mxu0 %v1907_v7  ;;  %1436 = vmatprep.subr.bf16.mxu1 %v1910_v8  ;;  %v2002_v7 = vld [vmem:[%s2752_s1 + $0x40c] ss:$16 sps:$4 sm:$0xff]   ;;  %v1567_v8 = vcombine.low %v2399_v30, %v2399_v30  ;;  %v2024_v30 = vld [vmem:[%s2752_s1 + $0x488] ss:$16 sps:$4 sm:$0xff]  }
  0x45   :  { %1302 = vmatprep.mubr.bf16.mxu0 %v1568_v33  ;;  %1466 = vmatprep.mubr.bf16.mxu1 %v1568_v33  ;;  %v2027_v33 = vld [vmem:[%s2752_s1 + $0x4a0] ss:$16 sps:$4 sm:$0xff]  }
  0x47   :  { %1273 = vmatpush1.bf16.msra.mxu0 %v1905_v9  ;;  %1437 = vmatpush1.bf16.msra.mxu1 %v1908_v10  ;;  %v1997_v9 = vld [vmem:[%s2752_s1 + $0x400] ss:$16 sps:$4 sm:$0xff]   ;;  %v2000_v10 = vld [vmem:[%s2752_s1 + $0x408] ss:$16 sps:$4 sm:$0xff]  }
  0x48   :  { %1274 = vmatprep.subr.bf16.mxu0 %v1913_v11  ;;  %1438 = vmatprep.subr.bf16.mxu1 %v1916_v12  ;;  %v2005_v11 = vld [vmem:[%s2752_s1 + $0x424] ss:$16 sps:$4 sm:$0xff]   ;;  %v2008_v12 = vld [vmem:[%s2752_s1 + $0x42c] ss:$16 sps:$4 sm:$0xff]  }
  0x4b   :  { %1275 = vmatpush1.bf16.msra.mxu0 %v1911_v14  ;;  %1439 = vmatpush1.bf16.msra.mxu1 %v1914_v15  ;;  %v2540_v14 = vld [vmem:[%s2753_s0 + $0x10] sm:$0xff] }
  0x4c   :  { %1276 = vmatprep.subr.bf16.mxu0 %v1919_v16  ;;  %1440 = vmatprep.subr.bf16.mxu1 %v1922_v17  ;;  %v1570_v15 = vcombine.high %v2540_v14, %v2540_v14  ;;  %v2003_v16 = vld [vmem:[%s2752_s1 + $0x420] ss:$16 sps:$4 sm:$0xff]   ;;  %v2006_v17 = vld [vmem:[%s2752_s1 + $0x428] ss:$16 sps:$4 sm:$0xff]  }
  0x4f   :  { %1277 = vmatpush1.bf16.msra.mxu0 %v1917_v18  ;;  %1441 = vmatpush1.bf16.msra.mxu1 %v1920_v19  ;;  %v215_v18 = vld [vmem:[%s2754_s2] sm:$0xff] }
  0x50   :  { %1278 = vmatprep.subr.bf16.mxu0 %v1925_v20  ;;  %1442 = vmatprep.subr.bf16.mxu1 %v1928_v21  ;;  %v2011_v19 = vld [vmem:[%s2752_s1 + $0x444] ss:$16 sps:$4 sm:$0xff]   ;;  %v2014_v20 = vld [vmem:[%s2752_s1 + $0x44c] ss:$16 sps:$4 sm:$0xff]   ;;  %v2009_v21 = vld [vmem:[%s2752_s1 + $0x440] ss:$16 sps:$4 sm:$0xff]  }
  0x51   :  { %218 = vperm.xlu0 %1799, %v215_v18  }
  0x53   :  { %1279 = vmatpush1.bf16.msra.mxu0 %v1923_v22  ;;  %1443 = vmatpush1.bf16.msra.mxu1 %v1926_v23  ;;  %v2012_v22 = vld [vmem:[%s2752_s1 + $0x448] ss:$16 sps:$4 sm:$0xff]   ;;  %v2017_v23 = vld [vmem:[%s2752_s1 + $0x464] ss:$16 sps:$4 sm:$0xff]  }
  0x54   :  { %1280 = vmatprep.subr.bf16.mxu0 %v1931_v24  ;;  %1444 = vmatprep.subr.bf16.mxu1 %v1934_v25  ;;  %v2020_v24 = vld [vmem:[%s2752_s1 + $0x46c] ss:$16 sps:$4 sm:$0xff]   ;;  %v2015_v25 = vld [vmem:[%s2752_s1 + $0x460] ss:$16 sps:$4 sm:$0xff]  }
  0x57   :  { %1281 = vmatpush1.bf16.msra.mxu0 %v1929_v26  ;;  %1445 = vmatpush1.bf16.msra.mxu1 %v1932_v27  ;;  %v2018_v26 = vld [vmem:[%s2752_s1 + $0x468] ss:$16 sps:$4 sm:$0xff]   ;;  %v2023_v27 = vld [vmem:[%s2752_s1 + $0x484] ss:$16 sps:$4 sm:$0xff]  }
  0x58   :  { %1282 = vmatprep.subr.bf16.mxu0 %v1937_v28  ;;  %1446 = vmatprep.subr.bf16.mxu1 %v1940_v29  ;;  %v2026_v28 = vld [vmem:[%s2752_s1 + $0x48c] ss:$16 sps:$4 sm:$0xff]   ;;  %v2021_v29 = vld [vmem:[%s2752_s1 + $0x480] ss:$16 sps:$4 sm:$0xff]  }
  0x5b   :  { %1283 = vmatpush1.bf16.msra.mxu0 %v1935_v31  ;;  %1447 = vmatpush1.bf16.msra.mxu1 %v1938_v32  ;;  %v2029_v31 = vld [vmem:[%s2752_s1 + $0x4a4] ss:$16 sps:$4 sm:$0xff]   ;;  %v2032_v32 = vld [vmem:[%s2752_s1 + $0x4ac] ss:$16 sps:$4 sm:$0xff]  }
  0x5c   :  { %1284 = vmatprep.subr.bf16.mxu0 %v1943_v34  ;;  %1448 = vmatprep.subr.bf16.mxu1 %v1946_v35  ;;  %v2030_v34 = vld [vmem:[%s2752_s1 + $0x4a8] ss:$16 sps:$4 sm:$0xff]   ;;  %v2035_v35 = vld [vmem:[%s2752_s1 + $0x4c4] ss:$16 sps:$4 sm:$0xff]  }
  0x5f   :  { %1285 = vmatpush1.bf16.msra.mxu0 %v1941_v36  ;;  %1449 = vmatpush1.bf16.msra.mxu1 %v1944_v37  ;;  %v2038_v36 = vld [vmem:[%s2752_s1 + $0x4cc] ss:$16 sps:$4 sm:$0xff]   ;;  %v2033_v37 = vld [vmem:[%s2752_s1 + $0x4c0] ss:$16 sps:$4 sm:$0xff]  }
  0x60   :  { %1286 = vmatprep.subr.bf16.mxu0 %v1949_v38  ;;  %1450 = vmatprep.subr.bf16.mxu1 %v1952_v39  ;;  %v2036_v38 = vld [vmem:[%s2752_s1 + $0x4c8] ss:$16 sps:$4 sm:$0xff]   ;;  %v2041_v39 = vld [vmem:[%s2752_s1 + $0x4e4] ss:$16 sps:$4 sm:$0xff]  }
  0x63   :  { %1287 = vmatpush1.bf16.msra.mxu0 %v1947_v40  ;;  %1451 = vmatpush1.bf16.msra.mxu1 %v1950_v41  ;;  %v2044_v40 = vld [vmem:[%s2752_s1 + $0x4ec] ss:$16 sps:$4 sm:$0xff]   ;;  %v2039_v41 = vld [vmem:[%s2752_s1 + $0x4e0] ss:$16 sps:$4 sm:$0xff]  }
  0x64   :  { %1288 = vmatprep.subr.bf16.mxu0 %v1955_v42  ;;  %1452 = vmatprep.subr.bf16.mxu1 %v1958_v43  ;;  %v2042_v42 = vld [vmem:[%s2752_s1 + $0x4e8] ss:$16 sps:$4 sm:$0xff]   ;;  %v2047_v43 = vld [vmem:[%s2752_s1 + $0x504] ss:$16 sps:$4 sm:$0xff]  }
  0x67   :  { %1289 = vmatpush1.bf16.msra.mxu0 %v1953_v44  ;;  %1453 = vmatpush1.bf16.msra.mxu1 %v1956_v45  ;;  %v2050_v44 = vld [vmem:[%s2752_s1 + $0x50c] ss:$16 sps:$4 sm:$0xff]   ;;  %v2045_v45 = vld [vmem:[%s2752_s1 + $0x500] ss:$16 sps:$4 sm:$0xff]  }
  0x68   :  { %1290 = vmatprep.subr.bf16.mxu0 %v1961_v46  ;;  %1454 = vmatprep.subr.bf16.mxu1 %v1964_v47  ;;  %v2048_v46 = vld [vmem:[%s2752_s1 + $0x508] ss:$16 sps:$4 sm:$0xff]   ;;  %v2053_v47 = vld [vmem:[%s2752_s1 + $0x524] ss:$16 sps:$4 sm:$0xff]  }
  0x6b   :  { %1291 = vmatpush1.bf16.msra.mxu0 %v1959_v48  ;;  %1455 = vmatpush1.bf16.msra.mxu1 %v1962_v49  ;;  %v2056_v48 = vld [vmem:[%s2752_s1 + $0x52c] ss:$16 sps:$4 sm:$0xff]   ;;  %v2051_v49 = vld [vmem:[%s2752_s1 + $0x520] ss:$16 sps:$4 sm:$0xff]  }
  0x6c   :  { %1292 = vmatprep.subr.bf16.mxu0 %v1967_v50  ;;  %1456 = vmatprep.subr.bf16.mxu1 %v1970_v51  ;;  %v2054_v50 = vld [vmem:[%s2752_s1 + $0x528] ss:$16 sps:$4 sm:$0xff]   ;;  %v2059_v51 = vld [vmem:[%s2752_s1 + $0x544] ss:$16 sps:$4 sm:$0xff]  }
  0x6f   :  { %1293 = vmatpush1.bf16.msra.mxu0 %v1965_v52  ;;  %1457 = vmatpush1.bf16.msra.mxu1 %v1968_v53  ;;  %v2062_v52 = vld [vmem:[%s2752_s1 + $0x54c] ss:$16 sps:$4 sm:$0xff]   ;;  %v2057_v53 = vld [vmem:[%s2752_s1 + $0x540] ss:$16 sps:$4 sm:$0xff]  }
  0x70   :  { %1294 = vmatprep.subr.bf16.mxu0 %v1973_v54  ;;  %1458 = vmatprep.subr.bf16.mxu1 %v1976_v55  ;;  %v2060_v54 = vld [vmem:[%s2752_s1 + $0x548] ss:$16 sps:$4 sm:$0xff]   ;;  %v2065_v55 = vld [vmem:[%s2752_s1 + $0x564] ss:$16 sps:$4 sm:$0xff]  }
  0x73   :  { %1295 = vmatpush1.bf16.msra.mxu0 %v1971_v56  ;;  %1459 = vmatpush1.bf16.msra.mxu1 %v1974_v57  ;;  %v2068_v56 = vld [vmem:[%s2752_s1 + $0x56c] ss:$16 sps:$4 sm:$0xff]   ;;  %v2063_v57 = vld [vmem:[%s2752_s1 + $0x560] ss:$16 sps:$4 sm:$0xff]  }
  0x74   :  { %1296 = vmatprep.subr.bf16.mxu0 %v1979_v58  ;;  %1460 = vmatprep.subr.bf16.mxu1 %v1982_v59  ;;  %v2066_v58 = vld [vmem:[%s2752_s1 + $0x568] ss:$16 sps:$4 sm:$0xff]   ;;  %v2071_v59 = vld [vmem:[%s2752_s1 + $0x584] ss:$16 sps:$4 sm:$0xff]  }
  0x77   :  { %1297 = vmatpush1.bf16.msra.mxu0 %v1977_v60  ;;  %1461 = vmatpush1.bf16.msra.mxu1 %v1980_v61  ;;  %v2074_v60 = vld [vmem:[%s2752_s1 + $0x58c] ss:$16 sps:$4 sm:$0xff]   ;;  %v2069_v61 = vld [vmem:[%s2752_s1 + $0x580] ss:$16 sps:$4 sm:$0xff]  }
  0x78   :  { %1298 = vmatprep.subr.bf16.mxu0 %v1985_v62  ;;  %1462 = vmatprep.subr.bf16.mxu1 %v1988_v63  ;;  %v2072_v62 = vld [vmem:[%s2752_s1 + $0x588] ss:$16 sps:$4 sm:$0xff]   ;;  %v2077_v63 = vld [vmem:[%s2752_s1 + $0x5a4] ss:$16 sps:$4 sm:$0xff]  }
  0x7b   :  { %1299 = vmatpush1.bf16.msra.mxu0 %v1983_v0  ;;  %1463 = vmatpush1.bf16.msra.mxu1 %v1986_v1  ;;  %v2080_v0 = vld [vmem:[%s2752_s1 + $0x5ac] ss:$16 sps:$4 sm:$0xff]   ;;  %v2075_v1 = vld [vmem:[%s2752_s1 + $0x5a0] ss:$16 sps:$4 sm:$0xff]  }
  0x7c   :  { %1300 = vmatprep.subr.bf16.mxu0 %v1991_v2  ;;  %1464 = vmatprep.subr.bf16.mxu1 %v1994_v3  ;;  %v2078_v2 = vld [vmem:[%s2752_s1 + $0x5a8] ss:$16 sps:$4 sm:$0xff]   ;;  %v2083_v3 = vld [vmem:[%s2752_s1 + $0x5c4] ss:$16 sps:$4 sm:$0xff]  }
  0x7f   :  { %1301 = vmatpush1.bf16.msra.mxu0 %v1989_v4  ;;  %1465 = vmatpush1.bf16.msra.mxu1 %v1992_v5  ;;  %v2086_v4 = vld [vmem:[%s2752_s1 + $0x5cc] ss:$16 sps:$4 sm:$0xff]   ;;  %v2081_v5 = vld [vmem:[%s2752_s1 + $0x5c0] ss:$16 sps:$4 sm:$0xff]  }
  0x80   :  { %1311 = vmatprep.subr.bf16.mxu0 %v1999_v6  ;;  %1475 = vmatprep.subr.bf16.mxu1 %v2002_v7  ;;  %v2084_v6 = vld [vmem:[%s2752_s1 + $0x5c8] ss:$16 sps:$4 sm:$0xff]   ;;  %v2089_v7 = vld [vmem:[%s2752_s1 + $0x5e4] ss:$16 sps:$4 sm:$0xff]  }
  0x82   :  { %1303 = vmatmul.mubr.bf16.vlgmr.msra.gmra.mrb[0].mxu0 %v1567_v8  ;;  %1467 = vmatmul.mubr.bf16.vlgmr.msra.gmra.mrb[0].mxu1 %v1567_v8  ;;  %v2092_v8 = vld [vmem:[%s2752_s1 + $0x5ec] ss:$16 sps:$4 sm:$0xff]  }
  0x83   :  { %1312 = vmatpush1.bf16.msra.mxu0 %v1997_v9  ;;  %1476 = vmatpush1.bf16.msra.mxu1 %v2000_v10  ;;  %v2087_v9 = vld [vmem:[%s2752_s1 + $0x5e0] ss:$16 sps:$4 sm:$0xff]   ;;  %v2090_v10 = vld [vmem:[%s2752_s1 + $0x5e8] ss:$16 sps:$4 sm:$0xff]  }
  0x84   :  { %1313 = vmatprep.subr.bf16.mxu0 %v2005_v11  ;;  %1477 = vmatprep.subr.bf16.mxu1 %v2008_v12  ;;  %v2097_v11 = vld [vmem:[%s2752_s1 + $0x604] ss:$16 sps:$4 sm:$0xff]   ;;  %v2100_v12 = vld [vmem:[%s2752_s1 + $0x60c] ss:$16 sps:$4 sm:$0xff]  }
  0x85   :  { %1343 = vmatprep.mubr.bf16.mxu0 %v1570_v15  ;;  %1507 = vmatprep.mubr.bf16.mxu1 %v1570_v15  ;;  %v1569_v15 = vcombine.low %v2540_v14, %v2540_v14  ;;  %v1898_v14 = vld [vmem:[%s2753_s0 + $0x18] ss:$0 sps:$4 sm:$0xff]  }
  0x87   :  { %1314 = vmatpush1.bf16.msra.mxu0 %v2003_v16  ;;  %1478 = vmatpush1.bf16.msra.mxu1 %v2006_v17  ;;  %v2095_v16 = vld [vmem:[%s2752_s1 + $0x600] ss:$16 sps:$4 sm:$0xff]   ;;  %v2098_v17 = vld [vmem:[%s2752_s1 + $0x608] ss:$16 sps:$4 sm:$0xff]  }
  0x88   :  { %1315 = vmatprep.subr.bf16.mxu0 %v2011_v19  ;;  %1479 = vmatprep.subr.bf16.mxu1 %v2014_v20 }
  0x8b   :  { %1316 = vmatpush1.bf16.msra.mxu0 %v2009_v21  ;;  %1480 = vmatpush1.bf16.msra.mxu1 %v2012_v22 }
  0x8c   :  { %1317 = vmatprep.subr.bf16.mxu0 %v2017_v23  ;;  %1481 = vmatprep.subr.bf16.mxu1 %v2020_v24 }
  0x8f   :  { %1318 = vmatpush1.bf16.msra.mxu0 %v2015_v25  ;;  %1482 = vmatpush1.bf16.msra.mxu1 %v2018_v26 }
  0x90   :  { %1319 = vmatprep.subr.bf16.mxu0 %v2023_v27  ;;  %1483 = vmatprep.subr.bf16.mxu1 %v2026_v28 }
  0x93   :  { %1320 = vmatpush1.bf16.msra.mxu0 %v2021_v29  ;;  %1484 = vmatpush1.bf16.msra.mxu1 %v2024_v30 }
  0x94   :  { %1321 = vmatprep.subr.bf16.mxu0 %v2029_v31  ;;  %1485 = vmatprep.subr.bf16.mxu1 %v2032_v32 }
  0x97   :  { %1322 = vmatpush1.bf16.msra.mxu0 %v2027_v33  ;;  %1486 = vmatpush1.bf16.msra.mxu1 %v2030_v34 }
  0x98   :  { %1323 = vmatprep.subr.bf16.mxu0 %v2035_v35  ;;  %1487 = vmatprep.subr.bf16.mxu1 %v2038_v36 }
  0x9b   :  { %1324 = vmatpush1.bf16.msra.mxu0 %v2033_v37  ;;  %1488 = vmatpush1.bf16.msra.mxu1 %v2036_v38 }
  0x9c   :  { %1325 = vmatprep.subr.bf16.mxu0 %v2041_v39  ;;  %1489 = vmatprep.subr.bf16.mxu1 %v2044_v40 }
  0x9f   :  { %1326 = vmatpush1.bf16.msra.mxu0 %v2039_v41  ;;  %1490 = vmatpush1.bf16.msra.mxu1 %v2042_v42 }
  0xa0   :  { %1327 = vmatprep.subr.bf16.mxu0 %v2047_v43  ;;  %1491 = vmatprep.subr.bf16.mxu1 %v2050_v44 }
  0xa3   :  { %1328 = vmatpush1.bf16.msra.mxu0 %v2045_v45  ;;  %1492 = vmatpush1.bf16.msra.mxu1 %v2048_v46 }
  0xa4   :  { %1329 = vmatprep.subr.bf16.mxu0 %v2053_v47  ;;  %1493 = vmatprep.subr.bf16.mxu1 %v2056_v48 }
  0xa7   :  { %1330 = vmatpush1.bf16.msra.mxu0 %v2051_v49  ;;  %1494 = vmatpush1.bf16.msra.mxu1 %v2054_v50 }
  0xa8   :  { %1331 = vmatprep.subr.bf16.mxu0 %v2059_v51  ;;  %1495 = vmatprep.subr.bf16.mxu1 %v2062_v52 }
  0xab   :  { %1332 = vmatpush1.bf16.msra.mxu0 %v2057_v53  ;;  %1496 = vmatpush1.bf16.msra.mxu1 %v2060_v54 }
  0xac   :  { %1333 = vmatprep.subr.bf16.mxu0 %v2065_v55  ;;  %1497 = vmatprep.subr.bf16.mxu1 %v2068_v56 }
  0xaf   :  { %1334 = vmatpush1.bf16.msra.mxu0 %v2063_v57  ;;  %1498 = vmatpush1.bf16.msra.mxu1 %v2066_v58 }
  0xb0   :  { %1335 = vmatprep.subr.bf16.mxu0 %v2071_v59  ;;  %1499 = vmatprep.subr.bf16.mxu1 %v2074_v60 }
  0xb3   :  { %1336 = vmatpush1.bf16.msra.mxu0 %v2069_v61  ;;  %1500 = vmatpush1.bf16.msra.mxu1 %v2072_v62 }
  0xb4   :  { %1337 = vmatprep.subr.bf16.mxu0 %v2077_v63  ;;  %1501 = vmatprep.subr.bf16.mxu1 %v2080_v0 }
  0xb7   :  { %1338 = vmatpush1.bf16.msra.mxu0 %v2075_v1  ;;  %1502 = vmatpush1.bf16.msra.mxu1 %v2078_v2 }
  0xb8   :  { %1339 = vmatprep.subr.bf16.mxu0 %v2083_v3  ;;  %1503 = vmatprep.subr.bf16.mxu1 %v2086_v4 }
  0xbb   :  { %1340 = vmatpush1.bf16.msra.mxu0 %v2081_v5  ;;  %1504 = vmatpush1.bf16.msra.mxu1 %v2084_v6 }
  0xbc   :  { %1341 = vmatprep.subr.bf16.mxu0 %v2089_v7  ;;  %1505 = vmatprep.subr.bf16.mxu1 %v2092_v8 }
  0xbf   :  { %1342 = vmatpush1.bf16.msra.mxu0 %v2087_v9  ;;  %1506 = vmatpush1.bf16.msra.mxu1 %v2090_v10 }
  0xc0   :  { %1352 = vmatprep.subr.bf16.mxu0 %v2097_v11  ;;  %1516 = vmatprep.subr.bf16.mxu1 %v2100_v12 }
  0xc2   :  { %1344 = vmatmul.mubr.bf16.vlgmr.msra.gmra.mrb[0].mxu0 %v1569_v15  ;;  %1508 = vmatmul.mubr.bf16.vlgmr.msra.gmra.mrb[0].mxu1 %v1569_v15 }
  0xc3   :  { %1353 = vmatpush1.bf16.msra.mxu0 %v2095_v16  ;;  %1517 = vmatpush1.bf16.msra.mxu1 %v2098_v17 }
  0xc4   :  { %1384 = vmatprep.mubr.bf16.mxu0 %v2101_v13  ;;  %1548 = vmatprep.mubr.bf16.mxu1 %v2101_v13 }
  0xce   :  { %1768 = vmatmul.mubr.msk.bf16.vlgmr.msra.gmra.mrb[0].mxu0 %vm1225_vm0, %v1898_v14  ;;  %1769 = vmatmul.mubr.msk.bf16.vlgmr.msra.gmra.mrb[0].mxu1 %vm1225_vm0, %v1898_v14 }
  0xd0   :  { %v219_v18 = vpop.permute.xlu0 %218 }
 0x1a1   :  { %v1386_v19 = vpop.f32.mrb[0].mxu0  ;;  %v1550_v20 = vpop.f32.mrb[0].mxu1 }
 0x1a2   :  { %v1770_v21 = vadd.f32 %v1386_v19, %v219_v18  ;;  %v1772_v22 = vadd.f32 %v1550_v20, %v219_v18  ;;  %v1388_v23 = vpop.f32.mrb[1].mxu0  ;;  %v1552_v24 = vpop.f32.mrb[1].mxu1 }
 0x1a3   :  { %v1771_v25 = vadd.f32 %v1388_v23, %v219_v18  ;;  %v1773_v26 = vadd.f32 %v1552_v24, %v219_v18  ;;  %v1390_v27 = vpop.f32.mrb[2].mxu0  ;;  %v1554_v28 = vpop.f32.mrb[2].mxu1 }
 0x1a4   :  { %1557 = vst [vmem:[%s2755_s3] sm:$0xff] %v1770_v21  ;;  %1559 = vst [vmem:[%s2755_s3 + $0x10] sm:$0xff] %v1772_v22  ;;  %v1391_v13 = vpop.f32.mrb[3].mxu0  ;;  %v1555_v29 = vpop.f32.mrb[3].mxu1 }
 0x1a5   :  { %1558 = vst [vmem:[%s2755_s3 + $0x8] sm:$0xff] %v1771_v25  ;;  %1560 = vst [vmem:[%s2755_s3 + $0x18] sm:$0xff] %v1773_v26 }

</bundles_post_ra>
